<compile_context>
chip_gen: v7x
topology: tpu7x:2x2x1
jax: 0.10.0
libtpu: 0.0.40
codegen_flags: <defaults>
</compile_context>

<pallas_src>
import math
from functools import partial

import jax
import jax.numpy as jnp
from jax import lax
from jax.experimental import pallas as pl
from jax.experimental.pallas import tpu as pltpu


def _layer_norm_f32(x, w, b, eps=1e-5):
    """LayerNorm with f32 statistics (matches the fp16-safe torch LayerNorm)."""
    mu = jnp.mean(x, axis=-1, keepdims=True)
    var = jnp.mean((x - mu) ** 2, axis=-1, keepdims=True)
    return (x - mu) * lax.rsqrt(var + eps) * w + b


def rab_kernel(x_ref, ln1w_ref, ln1b_ref, wqkv_t_ref, bqkv_ref, wo_t_ref, bo_ref,
               ln2w_ref, ln2b_ref, wfc_t_ref, bfc_ref, wproj_t_ref, bproj_ref,
               out_ref, *, n_head):
    # One grid step = one batch element; the whole (L, D) sequence sits in VMEM.
    x = x_ref[0]                                   # (L, D), input dtype
    L, D = x.shape
    hd = D // n_head
    # No-op for f32 inputs; for bf16 inputs the residual could stay bf16 to
    # halve the activation footprint (feedback #9) -- kept f32 here for accuracy.
    xf = x.astype(jnp.float32)

    # ---------------- attention branch: x + out_proj(MHA(LN1(x))) ------------
    h = _layer_norm_f32(xf, ln1w_ref[0], ln1b_ref[0]).astype(jnp.bfloat16)

    # qkv = h @ W_qkv^T + b_qkv, with W_qkv already transposed to (D, 3D) and
    # the q-scale folded in.  bf16 operands, f32 accumulation on the MXU.
    qkv = jnp.dot(h, wqkv_t_ref[...],
                  preferred_element_type=jnp.float32) + bqkv_ref[0]     # (L, 3D) f32
    q = qkv[:, 0 * D:1 * D].astype(jnp.bfloat16)
    k = qkv[:, 1 * D:2 * D].astype(jnp.bfloat16)
    v = qkv[:, 2 * D:3 * D].astype(jnp.bfloat16)

    # Per-head attention with the output projection fused into a single f32
    # accumulator (no concat; only one (L, L) score tile live at a time).
    # For production n_head (12-16) convert this static unroll into a
    # lax.fori_loop over head-major tiles; at these sizes static is fine.
    attn = jnp.zeros((L, D), jnp.float32)
    for hi in range(n_head):
        lo, hi_ = hi * hd, (hi + 1) * hd
        qh = q[:, lo:hi_]                          # (L, hd) bf16 (scale pre-folded)
        kh = k[:, lo:hi_]
        vh = v[:, lo:hi_]
        # q @ k^T without materializing a transposed copy.
        s = lax.dot_general(qh, kh, (((1,), (1,)), ((), ())),
                            preferred_element_type=jnp.float32)          # (L, L) f32
        s = s - jnp.max(s, axis=-1, keepdims=True)
        p = jnp.exp(s)
        denom = jnp.sum(p, axis=-1, keepdims=True)
        p = p * pl.reciprocal(denom, approx=True)                        # EUP slot
        ctx = jnp.dot(p.astype(jnp.bfloat16), vh,
                      preferred_element_type=jnp.float32)                # (L, hd) f32
        # Fused out_proj: accumulate ctx @ W_o^T[:, head rows] (pre-transposed).
        attn = attn + jnp.dot(ctx.astype(jnp.bfloat16), wo_t_ref[lo:hi_, :],
                              preferred_element_type=jnp.float32)
    x1 = xf + attn + bo_ref[0]                                           # (L, D) f32

    # ---------------- MLP branch: x + c_proj(QuickGELU(c_fc(LN2(x)))) --------
    h2 = _layer_norm_f32(x1, ln2w_ref[0], ln2b_ref[0]).astype(jnp.bfloat16)
    f = jnp.dot(h2, wfc_t_ref[...],
                preferred_element_type=jnp.float32) + bfc_ref[0]         # (L, 4D) f32
    f = f * jax.nn.sigmoid(1.702 * f)                                    # QuickGELU (f32)
    m = jnp.dot(f.astype(jnp.bfloat16), wproj_t_ref[...],
                preferred_element_type=jnp.float32) + bproj_ref[0]       # (L, D) f32

    out_ref[0] = (x1 + m).astype(out_ref.dtype)


def _build_specs(L, D, single_buffer_weights):
    """BlockSpecs: per-batch x/out blocks; full, constant-index parameter blocks."""
    wkw = {}
    if single_buffer_weights:
        # Weight block indices never change across the grid -> double-buffering
        # them is pure VMEM waste (critical on v7x's 64 MiB VMEM).
        wkw["pipeline_mode"] = pl.Buffered(1)

    def wspec(shape):                      # large bf16 weight matrices
        return pl.BlockSpec(shape, lambda b: (0, 0), **wkw)

    def cspec(shape):                      # small f32 LN params / biases
        return pl.BlockSpec(shape, lambda b: (0, 0))

    in_specs = [
        pl.BlockSpec((1, L, D), lambda b: (b, 0, 0)),   # x, one batch per step
        cspec((1, D)), cspec((1, D)),                   # ln1 w, b
        wspec((D, 3 * D)), cspec((1, 3 * D)),           # W_qkv^T, b_qkv
        wspec((D, D)), cspec((1, D)),                   # W_o^T, b_o
        cspec((1, D)), cspec((1, D)),                   # ln2 w, b
        wspec((D, 4 * D)), cspec((1, 4 * D)),           # W_fc^T, b_fc
        wspec((4 * D, D)), cspec((1, D)),               # W_proj^T, b_proj
    ]
    out_spec = pl.BlockSpec((1, L, D), lambda b: (b, 0, 0))
    return in_specs, out_spec


def residual_attention_block(x_lnd, params, n_head):
    """x_lnd: (L, N, D) like torch nn.MultiheadAttention (seq-first).

    `params` are in the torch layout / f32:
      (ln1w, ln1b, W_qkv(3D,D), b_qkv(1,3D), W_o(D,D), b_o(1,D),
       ln2w, ln2b, W_fc(4D,D), b_fc(1,4D), W_proj(D,4D), b_proj(1,D))
    """
    ln1w, ln1b, wqkv, bqkv, wo, bo, ln2w, ln2b, wfc, bfc, wproj, bproj = params
    L, N, D = x_lnd.shape
    assert D % n_head == 0
    hd = D // n_head
    scale = 1.0 / math.sqrt(hd)

    # Fold the 1/sqrt(hd) q-scale into the q rows of the in-projection (free).
    q_scale = jnp.concatenate([jnp.full((D,), scale, jnp.float32),
                               jnp.ones((2 * D,), jnp.float32)])
    wqkv_s = wqkv * q_scale[:, None]
    bqkv_s = bqkv * q_scale[None, :]

    # Pre-transpose the projection weights (kernel never transposes) and store
    # them bf16 (halves weight DMA + VMEM).  In a real model do this once at
    # parameter-load time; under jit these are constant-folded anyway.
    wqkv_t = wqkv_s.T.astype(jnp.bfloat16)          # (D, 3D)
    wo_t = wo.T.astype(jnp.bfloat16)                # (D, D)
    wfc_t = wfc.T.astype(jnp.bfloat16)              # (D, 4D)
    wproj_t = wproj.T.astype(jnp.bfloat16)          # (4D, D)

    kernel_args = (ln1w, ln1b, wqkv_t, bqkv_s, wo_t, bo,
                   ln2w, ln2b, wfc_t, bfc, wproj_t, bproj)

    # torch convention is (L, N, D); the kernel runs batch-major.
    x = jnp.transpose(x_lnd, (1, 0, 2))             # (N, L, D)

    def run(single_buffer_weights):
        in_specs, out_spec = _build_specs(L, D, single_buffer_weights)
        return pl.pallas_call(
            partial(rab_kernel, n_head=n_head),
            out_shape=jax.ShapeDtypeStruct((N, L, D), x.dtype),
            grid=(N,),
            in_specs=in_specs,
            out_specs=out_spec,
            compiler_params=pltpu.CompilerParams(
                dimension_semantics=("parallel",),
                vmem_limit_bytes=64 * 1024 * 1024,
            ),
        )(x, *kernel_args)

    try:
        out = run(single_buffer_weights=True)
    except Exception:
        # Fallback if this Pallas build rejects pipeline_mode=pl.Buffered(1).
        out = run(single_buffer_weights=False)
    return jnp.transpose(out, (1, 0, 2))            # back to (L, N, D)


# ---------------- pure-JAX f32 reference (for correctness check) -------------
def reference(x_lnd, params, n_head):
    ln1w, ln1b, wqkv, bqkv, wo, bo, ln2w, ln2b, wfc, bfc, wproj, bproj = params
    L, N, D = x_lnd.shape
    hd = D // n_head
    x = x_lnd.astype(jnp.float32)

    def ln(v, w, b):
        mu = v.mean(-1, keepdims=True)
        var = ((v - mu) ** 2).mean(-1, keepdims=True)
        return (v - mu) / jnp.sqrt(var + 1e-5) * w[0] + b[0]

    h = ln(x, ln1w, ln1b)
    qkv = h @ wqkv.T + bqkv[0]                      # (L, N, 3D)
    q, k, v = qkv[..., :D], qkv[..., D:2 * D], qkv[..., 2 * D:]
    q = q.reshape(L, N, n_head, hd) / math.sqrt(hd)
    k = k.reshape(L, N, n_head, hd)
    v = v.reshape(L, N, n_head, hd)
    s = jnp.einsum('qnhd,knhd->nhqk', q, k)
    p = jax.nn.softmax(s, axis=-1)
    a = jnp.einsum('nhqk,knhd->qnhd', p, v).reshape(L, N, D)
    a = a @ wo.T + bo[0]
    x = x + a
    h2 = ln(x, ln2w, ln2b)
    f = h2 @ wfc.T + bfc[0]
    f = f * jax.nn.sigmoid(1.702 * f)
    return x + (f @ wproj.T + bproj[0])


def init_params(key, d_model):
    keys = jax.random.split(key, 8)
    s = 0.02
    ln1w = jnp.ones((1, d_model), jnp.float32)
    ln1b = jnp.zeros((1, d_model), jnp.float32)
    wqkv = s * jax.random.normal(keys[0], (3 * d_model, d_model), jnp.float32)
    bqkv = s * jax.random.normal(keys[1], (1, 3 * d_model), jnp.float32)
    wo = s * jax.random.normal(keys[2], (d_model, d_model), jnp.float32)
    bo = s * jax.random.normal(keys[3], (1, d_model), jnp.float32)
    ln2w = jnp.ones((1, d_model), jnp.float32)
    ln2b = jnp.zeros((1, d_model), jnp.float32)
    wfc = s * jax.random.normal(keys[4], (4 * d_model, d_model), jnp.float32)
    bfc = s * jax.random.normal(keys[5], (1, 4 * d_model), jnp.float32)
    wproj = s * jax.random.normal(keys[6], (d_model, 4 * d_model), jnp.float32)
    bproj = s * jax.random.normal(keys[7], (1, d_model), jnp.float32)
    return (ln1w, ln1b, wqkv, bqkv, wo, bo, ln2w, ln2b, wfc, bfc, wproj, bproj)


if __name__ == "__main__":
    L, N, D, n_head = 8, 2, 32, 4               # seq, batch, d_model, heads
    key = jax.random.PRNGKey(0)
    kx, kp = jax.random.split(key)
    x = jax.random.normal(kx, (L, N, D), jnp.float32)
    params = init_params(kp, D)

    out = residual_attention_block(x, params, n_head)
    out = jax.block_until_ready(out)

    ref = reference(x, params, n_head)
    assert out.shape == (L, N, D)
    # bf16 matmul operands + approx reciprocal => compare against the f32
    # reference with a tolerance comfortably above the ~1e-3 mixed-precision
    # error floor but well below any structural mistake.
    max_diff = float(jnp.max(jnp.abs(out - ref)))
    assert jnp.allclose(out, ref, atol=5e-3, rtol=5e-3), f"max abs diff = {max_diff}"
    print("KERNEL_OK")
</pallas_src>

<mosaic_0001>
module attributes {stable_mosaic.version = 11 : i64} {
  func.func @rab_kernel(%arg0: i32, %arg1: memref<1x8x32xf32, #tpu.memory_space<vmem>>, %arg2: memref<1x32xf32, #tpu.memory_space<vmem>>, %arg3: memref<1x32xf32, #tpu.memory_space<vmem>>, %arg4: memref<32x96xbf16, #tpu.memory_space<vmem>>, %arg5: memref<1x96xf32, #tpu.memory_space<vmem>>, %arg6: memref<32x32xbf16, #tpu.memory_space<vmem>>, %arg7: memref<1x32xf32, #tpu.memory_space<vmem>>, %arg8: memref<1x32xf32, #tpu.memory_space<vmem>>, %arg9: memref<1x32xf32, #tpu.memory_space<vmem>>, %arg10: memref<32x128xbf16, #tpu.memory_space<vmem>>, %arg11: memref<1x128xf32, #tpu.memory_space<vmem>>, %arg12: memref<128x32xbf16, #tpu.memory_space<vmem>>, %arg13: memref<1x32xf32, #tpu.memory_space<vmem>>, %arg14: memref<1x8x32xf32, #tpu.memory_space<vmem>>) attributes {dimension_semantics = [#tpu.dimension_semantics<parallel>], iteration_bounds = array<i64: 2>, scalar_prefetch = 0 : i64, scratch_operands = 0 : i64, tpu.core_type = #tpu.core_type<tc>, window_params = [{transform_indices = @transform_0, window_bounds = array<i64: 1, 8, 32>}, {pipeline_mode = #tpu.pipeline_mode<synchronous>, transform_indices = @transform_1, window_bounds = array<i64: 1, 32>}, {pipeline_mode = #tpu.pipeline_mode<synchronous>, transform_indices = @transform_2, window_bounds = array<i64: 1, 32>}, {pipeline_mode = #tpu.pipeline_mode<synchronous>, transform_indices = @transform_3, window_bounds = array<i64: 32, 96>}, {pipeline_mode = #tpu.pipeline_mode<synchronous>, transform_indices = @transform_4, window_bounds = array<i64: 1, 96>}, {pipeline_mode = #tpu.pipeline_mode<synchronous>, transform_indices = @transform_5, window_bounds = array<i64: 32, 32>}, {pipeline_mode = #tpu.pipeline_mode<synchronous>, transform_indices = @transform_6, window_bounds = array<i64: 1, 32>}, {pipeline_mode = #tpu.pipeline_mode<synchronous>, transform_indices = @transform_7, window_bounds = array<i64: 1, 32>}, {pipeline_mode = #tpu.pipeline_mode<synchronous>, transform_indices = @transform_8, window_bounds = array<i64: 1, 32>}, {pipeline_mode = #tpu.pipeline_mode<synchronous>, transform_indices = @transform_9, window_bounds = array<i64: 32, 128>}, {pipeline_mode = #tpu.pipeline_mode<synchronous>, transform_indices = @transform_10, window_bounds = array<i64: 1, 128>}, {pipeline_mode = #tpu.pipeline_mode<synchronous>, transform_indices = @transform_11, window_bounds = array<i64: 128, 32>}, {pipeline_mode = #tpu.pipeline_mode<synchronous>, transform_indices = @transform_12, window_bounds = array<i64: 1, 32>}, {transform_indices = @transform_13, window_bounds = array<i64: 1, 8, 32>}]} {
    %c0 = arith.constant 0 : index
    %c0_0 = arith.constant 0 : index
    %c0_1 = arith.constant 0 : index
    %0 = vector.load %arg1[%c0, %c0_0, %c0_1] : memref<1x8x32xf32, #tpu.memory_space<vmem>>, vector<1x8x32xf32>
    %1 = vector.shape_cast %0 : vector<1x8x32xf32> to vector<8x32xf32>
    %c0_2 = arith.constant 0 : index
    %c0_3 = arith.constant 0 : index
    %2 = vector.load %arg2[%c0_2, %c0_3] : memref<1x32xf32, #tpu.memory_space<vmem>>, vector<1x32xf32>
    %3 = vector.shape_cast %2 : vector<1x32xf32> to vector<32xf32>
    %c0_4 = arith.constant 0 : index
    %c0_5 = arith.constant 0 : index
    %4 = vector.load %arg3[%c0_4, %c0_5] : memref<1x32xf32, #tpu.memory_space<vmem>>, vector<1x32xf32>
    %5 = vector.shape_cast %4 : vector<1x32xf32> to vector<32xf32>
    %cst = arith.constant dense<0.000000e+00> : vector<8xf32>
    %6 = vector.multi_reduction <add>, %1, %cst [1] : vector<8x32xf32> to vector<8xf32>
    %7 = vector.shape_cast %6 : vector<8xf32> to vector<8x1xf32>
    %cst_6 = arith.constant 3.200000e+01 : f32
    %8 = vector.broadcast %cst_6 : f32 to vector<8x1xf32>
    %9 = arith.divf %7, %8 : vector<8x1xf32>
    %10 = vector.broadcast %9 : vector<8x1xf32> to vector<8x32xf32>
    %11 = arith.subf %1, %10 : vector<8x32xf32>
    %12 = arith.mulf %11, %11 : vector<8x32xf32>
    %cst_7 = arith.constant dense<0.000000e+00> : vector<8xf32>
    %13 = vector.multi_reduction <add>, %12, %cst_7 [1] : vector<8x32xf32> to vector<8xf32>
    %14 = vector.shape_cast %13 : vector<8xf32> to vector<8x1xf32>
    %cst_8 = arith.constant 3.200000e+01 : f32
    %15 = vector.broadcast %cst_8 : f32 to vector<8x1xf32>
    %16 = arith.divf %14, %15 : vector<8x1xf32>
    %17 = vector.broadcast %9 : vector<8x1xf32> to vector<8x32xf32>
    %18 = arith.subf %1, %17 : vector<8x32xf32>
    %cst_9 = arith.constant 9.99999974E-6 : f32
    %19 = vector.broadcast %cst_9 : f32 to vector<8x1xf32>
    %20 = arith.addf %16, %19 : vector<8x1xf32>
    %21 = math.rsqrt %20 : vector<8x1xf32>
    %22 = vector.broadcast %21 : vector<8x1xf32> to vector<8x32xf32>
    %23 = arith.mulf %18, %22 : vector<8x32xf32>
    %24 = vector.shape_cast %3 : vector<32xf32> to vector<1x32xf32>
    %25 = vector.broadcast %24 : vector<1x32xf32> to vector<8x32xf32>
    %26 = arith.mulf %23, %25 : vector<8x32xf32>
    %27 = vector.shape_cast %5 : vector<32xf32> to vector<1x32xf32>
    %28 = vector.broadcast %27 : vector<1x32xf32> to vector<8x32xf32>
    %29 = arith.addf %26, %28 : vector<8x32xf32>
    %30 = arith.truncf %29 : vector<8x32xf32> to vector<8x32xbf16>
    %c0_10 = arith.constant 0 : index
    %c0_11 = arith.constant 0 : index
    %31 = vector.load %arg4[%c0_10, %c0_11] : memref<32x96xbf16, #tpu.memory_space<vmem>>, vector<32x96xbf16>
    %cst_12 = arith.constant dense<0.000000e+00> : vector<8x96xf32>
    %32 = tpu.matmul %30, %31, %cst_12 {dimension_numbers = #tpu.dot_dimension_numbers<[1], [0], [0], [1], [0, 0, 1, 1], [], []>} : vector<8x32xbf16>, vector<32x96xbf16>, vector<8x96xf32> -> vector<8x96xf32>
    %c0_13 = arith.constant 0 : index
    %c0_14 = arith.constant 0 : index
    %33 = vector.load %arg5[%c0_13, %c0_14] : memref<1x96xf32, #tpu.memory_space<vmem>>, vector<1x96xf32>
    %34 = vector.shape_cast %33 : vector<1x96xf32> to vector<96xf32>
    %35 = vector.shape_cast %34 : vector<96xf32> to vector<1x96xf32>
    %36 = vector.broadcast %35 : vector<1x96xf32> to vector<8x96xf32>
    %37 = arith.addf %32, %36 : vector<8x96xf32>
    %38 = vector.extract_strided_slice %37 {offsets = [0, 0], sizes = [8, 32], strides = [1, 1]} : vector<8x96xf32> to vector<8x32xf32>
    %39 = arith.truncf %38 : vector<8x32xf32> to vector<8x32xbf16>
    %40 = vector.extract_strided_slice %37 {offsets = [0, 32], sizes = [8, 32], strides = [1, 1]} : vector<8x96xf32> to vector<8x32xf32>
    %41 = arith.truncf %40 : vector<8x32xf32> to vector<8x32xbf16>
    %42 = vector.extract_strided_slice %37 {offsets = [0, 64], sizes = [8, 32], strides = [1, 1]} : vector<8x96xf32> to vector<8x32xf32>
    %43 = arith.truncf %42 : vector<8x32xf32> to vector<8x32xbf16>
    %cst_15 = arith.constant 0.000000e+00 : f32
    %44 = vector.broadcast %cst_15 : f32 to vector<8x32xf32>
    %45 = vector.extract_strided_slice %39 {offsets = [0, 0], sizes = [8, 8], strides = [1, 1]} : vector<8x32xbf16> to vector<8x8xbf16>
    %46 = vector.extract_strided_slice %41 {offsets = [0, 0], sizes = [8, 8], strides = [1, 1]} : vector<8x32xbf16> to vector<8x8xbf16>
    %47 = vector.extract_strided_slice %43 {offsets = [0, 0], sizes = [8, 8], strides = [1, 1]} : vector<8x32xbf16> to vector<8x8xbf16>
    %cst_16 = arith.constant dense<0.000000e+00> : vector<8x8xf32>
    %48 = tpu.matmul %45, %46, %cst_16 {dimension_numbers = #tpu.dot_dimension_numbers<[1], [1], [0], [0], [0, 0, 1, 0], [], []>} : vector<8x8xbf16>, vector<8x8xbf16>, vector<8x8xf32> -> vector<8x8xf32>
    %cst_17 = arith.constant dense<0xFF800000> : vector<8xf32>
    %49 = vector.multi_reduction <maximumf>, %48, %cst_17 [1] : vector<8x8xf32> to vector<8xf32>
    %50 = vector.shape_cast %49 : vector<8xf32> to vector<8x1xf32>
    %51 = vector.broadcast %50 : vector<8x1xf32> to vector<8x8xf32>
    %52 = arith.subf %48, %51 : vector<8x8xf32>
    %53 = math.exp %52 : vector<8x8xf32>
    %cst_18 = arith.constant dense<0.000000e+00> : vector<8xf32>
    %54 = vector.multi_reduction <add>, %53, %cst_18 [1] : vector<8x8xf32> to vector<8xf32>
    %55 = vector.shape_cast %54 : vector<8xf32> to vector<8x1xf32>
    %56 = tpu.reciprocal %55 {approx = true} : vector<8x1xf32> -> vector<8x1xf32>
    %57 = vector.broadcast %56 : vector<8x1xf32> to vector<8x8xf32>
    %58 = arith.mulf %53, %57 : vector<8x8xf32>
    %59 = arith.truncf %58 : vector<8x8xf32> to vector<8x8xbf16>
    %cst_19 = arith.constant dense<0.000000e+00> : vector<8x8xf32>
    %60 = tpu.matmul %59, %47, %cst_19 {dimension_numbers = #tpu.dot_dimension_numbers<[1], [0], [0], [1], [0, 0, 1, 1], [], []>} : vector<8x8xbf16>, vector<8x8xbf16>, vector<8x8xf32> -> vector<8x8xf32>
    %61 = arith.truncf %60 : vector<8x8xf32> to vector<8x8xbf16>
    %c0_20 = arith.constant 0 : index
    %c0_21 = arith.constant 0 : index
    %62 = vector.load %arg6[%c0_20, %c0_21] : memref<32x32xbf16, #tpu.memory_space<vmem>>, vector<8x32xbf16>
    %cst_22 = arith.constant dense<0.000000e+00> : vector<8x32xf32>
    %63 = tpu.matmul %61, %62, %cst_22 {dimension_numbers = #tpu.dot_dimension_numbers<[1], [0], [0], [1], [0, 0, 1, 1], [], []>} : vector<8x8xbf16>, vector<8x32xbf16>, vector<8x32xf32> -> vector<8x32xf32>
    %64 = arith.addf %44, %63 : vector<8x32xf32>
    %65 = vector.extract_strided_slice %39 {offsets = [0, 8], sizes = [8, 8], strides = [1, 1]} : vector<8x32xbf16> to vector<8x8xbf16>
    %66 = vector.extract_strided_slice %41 {offsets = [0, 8], sizes = [8, 8], strides = [1, 1]} : vector<8x32xbf16> to vector<8x8xbf16>
    %67 = vector.extract_strided_slice %43 {offsets = [0, 8], sizes = [8, 8], strides = [1, 1]} : vector<8x32xbf16> to vector<8x8xbf16>
    %cst_23 = arith.constant dense<0.000000e+00> : vector<8x8xf32>
    %68 = tpu.matmul %65, %66, %cst_23 {dimension_numbers = #tpu.dot_dimension_numbers<[1], [1], [0], [0], [0, 0, 1, 0], [], []>} : vector<8x8xbf16>, vector<8x8xbf16>, vector<8x8xf32> -> vector<8x8xf32>
    %cst_24 = arith.constant dense<0xFF800000> : vector<8xf32>
    %69 = vector.multi_reduction <maximumf>, %68, %cst_24 [1] : vector<8x8xf32> to vector<8xf32>
    %70 = vector.shape_cast %69 : vector<8xf32> to vector<8x1xf32>
    %71 = vector.broadcast %70 : vector<8x1xf32> to vector<8x8xf32>
    %72 = arith.subf %68, %71 : vector<8x8xf32>
    %73 = math.exp %72 : vector<8x8xf32>
    %cst_25 = arith.constant dense<0.000000e+00> : vector<8xf32>
    %74 = vector.multi_reduction <add>, %73, %cst_25 [1] : vector<8x8xf32> to vector<8xf32>
    %75 = vector.shape_cast %74 : vector<8xf32> to vector<8x1xf32>
    %76 = tpu.reciprocal %75 {approx = true} : vector<8x1xf32> -> vector<8x1xf32>
    %77 = vector.broadcast %76 : vector<8x1xf32> to vector<8x8xf32>
    %78 = arith.mulf %73, %77 : vector<8x8xf32>
    %79 = arith.truncf %78 : vector<8x8xf32> to vector<8x8xbf16>
    %cst_26 = arith.constant dense<0.000000e+00> : vector<8x8xf32>
    %80 = tpu.matmul %79, %67, %cst_26 {dimension_numbers = #tpu.dot_dimension_numbers<[1], [0], [0], [1], [0, 0, 1, 1], [], []>} : vector<8x8xbf16>, vector<8x8xbf16>, vector<8x8xf32> -> vector<8x8xf32>
    %81 = arith.truncf %80 : vector<8x8xf32> to vector<8x8xbf16>
    %c8 = arith.constant 8 : index
    %c0_27 = arith.constant 0 : index
    %82 = vector.load %arg6[%c8, %c0_27] : memref<32x32xbf16, #tpu.memory_space<vmem>>, vector<8x32xbf16>
    %cst_28 = arith.constant dense<0.000000e+00> : vector<8x32xf32>
    %83 = tpu.matmul %81, %82, %cst_28 {dimension_numbers = #tpu.dot_dimension_numbers<[1], [0], [0], [1], [0, 0, 1, 1], [], []>} : vector<8x8xbf16>, vector<8x32xbf16>, vector<8x32xf32> -> vector<8x32xf32>
    %84 = arith.addf %64, %83 : vector<8x32xf32>
    %85 = vector.extract_strided_slice %39 {offsets = [0, 16], sizes = [8, 8], strides = [1, 1]} : vector<8x32xbf16> to vector<8x8xbf16>
    %86 = vector.extract_strided_slice %41 {offsets = [0, 16], sizes = [8, 8], strides = [1, 1]} : vector<8x32xbf16> to vector<8x8xbf16>
    %87 = vector.extract_strided_slice %43 {offsets = [0, 16], sizes = [8, 8], strides = [1, 1]} : vector<8x32xbf16> to vector<8x8xbf16>
    %cst_29 = arith.constant dense<0.000000e+00> : vector<8x8xf32>
    %88 = tpu.matmul %85, %86, %cst_29 {dimension_numbers = #tpu.dot_dimension_numbers<[1], [1], [0], [0], [0, 0, 1, 0], [], []>} : vector<8x8xbf16>, vector<8x8xbf16>, vector<8x8xf32> -> vector<8x8xf32>
    %cst_30 = arith.constant dense<0xFF800000> : vector<8xf32>
    %89 = vector.multi_reduction <maximumf>, %88, %cst_30 [1] : vector<8x8xf32> to vector<8xf32>
    %90 = vector.shape_cast %89 : vector<8xf32> to vector<8x1xf32>
    %91 = vector.broadcast %90 : vector<8x1xf32> to vector<8x8xf32>
    %92 = arith.subf %88, %91 : vector<8x8xf32>
    %93 = math.exp %92 : vector<8x8xf32>
    %cst_31 = arith.constant dense<0.000000e+00> : vector<8xf32>
    %94 = vector.multi_reduction <add>, %93, %cst_31 [1] : vector<8x8xf32> to vector<8xf32>
    %95 = vector.shape_cast %94 : vector<8xf32> to vector<8x1xf32>
    %96 = tpu.reciprocal %95 {approx = true} : vector<8x1xf32> -> vector<8x1xf32>
    %97 = vector.broadcast %96 : vector<8x1xf32> to vector<8x8xf32>
    %98 = arith.mulf %93, %97 : vector<8x8xf32>
    %99 = arith.truncf %98 : vector<8x8xf32> to vector<8x8xbf16>
    %cst_32 = arith.constant dense<0.000000e+00> : vector<8x8xf32>
    %100 = tpu.matmul %99, %87, %cst_32 {dimension_numbers = #tpu.dot_dimension_numbers<[1], [0], [0], [1], [0, 0, 1, 1], [], []>} : vector<8x8xbf16>, vector<8x8xbf16>, vector<8x8xf32> -> vector<8x8xf32>
    %101 = arith.truncf %100 : vector<8x8xf32> to vector<8x8xbf16>
    %c16 = arith.constant 16 : index
    %c0_33 = arith.constant 0 : index
    %102 = vector.load %arg6[%c16, %c0_33] : memref<32x32xbf16, #tpu.memory_space<vmem>>, vector<8x32xbf16>
    %cst_34 = arith.constant dense<0.000000e+00> : vector<8x32xf32>
    %103 = tpu.matmul %101, %102, %cst_34 {dimension_numbers = #tpu.dot_dimension_numbers<[1], [0], [0], [1], [0, 0, 1, 1], [], []>} : vector<8x8xbf16>, vector<8x32xbf16>, vector<8x32xf32> -> vector<8x32xf32>
    %104 = arith.addf %84, %103 : vector<8x32xf32>
    %105 = vector.extract_strided_slice %39 {offsets = [0, 24], sizes = [8, 8], strides = [1, 1]} : vector<8x32xbf16> to vector<8x8xbf16>
    %106 = vector.extract_strided_slice %41 {offsets = [0, 24], sizes = [8, 8], strides = [1, 1]} : vector<8x32xbf16> to vector<8x8xbf16>
    %107 = vector.extract_strided_slice %43 {offsets = [0, 24], sizes = [8, 8], strides = [1, 1]} : vector<8x32xbf16> to vector<8x8xbf16>
    %cst_35 = arith.constant dense<0.000000e+00> : vector<8x8xf32>
    %108 = tpu.matmul %105, %106, %cst_35 {dimension_numbers = #tpu.dot_dimension_numbers<[1], [1], [0], [0], [0, 0, 1, 0], [], []>} : vector<8x8xbf16>, vector<8x8xbf16>, vector<8x8xf32> -> vector<8x8xf32>
    %cst_36 = arith.constant dense<0xFF800000> : vector<8xf32>
    %109 = vector.multi_reduction <maximumf>, %108, %cst_36 [1] : vector<8x8xf32> to vector<8xf32>
    %110 = vector.shape_cast %109 : vector<8xf32> to vector<8x1xf32>
    %111 = vector.broadcast %110 : vector<8x1xf32> to vector<8x8xf32>
    %112 = arith.subf %108, %111 : vector<8x8xf32>
    %113 = math.exp %112 : vector<8x8xf32>
    %cst_37 = arith.constant dense<0.000000e+00> : vector<8xf32>
    %114 = vector.multi_reduction <add>, %113, %cst_37 [1] : vector<8x8xf32> to vector<8xf32>
    %115 = vector.shape_cast %114 : vector<8xf32> to vector<8x1xf32>
    %116 = tpu.reciprocal %115 {approx = true} : vector<8x1xf32> -> vector<8x1xf32>
    %117 = vector.broadcast %116 : vector<8x1xf32> to vector<8x8xf32>
    %118 = arith.mulf %113, %117 : vector<8x8xf32>
    %119 = arith.truncf %118 : vector<8x8xf32> to vector<8x8xbf16>
    %cst_38 = arith.constant dense<0.000000e+00> : vector<8x8xf32>
    %120 = tpu.matmul %119, %107, %cst_38 {dimension_numbers = #tpu.dot_dimension_numbers<[1], [0], [0], [1], [0, 0, 1, 1], [], []>} : vector<8x8xbf16>, vector<8x8xbf16>, vector<8x8xf32> -> vector<8x8xf32>
    %121 = arith.truncf %120 : vector<8x8xf32> to vector<8x8xbf16>
    %c24 = arith.constant 24 : index
    %c0_39 = arith.constant 0 : index
    %122 = vector.load %arg6[%c24, %c0_39] : memref<32x32xbf16, #tpu.memory_space<vmem>>, vector<8x32xbf16>
    %cst_40 = arith.constant dense<0.000000e+00> : vector<8x32xf32>
    %123 = tpu.matmul %121, %122, %cst_40 {dimension_numbers = #tpu.dot_dimension_numbers<[1], [0], [0], [1], [0, 0, 1, 1], [], []>} : vector<8x8xbf16>, vector<8x32xbf16>, vector<8x32xf32> -> vector<8x32xf32>
    %124 = arith.addf %104, %123 : vector<8x32xf32>
    %125 = arith.addf %1, %124 : vector<8x32xf32>
    %c0_41 = arith.constant 0 : index
    %c0_42 = arith.constant 0 : index
    %126 = vector.load %arg7[%c0_41, %c0_42] : memref<1x32xf32, #tpu.memory_space<vmem>>, vector<1x32xf32>
    %127 = vector.shape_cast %126 : vector<1x32xf32> to vector<32xf32>
    %128 = vector.shape_cast %127 : vector<32xf32> to vector<1x32xf32>
    %129 = vector.broadcast %128 : vector<1x32xf32> to vector<8x32xf32>
    %130 = arith.addf %125, %129 : vector<8x32xf32>
    %c0_43 = arith.constant 0 : index
    %c0_44 = arith.constant 0 : index
    %131 = vector.load %arg8[%c0_43, %c0_44] : memref<1x32xf32, #tpu.memory_space<vmem>>, vector<1x32xf32>
    %132 = vector.shape_cast %131 : vector<1x32xf32> to vector<32xf32>
    %c0_45 = arith.constant 0 : index
    %c0_46 = arith.constant 0 : index
    %133 = vector.load %arg9[%c0_45, %c0_46] : memref<1x32xf32, #tpu.memory_space<vmem>>, vector<1x32xf32>
    %134 = vector.shape_cast %133 : vector<1x32xf32> to vector<32xf32>
    %cst_47 = arith.constant dense<0.000000e+00> : vector<8xf32>
    %135 = vector.multi_reduction <add>, %130, %cst_47 [1] : vector<8x32xf32> to vector<8xf32>
    %136 = vector.shape_cast %135 : vector<8xf32> to vector<8x1xf32>
    %cst_48 = arith.constant 3.200000e+01 : f32
    %137 = vector.broadcast %cst_48 : f32 to vector<8x1xf32>
    %138 = arith.divf %136, %137 : vector<8x1xf32>
    %139 = vector.broadcast %138 : vector<8x1xf32> to vector<8x32xf32>
    %140 = arith.subf %130, %139 : vector<8x32xf32>
    %141 = arith.mulf %140, %140 : vector<8x32xf32>
    %cst_49 = arith.constant dense<0.000000e+00> : vector<8xf32>
    %142 = vector.multi_reduction <add>, %141, %cst_49 [1] : vector<8x32xf32> to vector<8xf32>
    %143 = vector.shape_cast %142 : vector<8xf32> to vector<8x1xf32>
    %cst_50 = arith.constant 3.200000e+01 : f32
    %144 = vector.broadcast %cst_50 : f32 to vector<8x1xf32>
    %145 = arith.divf %143, %144 : vector<8x1xf32>
    %146 = vector.broadcast %138 : vector<8x1xf32> to vector<8x32xf32>
    %147 = arith.subf %130, %146 : vector<8x32xf32>
    %cst_51 = arith.constant 9.99999974E-6 : f32
    %148 = vector.broadcast %cst_51 : f32 to vector<8x1xf32>
    %149 = arith.addf %145, %148 : vector<8x1xf32>
    %150 = math.rsqrt %149 : vector<8x1xf32>
    %151 = vector.broadcast %150 : vector<8x1xf32> to vector<8x32xf32>
    %152 = arith.mulf %147, %151 : vector<8x32xf32>
    %153 = vector.shape_cast %132 : vector<32xf32> to vector<1x32xf32>
    %154 = vector.broadcast %153 : vector<1x32xf32> to vector<8x32xf32>
    %155 = arith.mulf %152, %154 : vector<8x32xf32>
    %156 = vector.shape_cast %134 : vector<32xf32> to vector<1x32xf32>
    %157 = vector.broadcast %156 : vector<1x32xf32> to vector<8x32xf32>
    %158 = arith.addf %155, %157 : vector<8x32xf32>
    %159 = arith.truncf %158 : vector<8x32xf32> to vector<8x32xbf16>
    %c0_52 = arith.constant 0 : index
    %c0_53 = arith.constant 0 : index
    %160 = vector.load %arg10[%c0_52, %c0_53] : memref<32x128xbf16, #tpu.memory_space<vmem>>, vector<32x128xbf16>
    %cst_54 = arith.constant dense<0.000000e+00> : vector<8x128xf32>
    %161 = tpu.matmul %159, %160, %cst_54 {dimension_numbers = #tpu.dot_dimension_numbers<[1], [0], [0], [1], [0, 0, 1, 1], [], []>} : vector<8x32xbf16>, vector<32x128xbf16>, vector<8x128xf32> -> vector<8x128xf32>
    %c0_55 = arith.constant 0 : index
    %c0_56 = arith.constant 0 : index
    %162 = vector.load %arg11[%c0_55, %c0_56] : memref<1x128xf32, #tpu.memory_space<vmem>>, vector<1x128xf32>
    %163 = vector.shape_cast %162 : vector<1x128xf32> to vector<128xf32>
    %164 = vector.shape_cast %163 : vector<128xf32> to vector<1x128xf32>
    %165 = vector.broadcast %164 : vector<1x128xf32> to vector<8x128xf32>
    %166 = arith.addf %161, %165 : vector<8x128xf32>
    %cst_57 = arith.constant 1.702000e+00 : f32
    %167 = vector.broadcast %cst_57 : f32 to vector<8x128xf32>
    %168 = arith.mulf %167, %166 : vector<8x128xf32>
    %169 = arith.negf %168 : vector<8x128xf32>
    %170 = math.exp %169 : vector<8x128xf32>
    %cst_58 = arith.constant 1.000000e+00 : f32
    %171 = vector.broadcast %cst_58 : f32 to vector<8x128xf32>
    %172 = arith.addf %171, %170 : vector<8x128xf32>
    %173 = arith.divf %171, %172 : vector<8x128xf32>
    %174 = arith.mulf %166, %173 : vector<8x128xf32>
    %175 = arith.truncf %174 : vector<8x128xf32> to vector<8x128xbf16>
    %c0_59 = arith.constant 0 : index
    %c0_60 = arith.constant 0 : index
    %176 = vector.load %arg12[%c0_59, %c0_60] : memref<128x32xbf16, #tpu.memory_space<vmem>>, vector<128x32xbf16>
    %cst_61 = arith.constant dense<0.000000e+00> : vector<8x32xf32>
    %177 = tpu.matmul %175, %176, %cst_61 {dimension_numbers = #tpu.dot_dimension_numbers<[1], [0], [0], [1], [0, 0, 1, 1], [], []>} : vector<8x128xbf16>, vector<128x32xbf16>, vector<8x32xf32> -> vector<8x32xf32>
    %c0_62 = arith.constant 0 : index
    %c0_63 = arith.constant 0 : index
    %178 = vector.load %arg13[%c0_62, %c0_63] : memref<1x32xf32, #tpu.memory_space<vmem>>, vector<1x32xf32>
    %179 = vector.shape_cast %178 : vector<1x32xf32> to vector<32xf32>
    %180 = vector.shape_cast %179 : vector<32xf32> to vector<1x32xf32>
    %181 = vector.broadcast %180 : vector<1x32xf32> to vector<8x32xf32>
    %182 = arith.addf %177, %181 : vector<8x32xf32>
    %183 = arith.addf %130, %182 : vector<8x32xf32>
    %c0_64 = arith.constant 0 : index
    %c0_65 = arith.constant 0 : index
    %c0_66 = arith.constant 0 : index
    %184 = vector.load %arg14[%c0_64, %c0_65, %c0_66] : memref<1x8x32xf32, #tpu.memory_space<vmem>>, vector<1x8x32xf32>
    %185 = vector.shape_cast %184 : vector<1x8x32xf32> to vector<8x32xf32>
    %186 = vector.shape_cast %183 : vector<8x32xf32> to vector<1x8x32xf32>
    tpu.vector_store %arg14[%c0_64, %c0_65, %c0_66], %186 {strides = array<i32>} : memref<1x8x32xf32, #tpu.memory_space<vmem>>, vector<1x8x32xf32>,
    return
  }
  func.func @transform_0(%arg0: i32) -> (i32, i32, i32) {
    %c0_i32 = arith.constant 0 : i32
    %c0_i32_0 = arith.constant 0 : i32
    %c0_i32_1 = arith.constant 0 : i32
    return %arg0, %c0_i32, %c0_i32_0 : i32, i32, i32
  }
  func.func @transform_1(%arg0: i32) -> (i32, i32) {
    %c0_i32 = arith.constant 0 : i32
    %c0_i32_0 = arith.constant 0 : i32
    %c0_i32_1 = arith.constant 0 : i32
    return %c0_i32, %c0_i32_0 : i32, i32
  }
  func.func @transform_2(%arg0: i32) -> (i32, i32) {
    %c0_i32 = arith.constant 0 : i32
    %c0_i32_0 = arith.constant 0 : i32
    %c0_i32_1 = arith.constant 0 : i32
    return %c0_i32, %c0_i32_0 : i32, i32
  }
  func.func @transform_3(%arg0: i32) -> (i32, i32) {
    %c0_i32 = arith.constant 0 : i32
    %c0_i32_0 = arith.constant 0 : i32
    %c0_i32_1 = arith.constant 0 : i32
    return %c0_i32, %c0_i32_0 : i32, i32
  }
  func.func @transform_4(%arg0: i32) -> (i32, i32) {
    %c0_i32 = arith.constant 0 : i32
    %c0_i32_0 = arith.constant 0 : i32
    %c0_i32_1 = arith.constant 0 : i32
    return %c0_i32, %c0_i32_0 : i32, i32
  }
  func.func @transform_5(%arg0: i32) -> (i32, i32) {
    %c0_i32 = arith.constant 0 : i32
    %c0_i32_0 = arith.constant 0 : i32
    %c0_i32_1 = arith.constant 0 : i32
    return %c0_i32, %c0_i32_0 : i32, i32
  }
  func.func @transform_6(%arg0: i32) -> (i32, i32) {
    %c0_i32 = arith.constant 0 : i32
    %c0_i32_0 = arith.constant 0 : i32
    %c0_i32_1 = arith.constant 0 : i32
    return %c0_i32, %c0_i32_0 : i32, i32
  }
  func.func @transform_7(%arg0: i32) -> (i32, i32) {
    %c0_i32 = arith.constant 0 : i32
    %c0_i32_0 = arith.constant 0 : i32
    %c0_i32_1 = arith.constant 0 : i32
    return %c0_i32, %c0_i32_0 : i32, i32
  }
  func.func @transform_8(%arg0: i32) -> (i32, i32) {
    %c0_i32 = arith.constant 0 : i32
    %c0_i32_0 = arith.constant 0 : i32
    %c0_i32_1 = arith.constant 0 : i32
    return %c0_i32, %c0_i32_0 : i32, i32
  }
  func.func @transform_9(%arg0: i32) -> (i32, i32) {
    %c0_i32 = arith.constant 0 : i32
    %c0_i32_0 = arith.constant 0 : i32
    %c0_i32_1 = arith.constant 0 : i32
    return %c0_i32, %c0_i32_0 : i32, i32
  }
  func.func @transform_10(%arg0: i32) -> (i32, i32) {
    %c0_i32 = arith.constant 0 : i32
    %c0_i32_0 = arith.constant 0 : i32
    %c0_i32_1 = arith.constant 0 : i32
    return %c0_i32, %c0_i32_0 : i32, i32
  }
  func.func @transform_11(%arg0: i32) -> (i32, i32) {
    %c0_i32 = arith.constant 0 : i32
    %c0_i32_0 = arith.constant 0 : i32
    %c0_i32_1 = arith.constant 0 : i32
    return %c0_i32, %c0_i32_0 : i32, i32
  }
  func.func @transform_12(%arg0: i32) -> (i32, i32) {
    %c0_i32 = arith.constant 0 : i32
    %c0_i32_0 = arith.constant 0 : i32
    %c0_i32_1 = arith.constant 0 : i32
    return %c0_i32, %c0_i32_0 : i32, i32
  }
  func.func @transform_13(%arg0: i32) -> (i32, i32, i32) {
    %c0_i32 = arith.constant 0 : i32
    %c0_i32_0 = arith.constant 0 : i32
    %c0_i32_1 = arith.constant 0 : i32
    return %arg0, %c0_i32, %c0_i32_0 : i32, i32, i32
  }
}

module attributes {stable_mosaic.version = 11 : i64} {
  func.func @rab_kernel(%arg0: i32, %arg1: memref<1x8x32xf32, #tpu.memory_space<vmem>>, %arg2: memref<1x32xf32, #tpu.memory_space<vmem>>, %arg3: memref<1x32xf32, #tpu.memory_space<vmem>>, %arg4: memref<32x96xbf16, #tpu.memory_space<vmem>>, %arg5: memref<1x96xf32, #tpu.memory_space<vmem>>, %arg6: memref<32x32xbf16, #tpu.memory_space<vmem>>, %arg7: memref<1x32xf32, #tpu.memory_space<vmem>>, %arg8: memref<1x32xf32, #tpu.memory_space<vmem>>, %arg9: memref<1x32xf32, #tpu.memory_space<vmem>>, %arg10: memref<32x128xbf16, #tpu.memory_space<vmem>>, %arg11: memref<1x128xf32, #tpu.memory_space<vmem>>, %arg12: memref<128x32xbf16, #tpu.memory_space<vmem>>, %arg13: memref<1x32xf32, #tpu.memory_space<vmem>>, %arg14: memref<1x8x32xf32, #tpu.memory_space<vmem>>) attributes {dimension_semantics = [#tpu.dimension_semantics<parallel>], iteration_bounds = array<i64: 2>, scalar_prefetch = 0 : i64, scratch_operands = 0 : i64, tpu.core_type = #tpu.core_type<tc>, window_params = [{transform_indices = @transform_0, window_bounds = array<i64: 1, 8, 32>}, {pipeline_mode = #tpu.pipeline_mode<synchronous>, transform_indices = @transform_1, window_bounds = array<i64: 1, 32>}, {pipeline_mode = #tpu.pipeline_mode<synchronous>, transform_indices = @transform_2, window_bounds = array<i64: 1, 32>}, {pipeline_mode = #tpu.pipeline_mode<synchronous>, transform_indices = @transform_3, window_bounds = array<i64: 32, 96>}, {pipeline_mode = #tpu.pipeline_mode<synchronous>, transform_indices = @transform_4, window_bounds = array<i64: 1, 96>}, {pipeline_mode = #tpu.pipeline_mode<synchronous>, transform_indices = @transform_5, window_bounds = array<i64: 32, 32>}, {pipeline_mode = #tpu.pipeline_mode<synchronous>, transform_indices = @transform_6, window_bounds = array<i64: 1, 32>}, {pipeline_mode = #tpu.pipeline_mode<synchronous>, transform_indices = @transform_7, window_bounds = array<i64: 1, 32>}, {pipeline_mode = #tpu.pipeline_mode<synchronous>, transform_indices = @transform_8, window_bounds = array<i64: 1, 32>}, {pipeline_mode = #tpu.pipeline_mode<synchronous>, transform_indices = @transform_9, window_bounds = array<i64: 32, 128>}, {pipeline_mode = #tpu.pipeline_mode<synchronous>, transform_indices = @transform_10, window_bounds = array<i64: 1, 128>}, {pipeline_mode = #tpu.pipeline_mode<synchronous>, transform_indices = @transform_11, window_bounds = array<i64: 128, 32>}, {pipeline_mode = #tpu.pipeline_mode<synchronous>, transform_indices = @transform_12, window_bounds = array<i64: 1, 32>}, {transform_indices = @transform_13, window_bounds = array<i64: 1, 8, 32>}]} {
    %c0 = arith.constant 0 : index
    %c0_0 = arith.constant 0 : index
    %c0_1 = arith.constant 0 : index
    %0 = vector.load %arg1[%c0, %c0_0, %c0_1] : memref<1x8x32xf32, #tpu.memory_space<vmem>>, vector<1x8x32xf32>
    %1 = vector.shape_cast %0 : vector<1x8x32xf32> to vector<8x32xf32>
    %c0_2 = arith.constant 0 : index
    %c0_3 = arith.constant 0 : index
    %2 = vector.load %arg2[%c0_2, %c0_3] : memref<1x32xf32, #tpu.memory_space<vmem>>, vector<1x32xf32>
    %3 = vector.shape_cast %2 : vector<1x32xf32> to vector<32xf32>
    %c0_4 = arith.constant 0 : index
    %c0_5 = arith.constant 0 : index
    %4 = vector.load %arg3[%c0_4, %c0_5] : memref<1x32xf32, #tpu.memory_space<vmem>>, vector<1x32xf32>
    %5 = vector.shape_cast %4 : vector<1x32xf32> to vector<32xf32>
    %cst = arith.constant dense<0.000000e+00> : vector<8xf32>
    %6 = vector.multi_reduction <add>, %1, %cst [1] : vector<8x32xf32> to vector<8xf32>
    %7 = vector.shape_cast %6 : vector<8xf32> to vector<8x1xf32>
    %cst_6 = arith.constant 3.200000e+01 : f32
    %8 = vector.broadcast %cst_6 : f32 to vector<8x1xf32>
    %9 = arith.divf %7, %8 : vector<8x1xf32>
    %10 = vector.broadcast %9 : vector<8x1xf32> to vector<8x32xf32>
    %11 = arith.subf %1, %10 : vector<8x32xf32>
    %12 = arith.mulf %11, %11 : vector<8x32xf32>
    %cst_7 = arith.constant dense<0.000000e+00> : vector<8xf32>
    %13 = vector.multi_reduction <add>, %12, %cst_7 [1] : vector<8x32xf32> to vector<8xf32>
    %14 = vector.shape_cast %13 : vector<8xf32> to vector<8x1xf32>
    %cst_8 = arith.constant 3.200000e+01 : f32
    %15 = vector.broadcast %cst_8 : f32 to vector<8x1xf32>
    %16 = arith.divf %14, %15 : vector<8x1xf32>
    %17 = vector.broadcast %9 : vector<8x1xf32> to vector<8x32xf32>
    %18 = arith.subf %1, %17 : vector<8x32xf32>
    %cst_9 = arith.constant 9.99999974E-6 : f32
    %19 = vector.broadcast %cst_9 : f32 to vector<8x1xf32>
    %20 = arith.addf %16, %19 : vector<8x1xf32>
    %21 = math.rsqrt %20 : vector<8x1xf32>
    %22 = vector.broadcast %21 : vector<8x1xf32> to vector<8x32xf32>
    %23 = arith.mulf %18, %22 : vector<8x32xf32>
    %24 = vector.shape_cast %3 : vector<32xf32> to vector<1x32xf32>
    %25 = vector.broadcast %24 : vector<1x32xf32> to vector<8x32xf32>
    %26 = arith.mulf %23, %25 : vector<8x32xf32>
    %27 = vector.shape_cast %5 : vector<32xf32> to vector<1x32xf32>
    %28 = vector.broadcast %27 : vector<1x32xf32> to vector<8x32xf32>
    %29 = arith.addf %26, %28 : vector<8x32xf32>
    %30 = arith.truncf %29 : vector<8x32xf32> to vector<8x32xbf16>
    %c0_10 = arith.constant 0 : index
    %c0_11 = arith.constant 0 : index
    %31 = vector.load %arg4[%c0_10, %c0_11] : memref<32x96xbf16, #tpu.memory_space<vmem>>, vector<32x96xbf16>
    %cst_12 = arith.constant dense<0.000000e+00> : vector<8x96xf32>
    %32 = tpu.matmul %30, %31, %cst_12 {dimension_numbers = #tpu.dot_dimension_numbers<[1], [0], [0], [1], [0, 0, 1, 1], [], []>} : vector<8x32xbf16>, vector<32x96xbf16>, vector<8x96xf32> -> vector<8x96xf32>
    %c0_13 = arith.constant 0 : index
    %c0_14 = arith.constant 0 : index
    %33 = vector.load %arg5[%c0_13, %c0_14] : memref<1x96xf32, #tpu.memory_space<vmem>>, vector<1x96xf32>
    %34 = vector.shape_cast %33 : vector<1x96xf32> to vector<96xf32>
    %35 = vector.shape_cast %34 : vector<96xf32> to vector<1x96xf32>
    %36 = vector.broadcast %35 : vector<1x96xf32> to vector<8x96xf32>
    %37 = arith.addf %32, %36 : vector<8x96xf32>
    %38 = vector.extract_strided_slice %37 {offsets = [0, 0], sizes = [8, 32], strides = [1, 1]} : vector<8x96xf32> to vector<8x32xf32>
    %39 = arith.truncf %38 : vector<8x32xf32> to vector<8x32xbf16>
    %40 = vector.extract_strided_slice %37 {offsets = [0, 32], sizes = [8, 32], strides = [1, 1]} : vector<8x96xf32> to vector<8x32xf32>
    %41 = arith.truncf %40 : vector<8x32xf32> to vector<8x32xbf16>
    %42 = vector.extract_strided_slice %37 {offsets = [0, 64], sizes = [8, 32], strides = [1, 1]} : vector<8x96xf32> to vector<8x32xf32>
    %43 = arith.truncf %42 : vector<8x32xf32> to vector<8x32xbf16>
    %cst_15 = arith.constant 0.000000e+00 : f32
    %44 = vector.broadcast %cst_15 : f32 to vector<8x32xf32>
    %45 = vector.extract_strided_slice %39 {offsets = [0, 0], sizes = [8, 8], strides = [1, 1]} : vector<8x32xbf16> to vector<8x8xbf16>
    %46 = vector.extract_strided_slice %41 {offsets = [0, 0], sizes = [8, 8], strides = [1, 1]} : vector<8x32xbf16> to vector<8x8xbf16>
    %47 = vector.extract_strided_slice %43 {offsets = [0, 0], sizes = [8, 8], strides = [1, 1]} : vector<8x32xbf16> to vector<8x8xbf16>
    %cst_16 = arith.constant dense<0.000000e+00> : vector<8x8xf32>
    %48 = tpu.matmul %45, %46, %cst_16 {dimension_numbers = #tpu.dot_dimension_numbers<[1], [1], [0], [0], [0, 0, 1, 0], [], []>} : vector<8x8xbf16>, vector<8x8xbf16>, vector<8x8xf32> -> vector<8x8xf32>
    %cst_17 = arith.constant dense<0xFF800000> : vector<8xf32>
    %49 = vector.multi_reduction <maximumf>, %48, %cst_17 [1] : vector<8x8xf32> to vector<8xf32>
    %50 = vector.shape_cast %49 : vector<8xf32> to vector<8x1xf32>
    %51 = vector.broadcast %50 : vector<8x1xf32> to vector<8x8xf32>
    %52 = arith.subf %48, %51 : vector<8x8xf32>
    %53 = math.exp %52 : vector<8x8xf32>
    %cst_18 = arith.constant dense<0.000000e+00> : vector<8xf32>
    %54 = vector.multi_reduction <add>, %53, %cst_18 [1] : vector<8x8xf32> to vector<8xf32>
    %55 = vector.shape_cast %54 : vector<8xf32> to vector<8x1xf32>
    %56 = tpu.reciprocal %55 {approx = true} : vector<8x1xf32> -> vector<8x1xf32>
    %57 = vector.broadcast %56 : vector<8x1xf32> to vector<8x8xf32>
    %58 = arith.mulf %53, %57 : vector<8x8xf32>
    %59 = arith.truncf %58 : vector<8x8xf32> to vector<8x8xbf16>
    %cst_19 = arith.constant dense<0.000000e+00> : vector<8x8xf32>
    %60 = tpu.matmul %59, %47, %cst_19 {dimension_numbers = #tpu.dot_dimension_numbers<[1], [0], [0], [1], [0, 0, 1, 1], [], []>} : vector<8x8xbf16>, vector<8x8xbf16>, vector<8x8xf32> -> vector<8x8xf32>
    %61 = arith.truncf %60 : vector<8x8xf32> to vector<8x8xbf16>
    %c0_20 = arith.constant 0 : index
    %c0_21 = arith.constant 0 : index
    %62 = vector.load %arg6[%c0_20, %c0_21] : memref<32x32xbf16, #tpu.memory_space<vmem>>, vector<8x32xbf16>
    %cst_22 = arith.constant dense<0.000000e+00> : vector<8x32xf32>
    %63 = tpu.matmul %61, %62, %cst_22 {dimension_numbers = #tpu.dot_dimension_numbers<[1], [0], [0], [1], [0, 0, 1, 1], [], []>} : vector<8x8xbf16>, vector<8x32xbf16>, vector<8x32xf32> -> vector<8x32xf32>
    %64 = arith.addf %44, %63 : vector<8x32xf32>
    %65 = vector.extract_strided_slice %39 {offsets = [0, 8], sizes = [8, 8], strides = [1, 1]} : vector<8x32xbf16> to vector<8x8xbf16>
    %66 = vector.extract_strided_slice %41 {offsets = [0, 8], sizes = [8, 8], strides = [1, 1]} : vector<8x32xbf16> to vector<8x8xbf16>
    %67 = vector.extract_strided_slice %43 {offsets = [0, 8], sizes = [8, 8], strides = [1, 1]} : vector<8x32xbf16> to vector<8x8xbf16>
    %cst_23 = arith.constant dense<0.000000e+00> : vector<8x8xf32>
    %68 = tpu.matmul %65, %66, %cst_23 {dimension_numbers = #tpu.dot_dimension_numbers<[1], [1], [0], [0], [0, 0, 1, 0], [], []>} : vector<8x8xbf16>, vector<8x8xbf16>, vector<8x8xf32> -> vector<8x8xf32>
    %cst_24 = arith.constant dense<0xFF800000> : vector<8xf32>
    %69 = vector.multi_reduction <maximumf>, %68, %cst_24 [1] : vector<8x8xf32> to vector<8xf32>
    %70 = vector.shape_cast %69 : vector<8xf32> to vector<8x1xf32>
    %71 = vector.broadcast %70 : vector<8x1xf32> to vector<8x8xf32>
    %72 = arith.subf %68, %71 : vector<8x8xf32>
    %73 = math.exp %72 : vector<8x8xf32>
    %cst_25 = arith.constant dense<0.000000e+00> : vector<8xf32>
    %74 = vector.multi_reduction <add>, %73, %cst_25 [1] : vector<8x8xf32> to vector<8xf32>
    %75 = vector.shape_cast %74 : vector<8xf32> to vector<8x1xf32>
    %76 = tpu.reciprocal %75 {approx = true} : vector<8x1xf32> -> vector<8x1xf32>
    %77 = vector.broadcast %76 : vector<8x1xf32> to vector<8x8xf32>
    %78 = arith.mulf %73, %77 : vector<8x8xf32>
    %79 = arith.truncf %78 : vector<8x8xf32> to vector<8x8xbf16>
    %cst_26 = arith.constant dense<0.000000e+00> : vector<8x8xf32>
    %80 = tpu.matmul %79, %67, %cst_26 {dimension_numbers = #tpu.dot_dimension_numbers<[1], [0], [0], [1], [0, 0, 1, 1], [], []>} : vector<8x8xbf16>, vector<8x8xbf16>, vector<8x8xf32> -> vector<8x8xf32>
    %81 = arith.truncf %80 : vector<8x8xf32> to vector<8x8xbf16>
    %c8 = arith.constant 8 : index
    %c0_27 = arith.constant 0 : index
    %82 = vector.load %arg6[%c8, %c0_27] : memref<32x32xbf16, #tpu.memory_space<vmem>>, vector<8x32xbf16>
    %cst_28 = arith.constant dense<0.000000e+00> : vector<8x32xf32>
    %83 = tpu.matmul %81, %82, %cst_28 {dimension_numbers = #tpu.dot_dimension_numbers<[1], [0], [0], [1], [0, 0, 1, 1], [], []>} : vector<8x8xbf16>, vector<8x32xbf16>, vector<8x32xf32> -> vector<8x32xf32>
    %84 = arith.addf %64, %83 : vector<8x32xf32>
    %85 = vector.extract_strided_slice %39 {offsets = [0, 16], sizes = [8, 8], strides = [1, 1]} : vector<8x32xbf16> to vector<8x8xbf16>
    %86 = vector.extract_strided_slice %41 {offsets = [0, 16], sizes = [8, 8], strides = [1, 1]} : vector<8x32xbf16> to vector<8x8xbf16>
    %87 = vector.extract_strided_slice %43 {offsets = [0, 16], sizes = [8, 8], strides = [1, 1]} : vector<8x32xbf16> to vector<8x8xbf16>
    %cst_29 = arith.constant dense<0.000000e+00> : vector<8x8xf32>
    %88 = tpu.matmul %85, %86, %cst_29 {dimension_numbers = #tpu.dot_dimension_numbers<[1], [1], [0], [0], [0, 0, 1, 0], [], []>} : vector<8x8xbf16>, vector<8x8xbf16>, vector<8x8xf32> -> vector<8x8xf32>
    %cst_30 = arith.constant dense<0xFF800000> : vector<8xf32>
    %89 = vector.multi_reduction <maximumf>, %88, %cst_30 [1] : vector<8x8xf32> to vector<8xf32>
    %90 = vector.shape_cast %89 : vector<8xf32> to vector<8x1xf32>
    %91 = vector.broadcast %90 : vector<8x1xf32> to vector<8x8xf32>
    %92 = arith.subf %88, %91 : vector<8x8xf32>
    %93 = math.exp %92 : vector<8x8xf32>
    %cst_31 = arith.constant dense<0.000000e+00> : vector<8xf32>
    %94 = vector.multi_reduction <add>, %93, %cst_31 [1] : vector<8x8xf32> to vector<8xf32>
    %95 = vector.shape_cast %94 : vector<8xf32> to vector<8x1xf32>
    %96 = tpu.reciprocal %95 {approx = true} : vector<8x1xf32> -> vector<8x1xf32>
    %97 = vector.broadcast %96 : vector<8x1xf32> to vector<8x8xf32>
    %98 = arith.mulf %93, %97 : vector<8x8xf32>
    %99 = arith.truncf %98 : vector<8x8xf32> to vector<8x8xbf16>
    %cst_32 = arith.constant dense<0.000000e+00> : vector<8x8xf32>
    %100 = tpu.matmul %99, %87, %cst_32 {dimension_numbers = #tpu.dot_dimension_numbers<[1], [0], [0], [1], [0, 0, 1, 1], [], []>} : vector<8x8xbf16>, vector<8x8xbf16>, vector<8x8xf32> -> vector<8x8xf32>
    %101 = arith.truncf %100 : vector<8x8xf32> to vector<8x8xbf16>
    %c16 = arith.constant 16 : index
    %c0_33 = arith.constant 0 : index
    %102 = vector.load %arg6[%c16, %c0_33] : memref<32x32xbf16, #tpu.memory_space<vmem>>, vector<8x32xbf16>
    %cst_34 = arith.constant dense<0.000000e+00> : vector<8x32xf32>
    %103 = tpu.matmul %101, %102, %cst_34 {dimension_numbers = #tpu.dot_dimension_numbers<[1], [0], [0], [1], [0, 0, 1, 1], [], []>} : vector<8x8xbf16>, vector<8x32xbf16>, vector<8x32xf32> -> vector<8x32xf32>
    %104 = arith.addf %84, %103 : vector<8x32xf32>
    %105 = vector.extract_strided_slice %39 {offsets = [0, 24], sizes = [8, 8], strides = [1, 1]} : vector<8x32xbf16> to vector<8x8xbf16>
    %106 = vector.extract_strided_slice %41 {offsets = [0, 24], sizes = [8, 8], strides = [1, 1]} : vector<8x32xbf16> to vector<8x8xbf16>
    %107 = vector.extract_strided_slice %43 {offsets = [0, 24], sizes = [8, 8], strides = [1, 1]} : vector<8x32xbf16> to vector<8x8xbf16>
    %cst_35 = arith.constant dense<0.000000e+00> : vector<8x8xf32>
    %108 = tpu.matmul %105, %106, %cst_35 {dimension_numbers = #tpu.dot_dimension_numbers<[1], [1], [0], [0], [0, 0, 1, 0], [], []>} : vector<8x8xbf16>, vector<8x8xbf16>, vector<8x8xf32> -> vector<8x8xf32>
    %cst_36 = arith.constant dense<0xFF800000> : vector<8xf32>
    %109 = vector.multi_reduction <maximumf>, %108, %cst_36 [1] : vector<8x8xf32> to vector<8xf32>
    %110 = vector.shape_cast %109 : vector<8xf32> to vector<8x1xf32>
    %111 = vector.broadcast %110 : vector<8x1xf32> to vector<8x8xf32>
    %112 = arith.subf %108, %111 : vector<8x8xf32>
    %113 = math.exp %112 : vector<8x8xf32>
    %cst_37 = arith.constant dense<0.000000e+00> : vector<8xf32>
    %114 = vector.multi_reduction <add>, %113, %cst_37 [1] : vector<8x8xf32> to vector<8xf32>
    %115 = vector.shape_cast %114 : vector<8xf32> to vector<8x1xf32>
    %116 = tpu.reciprocal %115 {approx = true} : vector<8x1xf32> -> vector<8x1xf32>
    %117 = vector.broadcast %116 : vector<8x1xf32> to vector<8x8xf32>
    %118 = arith.mulf %113, %117 : vector<8x8xf32>
    %119 = arith.truncf %118 : vector<8x8xf32> to vector<8x8xbf16>
    %cst_38 = arith.constant dense<0.000000e+00> : vector<8x8xf32>
    %120 = tpu.matmul %119, %107, %cst_38 {dimension_numbers = #tpu.dot_dimension_numbers<[1], [0], [0], [1], [0, 0, 1, 1], [], []>} : vector<8x8xbf16>, vector<8x8xbf16>, vector<8x8xf32> -> vector<8x8xf32>
    %121 = arith.truncf %120 : vector<8x8xf32> to vector<8x8xbf16>
    %c24 = arith.constant 24 : index
    %c0_39 = arith.constant 0 : index
    %122 = vector.load %arg6[%c24, %c0_39] : memref<32x32xbf16, #tpu.memory_space<vmem>>, vector<8x32xbf16>
    %cst_40 = arith.constant dense<0.000000e+00> : vector<8x32xf32>
    %123 = tpu.matmul %121, %122, %cst_40 {dimension_numbers = #tpu.dot_dimension_numbers<[1], [0], [0], [1], [0, 0, 1, 1], [], []>} : vector<8x8xbf16>, vector<8x32xbf16>, vector<8x32xf32> -> vector<8x32xf32>
    %124 = arith.addf %104, %123 : vector<8x32xf32>
    %125 = arith.addf %1, %124 : vector<8x32xf32>
    %c0_41 = arith.constant 0 : index
    %c0_42 = arith.constant 0 : index
    %126 = vector.load %arg7[%c0_41, %c0_42] : memref<1x32xf32, #tpu.memory_space<vmem>>, vector<1x32xf32>
    %127 = vector.shape_cast %126 : vector<1x32xf32> to vector<32xf32>
    %128 = vector.shape_cast %127 : vector<32xf32> to vector<1x32xf32>
    %129 = vector.broadcast %128 : vector<1x32xf32> to vector<8x32xf32>
    %130 = arith.addf %125, %129 : vector<8x32xf32>
    %c0_43 = arith.constant 0 : index
    %c0_44 = arith.constant 0 : index
    %131 = vector.load %arg8[%c0_43, %c0_44] : memref<1x32xf32, #tpu.memory_space<vmem>>, vector<1x32xf32>
    %132 = vector.shape_cast %131 : vector<1x32xf32> to vector<32xf32>
    %c0_45 = arith.constant 0 : index
    %c0_46 = arith.constant 0 : index
    %133 = vector.load %arg9[%c0_45, %c0_46] : memref<1x32xf32, #tpu.memory_space<vmem>>, vector<1x32xf32>
    %134 = vector.shape_cast %133 : vector<1x32xf32> to vector<32xf32>
    %cst_47 = arith.constant dense<0.000000e+00> : vector<8xf32>
    %135 = vector.multi_reduction <add>, %130, %cst_47 [1] : vector<8x32xf32> to vector<8xf32>
    %136 = vector.shape_cast %135 : vector<8xf32> to vector<8x1xf32>
    %cst_48 = arith.constant 3.200000e+01 : f32
    %137 = vector.broadcast %cst_48 : f32 to vector<8x1xf32>
    %138 = arith.divf %136, %137 : vector<8x1xf32>
    %139 = vector.broadcast %138 : vector<8x1xf32> to vector<8x32xf32>
    %140 = arith.subf %130, %139 : vector<8x32xf32>
    %141 = arith.mulf %140, %140 : vector<8x32xf32>
    %cst_49 = arith.constant dense<0.000000e+00> : vector<8xf32>
    %142 = vector.multi_reduction <add>, %141, %cst_49 [1] : vector<8x32xf32> to vector<8xf32>
    %143 = vector.shape_cast %142 : vector<8xf32> to vector<8x1xf32>
    %cst_50 = arith.constant 3.200000e+01 : f32
    %144 = vector.broadcast %cst_50 : f32 to vector<8x1xf32>
    %145 = arith.divf %143, %144 : vector<8x1xf32>
    %146 = vector.broadcast %138 : vector<8x1xf32> to vector<8x32xf32>
    %147 = arith.subf %130, %146 : vector<8x32xf32>
    %cst_51 = arith.constant 9.99999974E-6 : f32
    %148 = vector.broadcast %cst_51 : f32 to vector<8x1xf32>
    %149 = arith.addf %145, %148 : vector<8x1xf32>
    %150 = math.rsqrt %149 : vector<8x1xf32>
    %151 = vector.broadcast %150 : vector<8x1xf32> to vector<8x32xf32>
    %152 = arith.mulf %147, %151 : vector<8x32xf32>
    %153 = vector.shape_cast %132 : vector<32xf32> to vector<1x32xf32>
    %154 = vector.broadcast %153 : vector<1x32xf32> to vector<8x32xf32>
    %155 = arith.mulf %152, %154 : vector<8x32xf32>
    %156 = vector.shape_cast %134 : vector<32xf32> to vector<1x32xf32>
    %157 = vector.broadcast %156 : vector<1x32xf32> to vector<8x32xf32>
    %158 = arith.addf %155, %157 : vector<8x32xf32>
    %159 = arith.truncf %158 : vector<8x32xf32> to vector<8x32xbf16>
    %c0_52 = arith.constant 0 : index
    %c0_53 = arith.constant 0 : index
    %160 = vector.load %arg10[%c0_52, %c0_53] : memref<32x128xbf16, #tpu.memory_space<vmem>>, vector<32x128xbf16>
    %cst_54 = arith.constant dense<0.000000e+00> : vector<8x128xf32>
    %161 = tpu.matmul %159, %160, %cst_54 {dimension_numbers = #tpu.dot_dimension_numbers<[1], [0], [0], [1], [0, 0, 1, 1], [], []>} : vector<8x32xbf16>, vector<32x128xbf16>, vector<8x128xf32> -> vector<8x128xf32>
    %c0_55 = arith.constant 0 : index
    %c0_56 = arith.constant 0 : index
    %162 = vector.load %arg11[%c0_55, %c0_56] : memref<1x128xf32, #tpu.memory_space<vmem>>, vector<1x128xf32>
    %163 = vector.shape_cast %162 : vector<1x128xf32> to vector<128xf32>
    %164 = vector.shape_cast %163 : vector<128xf32> to vector<1x128xf32>
    %165 = vector.broadcast %164 : vector<1x128xf32> to vector<8x128xf32>
    %166 = arith.addf %161, %165 : vector<8x128xf32>
    %cst_57 = arith.constant 1.702000e+00 : f32
    %167 = vector.broadcast %cst_57 : f32 to vector<8x128xf32>
    %168 = arith.mulf %167, %166 : vector<8x128xf32>
    %169 = arith.negf %168 : vector<8x128xf32>
    %170 = math.exp %169 : vector<8x128xf32>
    %cst_58 = arith.constant 1.000000e+00 : f32
    %171 = vector.broadcast %cst_58 : f32 to vector<8x128xf32>
    %172 = arith.addf %171, %170 : vector<8x128xf32>
    %173 = arith.divf %171, %172 : vector<8x128xf32>
    %174 = arith.mulf %166, %173 : vector<8x128xf32>
    %175 = arith.truncf %174 : vector<8x128xf32> to vector<8x128xbf16>
    %c0_59 = arith.constant 0 : index
    %c0_60 = arith.constant 0 : index
    %176 = vector.load %arg12[%c0_59, %c0_60] : memref<128x32xbf16, #tpu.memory_space<vmem>>, vector<128x32xbf16>
    %cst_61 = arith.constant dense<0.000000e+00> : vector<8x32xf32>
    %177 = tpu.matmul %175, %176, %cst_61 {dimension_numbers = #tpu.dot_dimension_numbers<[1], [0], [0], [1], [0, 0, 1, 1], [], []>} : vector<8x128xbf16>, vector<128x32xbf16>, vector<8x32xf32> -> vector<8x32xf32>
    %c0_62 = arith.constant 0 : index
    %c0_63 = arith.constant 0 : index
    %178 = vector.load %arg13[%c0_62, %c0_63] : memref<1x32xf32, #tpu.memory_space<vmem>>, vector<1x32xf32>
    %179 = vector.shape_cast %178 : vector<1x32xf32> to vector<32xf32>
    %180 = vector.shape_cast %179 : vector<32xf32> to vector<1x32xf32>
    %181 = vector.broadcast %180 : vector<1x32xf32> to vector<8x32xf32>
    %182 = arith.addf %177, %181 : vector<8x32xf32>
    %183 = arith.addf %130, %182 : vector<8x32xf32>
    %c0_64 = arith.constant 0 : index
    %c0_65 = arith.constant 0 : index
    %c0_66 = arith.constant 0 : index
    %184 = vector.load %arg14[%c0_64, %c0_65, %c0_66] : memref<1x8x32xf32, #tpu.memory_space<vmem>>, vector<1x8x32xf32>
    %185 = vector.shape_cast %184 : vector<1x8x32xf32> to vector<8x32xf32>
    %186 = vector.shape_cast %183 : vector<8x32xf32> to vector<1x8x32xf32>
    tpu.vector_store %arg14[%c0_64, %c0_65, %c0_66], %186 {strides = array<i32>} : memref<1x8x32xf32, #tpu.memory_space<vmem>>, vector<1x8x32xf32>,
    return
  }
  func.func @transform_0(%arg0: i32) -> (i32, i32, i32) {
    %c0_i32 = arith.constant 0 : i32
    %c0_i32_0 = arith.constant 0 : i32
    %c0_i32_1 = arith.constant 0 : i32
    return %arg0, %c0_i32, %c0_i32_0 : i32, i32, i32
  }
  func.func @transform_1(%arg0: i32) -> (i32, i32) {
    %c0_i32 = arith.constant 0 : i32
    %c0_i32_0 = arith.constant 0 : i32
    %c0_i32_1 = arith.constant 0 : i32
    return %c0_i32, %c0_i32_0 : i32, i32
  }
  func.func @transform_2(%arg0: i32) -> (i32, i32) {
    %c0_i32 = arith.constant 0 : i32
    %c0_i32_0 = arith.constant 0 : i32
    %c0_i32_1 = arith.constant 0 : i32
    return %c0_i32, %c0_i32_0 : i32, i32
  }
  func.func @transform_3(%arg0: i32) -> (i32, i32) {
    %c0_i32 = arith.constant 0 : i32
    %c0_i32_0 = arith.constant 0 : i32
    %c0_i32_1 = arith.constant 0 : i32
    return %c0_i32, %c0_i32_0 : i32, i32
  }
  func.func @transform_4(%arg0: i32) -> (i32, i32) {
    %c0_i32 = arith.constant 0 : i32
    %c0_i32_0 = arith.constant 0 : i32
    %c0_i32_1 = arith.constant 0 : i32
    return %c0_i32, %c0_i32_0 : i32, i32
  }
  func.func @transform_5(%arg0: i32) -> (i32, i32) {
    %c0_i32 = arith.constant 0 : i32
    %c0_i32_0 = arith.constant 0 : i32
    %c0_i32_1 = arith.constant 0 : i32
    return %c0_i32, %c0_i32_0 : i32, i32
  }
  func.func @transform_6(%arg0: i32) -> (i32, i32) {
    %c0_i32 = arith.constant 0 : i32
    %c0_i32_0 = arith.constant 0 : i32
    %c0_i32_1 = arith.constant 0 : i32
    return %c0_i32, %c0_i32_0 : i32, i32
  }
  func.func @transform_7(%arg0: i32) -> (i32, i32) {
    %c0_i32 = arith.constant 0 : i32
    %c0_i32_0 = arith.constant 0 : i32
    %c0_i32_1 = arith.constant 0 : i32
    return %c0_i32, %c0_i32_0 : i32, i32
  }
  func.func @transform_8(%arg0: i32) -> (i32, i32) {
    %c0_i32 = arith.constant 0 : i32
    %c0_i32_0 = arith.constant 0 : i32
    %c0_i32_1 = arith.constant 0 : i32
    return %c0_i32, %c0_i32_0 : i32, i32
  }
  func.func @transform_9(%arg0: i32) -> (i32, i32) {
    %c0_i32 = arith.constant 0 : i32
    %c0_i32_0 = arith.constant 0 : i32
    %c0_i32_1 = arith.constant 0 : i32
    return %c0_i32, %c0_i32_0 : i32, i32
  }
  func.func @transform_10(%arg0: i32) -> (i32, i32) {
    %c0_i32 = arith.constant 0 : i32
    %c0_i32_0 = arith.constant 0 : i32
    %c0_i32_1 = arith.constant 0 : i32
    return %c0_i32, %c0_i32_0 : i32, i32
  }
  func.func @transform_11(%arg0: i32) -> (i32, i32) {
    %c0_i32 = arith.constant 0 : i32
    %c0_i32_0 = arith.constant 0 : i32
    %c0_i32_1 = arith.constant 0 : i32
    return %c0_i32, %c0_i32_0 : i32, i32
  }
  func.func @transform_12(%arg0: i32) -> (i32, i32) {
    %c0_i32 = arith.constant 0 : i32
    %c0_i32_0 = arith.constant 0 : i32
    %c0_i32_1 = arith.constant 0 : i32
    return %c0_i32, %c0_i32_0 : i32, i32
  }
  func.func @transform_13(%arg0: i32) -> (i32, i32, i32) {
    %c0_i32 = arith.constant 0 : i32
    %c0_i32_0 = arith.constant 0 : i32
    %c0_i32_1 = arith.constant 0 : i32
    return %arg0, %c0_i32, %c0_i32_0 : i32, i32, i32
  }
}

</mosaic_0001>

<bundles_post_ra>
// kernel: tpu_custom_call.1
= control target key start
LH: loop header
LB: loop body
LE: loop exit
PB: predicated region body
PF: predicated region fallthrough
CT: control target
= control target key end

     0   :  { %s3345_s0 = inlined_call_operand.hbm [shape: f32[2,8,32], index: 0, kind: input, shape index: {}]   ;;  %s3346_s1 = inlined_call_operand.hbm [shape: f32[1,32], index: 1, kind: input, shape index: {}]   ;;  %s3347_s2 = inlined_call_operand.hbm [shape: f32[1,32], index: 2, kind: input, shape index: {}]   ;;  %s3348_s3 = inlined_call_operand.hbm [shape: bf16[32,96], index: 3, kind: input, shape index: {}]   ;;  %s3349_s4 = inlined_call_operand.hbm [shape: f32[1,96], index: 4, kind: input, shape index: {}]   ;;  %s3350_s5 = inlined_call_operand.hbm [shape: bf16[32,32], index: 5, kind: input, shape index: {}]   ;;  %s3351_s6 = inlined_call_operand.hbm [shape: f32[1,32], index: 6, kind: input, shape index: {}]   ;;  %s3352_s7 = inlined_call_operand.hbm [shape: f32[1,32], index: 7, kind: input, shape index: {}]   ;;  %s3353_s8 = inlined_call_operand.hbm [shape: f32[1,32], index: 8, kind: input, shape index: {}]   ;;  %s3354_s9 = inlined_call_operand.hbm [shape: bf16[32,128], index: 9, kind: input, shape index: {}]   ;;  %s3355_s10 = inlined_call_operand.hbm [shape: f32[1,128], index: 10, kind: input, shape index: {}]   ;;  %s3356_s11 = inlined_call_operand.hbm [shape: bf16[128,32], index: 11, kind: input, shape index: {}]   ;;  %s3357_s12 = inlined_call_operand.hbm [shape: f32[1,32], index: 12, kind: input, shape index: {}]   ;;  %s3358_s13 = inlined_call_operand.hbm [shape: f32[2,8,32], index: 13, kind: output, shape index: {}]  }
   0x1   :  { %3368 = sst [smem:[#allocation34_spill]] %s3345_s0 }
   0x2   :  { %3369 = sst [smem:[#allocation35_spill]] %s3346_s1 }
   0x3   :  { %3370 = sst [smem:[#allocation36_spill]] %s3347_s2 }
   0x4   :  { %3371 = sst [smem:[#allocation37_spill]] %s3348_s3 }
   0x5   :  { %3372 = sst [smem:[#allocation38_spill]] %s3358_s13 }
   0x6   :  { %18 = vsyncpa [#allocation3], 0 }
   0x7   :  { %20 = vsyncpa [#allocation3 + $0x1], 0 }
   0x8   :  { %21 = vsyncpa [#allocation6], 0 }
   0x9   :  { %22 = vsyncpa [#allocation9], 0 }
   0xa   :  { %23 = vsyncpa [#allocation12], 0 }
   0xb   :  { %24 = vsyncpa [#allocation15], 0 }
   0xc   :  { %25 = vsyncpa [#allocation18], 0 }
   0xd   :  { %26 = vsyncpa [#allocation21], 0 }
   0xe   :  { %27 = vsyncpa [#allocation4], 0 }
   0xf   :  { %29 = vsyncpa [#allocation4 + $0x1], 0  ;;  %s2768_s25 = smov 0   ;;  %s2770_s26 = smov 0  }
  0x10   :  { %s2772_s27 = smov 0   ;;  %s2774_s28 = smov 0  }
  0x11 LB: > { %s2669_s29 = smov [#allocation5]   ;;  %s2789_s14 = sadd.s32 4294967295, %s2667_s28   ;;  %s2667_s28 = sphi %s2774_s28, %s3411_s28   ;;  %s2663_s27 = sphi %s2772_s27, %s3410_s27   ;;  %s2659_s26 = sphi %s2770_s26, %s3409_s26   ;;  %s2655_s25 = sphi %s2768_s25, %s3408_s25  }
  0x12   : > { %s357_s30 = sshll.u32 %s2669_s29, 4  ;;  %3373 = sst [smem:[#allocation32_spill]] %s2789_s14  ;;  %s2794_s30 = int_to_ptr.vmem [resolvable:$true] %s357_s30 }
  0x13   : > { %p1776_p0 = scmp.ge.s32.totalorder %s2667_s28, 1  ;;  %p3365_p1 = scmp.eq.s32.totalorder %s2789_s14, 0 }
  0x14   : > { %p344_p2 = scmp.lt.s32.totalorder %s2667_s28, 3  ;;  %s2670_s16 = smov [#allocation8]  }
  0x15   : > { %s378_s17 = sshll.u32 %s2670_s16, 4  ;;  %s2671_s19 = smov [#allocation11]   ;;  %s2803_s17 = int_to_ptr.vmem [resolvable:$true] %s378_s17 }
  0x16   : > { %p2796_p3 = pnand %p1776_p0, %p344_p2  ;;  %s402_s20 = sshll.u32 %s2671_s19, 4  ;;  %s2811_s20 = int_to_ptr.vmem [resolvable:$true] %s402_s20 }
  0x17   : > { %s3377_s1 = sld [smem:[#allocation35_spill]] }
  0x18   : > { %s3374_s15 = scalar_select %p2796_p3, 1, 0 }
  0x19   : > { %p2045_p5 = pneg %p2796_p3 }
  0x1a   : > { %3375 = sst [smem:[#allocation33_spill]] %s3374_s15 }
  0x1b   : > { %p2807_p6 = pnand %p2045_p5, %p3365_p1 }
  0x1d   : > { %s2211_s23 = scalar_lea.hbm %s3377_s1, 16  ;;  %p2821_p8 = pneg %p2807_p6 }
  0x1e   : > { %p2212_p7 = scmp.ne.s32.totalorder %s3377_s1, %s2211_s23  ;;  %p2218_p11 = scmp.lt.u32.totalorder %s2211_s23, %s3377_s1 }
  0x20   : > { %p2214_p9 = pnand %p2821_p8, %p2212_p7 }
  0x22   : > { %p2215_p10 = pneg %p2214_p9 }
  0x24   : > { %p2220_p12 = pnand %p2218_p11, %p2215_p10 }
  0x26   : > { %2223 = shalt.err (!%p2220_p12)
}
  0x27   : > { %s2224_s21 = scalar_lea.vmem %s2794_s30, 16  ;;  %s2231_s22 = scalar_lea.vmem %s2794_s30, 32 }
  0x28   : > { %p2225_p13 = scmp.ne.s32.totalorder %s2794_s30, %s2224_s21  ;;  %p2232_p5 = scmp.lt.s32.totalorder %s2794_s30, %s2794_s30 }
  0x29   : > { %p2233_p7 = scmp.lt.s32.totalorder %s2231_s22, %s2224_s21 }
  0x2a   : > { %p2227_p0 = pnand %p2225_p13, %p2821_p8 }
  0x2b   : > { %p2234_p9 = por %p2233_p7, %p2232_p5 }
  0x2c   : > { %p2228_p2 = pneg %p2227_p0 }
  0x2e   : > { %p2235_p4 = pnand %p2234_p9, %p2228_p2 }
  0x30   : > { %2238 = shalt.err (!%p2235_p4)
}
  0x31   : > { %2048 = dma.hbm_to_vmem [thread:$0]  (!%p2807_p6), %s3377_s1, 16, %s2794_s30, [#allocation6]  }
  0x32   : > { %s3379_s3 = sld [smem:[#allocation37_spill]] }
  0x38   : > { %s2239_s19 = scalar_lea.hbm %s3379_s3, 256 }
  0x39   : > { %p2240_p10 = scmp.ne.s32.totalorder %s3379_s3, %s2239_s19  ;;  %p2246_p4 = scmp.lt.u32.totalorder %s2239_s19, %s3379_s3 }
  0x3b   : > { %p2242_p11 = pnand %p2240_p10, %p2821_p8 }
  0x3d   : > { %p2243_p12 = pneg %p2242_p11 }
  0x3f   : > { %p2248_p13 = pnand %p2246_p4, %p2243_p12 }
  0x41   : > { %2251 = shalt.err (!%p2248_p13)
}
  0x42   : > { %s2252_s30 = scalar_lea.vmem %s2803_s17, 256  ;;  %p2260_p7 = scmp.lt.s32.totalorder %s2803_s17, %s2803_s17 }
  0x43   : > { %p2253_p0 = scmp.ne.s32.totalorder %s2803_s17, %s2252_s30  ;;  %p2261_p9 = scmp.lt.s32.totalorder %s2252_s30, %s2252_s30 }
  0x45   : > { %p2255_p2 = pnand %p2253_p0, %p2821_p8  ;;  %p2262_p10 = por %p2261_p9, %p2260_p7 }
  0x47   : > { %p2256_p5 = pneg %p2255_p2 }
  0x49   : > { %p2263_p11 = pnand %p2262_p10, %p2256_p5 }
  0x4b   : > { %2266 = shalt.err (!%p2263_p11)
}
  0x4c   : > { %s2672_s0 = smov 64   ;;  %s2673_s15 = smov 4  }
  0x4d   : > { %2054 = dma.hbm_to_vmem [thread:$0]  (!%p2807_p6), %s3379_s3, 256, %s2803_s17, [#allocation9], %s2672_s0, %s2672_s0, %s2673_s15  }
  0x4e   : > { %s2267_s19 = scalar_lea.hbm %s3350_s5, 256 }
  0x4f   : > { %p2268_p12 = scmp.ne.s32.totalorder %s3350_s5, %s2267_s19  ;;  %p2274_p0 = scmp.lt.u32.totalorder %s2267_s19, %s3350_s5 }
  0x51   : > { %p2270_p4 = pnand %p2268_p12, %p2821_p8 }
  0x53   : > { %p2271_p13 = pneg %p2270_p4 }
  0x55   : > { %p2276_p2 = pnand %p2274_p0, %p2271_p13 }
  0x57   : > { %2279 = shalt.err (!%p2276_p2)
}
  0x58   : > { %s2280_s17 = scalar_lea.vmem %s2811_s20, 256  ;;  %p2288_p10 = scmp.lt.s32.totalorder %s2811_s20, %s2811_s20 }
  0x59   : > { %p2281_p5 = scmp.ne.s32.totalorder %s2811_s20, %s2280_s17  ;;  %p2289_p11 = scmp.lt.s32.totalorder %s2280_s17, %s2280_s17 }
  0x5b   : > { %p2283_p7 = pnand %p2281_p5, %p2821_p8  ;;  %p2290_p12 = por %p2289_p11, %p2288_p10 }
  0x5d   : > { %p2284_p9 = pneg %p2283_p7 }
  0x5f   : > { %p2291_p4 = pnand %p2290_p12, %p2284_p9 }
  0x61   : > { %2294 = shalt.err (!%p2291_p4)
}
  0x62   : > { %2060 = dma.hbm_to_vmem [thread:$0]  (!%p2807_p6), %s3350_s5, 256, %s2811_s20, [#allocation12], %s2672_s0, %s2672_s0, %s2673_s15  }
  0x63   : > { %s2674_s23 = smov [#allocation14]   ;;  %s2675_s29 = smov [#allocation17]  }
  0x64   : > { %s427_s24 = sshll.u32 %s2674_s23, 4  ;;  %s448_s19 = sshll.u32 %s2675_s29, 4  ;;  %s428_s24 = int_to_ptr.vmem [resolvable:$true] %s427_s24  ;;  %s449_s19 = int_to_ptr.vmem [resolvable:$true] %s448_s19 }
  0x65   : > { %s2295_s30 = scalar_lea.hbm %s3352_s7, 16 }
  0x66   : > { %p2296_p13 = scmp.ne.s32.totalorder %s3352_s7, %s2295_s30  ;;  %p2302_p5 = scmp.lt.u32.totalorder %s2295_s30, %s3352_s7 }
  0x68   : > { %p2298_p0 = pnand %p2296_p13, %p2821_p8 }
  0x6a   : > { %p2299_p2 = pneg %p2298_p0 }
  0x6c   : > { %p2304_p7 = pnand %p2302_p5, %p2299_p2 }
  0x6e   : > { %2307 = shalt.err (!%p2304_p7)
}
  0x6f   : > { %s2308_s20 = scalar_lea.vmem %s428_s24, 16  ;;  %s2315_s13 = scalar_lea.vmem %s428_s24, 32 }
  0x70   : > { %p2309_p9 = scmp.ne.s32.totalorder %s428_s24, %s2308_s20  ;;  %p2316_p12 = scmp.lt.s32.totalorder %s428_s24, %s428_s24 }
  0x71   : > { %p2317_p4 = scmp.lt.s32.totalorder %s2315_s13, %s2308_s20 }
  0x72   : > { %p2311_p10 = pnand %p2309_p9, %p2821_p8 }
  0x73   : > { %p2318_p1 = por %p2317_p4, %p2316_p12 }
  0x74   : > { %p2312_p11 = pneg %p2311_p10 }
  0x76   : > { %p2319_p3 = pnand %p2318_p1, %p2312_p11 }
  0x78   : > { %2322 = shalt.err (!%p2319_p3)
}
  0x79   : > { %2066 = dma.hbm_to_vmem [thread:$0]  (!%p2807_p6), %s3352_s7, 16, %s428_s24, [#allocation15]  }
  0x7a   : > { %s2323_s21 = scalar_lea.hbm %s3354_s9, 256 }
  0x7b   : > { %p2324_p13 = scmp.ne.s32.totalorder %s3354_s9, %s2323_s21  ;;  %p2330_p3 = scmp.lt.u32.totalorder %s2323_s21, %s3354_s9 }
  0x7d   : > { %p2326_p0 = pnand %p2324_p13, %p2821_p8 }
  0x7f   : > { %p2327_p1 = pneg %p2326_p0 }
  0x81   : > { %p2332_p2 = pnand %p2330_p3, %p2327_p1 }
  0x83   : > { %2335 = shalt.err (!%p2332_p2)
}
  0x84   : > { %s2336_s20 = scalar_lea.vmem %s449_s19, 256  ;;  %p2344_p10 = scmp.lt.s32.totalorder %s449_s19, %s449_s19 }
  0x85   : > { %p2337_p5 = scmp.ne.s32.totalorder %s449_s19, %s2336_s20  ;;  %p2345_p11 = scmp.lt.s32.totalorder %s2336_s20, %s2336_s20 }
  0x87   : > { %p2339_p7 = pnand %p2337_p5, %p2821_p8  ;;  %p2346_p12 = por %p2345_p11, %p2344_p10 }
  0x89   : > { %p2340_p9 = pneg %p2339_p7 }
  0x8b   : > { %p2347_p4 = pnand %p2346_p12, %p2340_p9 }
  0x8d   : > { %2350 = shalt.err (!%p2347_p4)
}
  0x8e   : > { %2072 = dma.hbm_to_vmem [thread:$0]  (!%p2807_p6), %s3354_s9, 256, %s449_s19, [#allocation18], %s2672_s0, %s2672_s0, %s2673_s15  }
  0x8f   : > { %s2676_s3 = smov [#allocation20]   ;;  %s2677_s14 = smov [#allocation7]  }
  0x90   : > { %s472_s23 = sshll.u32 %s2676_s3, 4  ;;  %s368_s29 = sshll.u32 %s2677_s14, 4  ;;  %s473_s23 = int_to_ptr.vmem [resolvable:$true] %s472_s23  ;;  %s369_s29 = int_to_ptr.vmem [resolvable:$true] %s368_s29 }
  0x91   : > { %s2351_s30 = scalar_lea.hbm %s3356_s11, 1024 }
  0x92   : > { %p2352_p13 = scmp.ne.s32.totalorder %s3356_s11, %s2351_s30  ;;  %p2358_p3 = scmp.lt.u32.totalorder %s2351_s30, %s3356_s11 }
  0x94   : > { %p2354_p0 = pnand %p2352_p13, %p2821_p8 }
  0x96   : > { %p2355_p1 = pneg %p2354_p0 }
  0x98   : > { %p2360_p2 = pnand %p2358_p3, %p2355_p1 }
  0x9a   : > { %2363 = shalt.err (!%p2360_p2)
}
  0x9b   : > { %s2364_s19 = scalar_lea.vmem %s473_s23, 1024  ;;  %p2372_p10 = scmp.lt.s32.totalorder %s473_s23, %s473_s23 }
  0x9c   : > { %p2365_p5 = scmp.ne.s32.totalorder %s473_s23, %s2364_s19  ;;  %p2373_p11 = scmp.lt.s32.totalorder %s2364_s19, %s2364_s19 }
  0x9e   : > { %p2367_p7 = pnand %p2365_p5, %p2821_p8  ;;  %p2374_p12 = por %p2373_p11, %p2372_p10 }
  0xa0   : > { %p2368_p9 = pneg %p2367_p7 }
  0xa2   : > { %p2375_p4 = pnand %p2374_p12, %p2368_p9 }
  0xa4   : > { %2378 = shalt.err (!%p2375_p4)
}
  0xa5   : > { %2078 = dma.hbm_to_vmem [thread:$0]  (!%p2807_p6), %s3356_s11, 1024, %s473_s23, [#allocation21], %s2672_s0, %s2672_s0, %s2673_s15  }
  0xa6   : > { %s3380_s2 = sld [smem:[#allocation36_spill]] }
  0xac   : > { %s2379_s22 = scalar_lea.hbm %s3380_s2, 16 }
  0xad   : > { %p2380_p13 = scmp.ne.s32.totalorder %s3380_s2, %s2379_s22  ;;  %p2386_p3 = scmp.lt.u32.totalorder %s2379_s22, %s3380_s2 }
  0xaf   : > { %p2382_p0 = pnand %p2380_p13, %p2821_p8 }
  0xb1   : > { %p2383_p1 = pneg %p2382_p0 }
  0xb3   : > { %p2388_p2 = pnand %p2386_p3, %p2383_p1 }
  0xb5   : > { %2391 = shalt.err (!%p2388_p2)
}
  0xb6   : > { %s2392_s24 = scalar_lea.vmem %s369_s29, 16  ;;  %s2399_s0 = scalar_lea.vmem %s369_s29, 32 }
  0xb7   : > { %p2393_p5 = scmp.ne.s32.totalorder %s369_s29, %s2392_s24  ;;  %p2400_p10 = scmp.lt.s32.totalorder %s369_s29, %s369_s29 }
  0xb8   : > { %p2401_p11 = scmp.lt.s32.totalorder %s2399_s0, %s2392_s24 }
  0xb9   : > { %p2395_p7 = pnand %p2393_p5, %p2821_p8 }
  0xba   : > { %p2402_p12 = por %p2401_p11, %p2400_p10 }
  0xbb   : > { %p2396_p9 = pneg %p2395_p7 }
  0xbd   : > { %p2403_p4 = pnand %p2402_p12, %p2396_p9 }
  0xbf   : > { %2406 = shalt.err (!%p2403_p4)
}
  0xc0   : > { %2051 = dma.hbm_to_vmem [thread:$0]  (!%p2807_p6), %s3380_s2, 16, %s369_s29, [#allocation6]  }
  0xc1   : > { %s2678_s19 = smov [#allocation10]   ;;  %s2679_s3 = smov [#allocation13]  }
  0xc2   : > { %s392_s13 = sshll.u32 %s2678_s19, 4  ;;  %s416_s14 = sshll.u32 %s2679_s3, 4  ;;  %s393_s13 = int_to_ptr.vmem [resolvable:$true] %s392_s13  ;;  %s417_s14 = int_to_ptr.vmem [resolvable:$true] %s416_s14 }
  0xc3   : > { %s2407_s30 = scalar_lea.hbm %s3349_s4, 16 }
  0xc4   : > { %p2408_p13 = scmp.ne.s32.totalorder %s3349_s4, %s2407_s30  ;;  %p2414_p3 = scmp.lt.u32.totalorder %s2407_s30, %s3349_s4 }
  0xc6   : > { %p2410_p0 = pnand %p2408_p13, %p2821_p8 }
  0xc8   : > { %p2411_p1 = pneg %p2410_p0 }
  0xca   : > { %p2416_p2 = pnand %p2414_p3, %p2411_p1 }
  0xcc   : > { %2419 = shalt.err (!%p2416_p2)
}
  0xcd   : > { %s2420_s29 = scalar_lea.vmem %s393_s13, 16  ;;  %s2427_s0 = scalar_lea.vmem %s393_s13, 32 }
  0xce   : > { %p2421_p5 = scmp.ne.s32.totalorder %s393_s13, %s2420_s29  ;;  %p2428_p10 = scmp.lt.s32.totalorder %s393_s13, %s393_s13 }
  0xcf   : > { %p2429_p11 = scmp.lt.s32.totalorder %s2427_s0, %s2420_s29 }
  0xd0   : > { %p2423_p7 = pnand %p2421_p5, %p2821_p8 }
  0xd1   : > { %p2430_p12 = por %p2429_p11, %p2428_p10 }
  0xd2   : > { %p2424_p9 = pneg %p2423_p7 }
  0xd4   : > { %p2431_p4 = pnand %p2430_p12, %p2424_p9 }
  0xd6   : > { %2434 = shalt.err (!%p2431_p4)
}
  0xd7   : > { %2057 = dma.hbm_to_vmem [thread:$0]  (!%p2807_p6), %s3349_s4, 16, %s393_s13, [#allocation9]  }
  0xd8   : > { %s2435_s21 = scalar_lea.hbm %s3351_s6, 16 }
  0xd9   : > { %p2436_p13 = scmp.ne.s32.totalorder %s3351_s6, %s2435_s21  ;;  %p2442_p3 = scmp.lt.u32.totalorder %s2435_s21, %s3351_s6 }
  0xdb   : > { %p2438_p0 = pnand %p2436_p13, %p2821_p8 }
  0xdd   : > { %p2439_p1 = pneg %p2438_p0 }
  0xdf   : > { %p2444_p2 = pnand %p2442_p3, %p2439_p1 }
  0xe1   : > { %2447 = shalt.err (!%p2444_p2)
}
  0xe2   : > { %s2448_s20 = scalar_lea.vmem %s417_s14, 16  ;;  %s2455_s13 = scalar_lea.vmem %s417_s14, 32 }
  0xe3   : > { %p2449_p5 = scmp.ne.s32.totalorder %s417_s14, %s2448_s20  ;;  %p2456_p10 = scmp.lt.s32.totalorder %s417_s14, %s417_s14 }
  0xe4   : > { %p2457_p11 = scmp.lt.s32.totalorder %s2455_s13, %s2448_s20 }
  0xe5   : > { %p2451_p7 = pnand %p2449_p5, %p2821_p8 }
  0xe6   : > { %p2458_p12 = por %p2457_p11, %p2456_p10 }
  0xe7   : > { %p2452_p9 = pneg %p2451_p7 }
  0xe9   : > { %p2459_p4 = pnand %p2458_p12, %p2452_p9 }
  0xeb   : > { %2462 = shalt.err (!%p2459_p4)
}
  0xec   : > { %2063 = dma.hbm_to_vmem [thread:$0]  (!%p2807_p6), %s3351_s6, 16, %s417_s14, [#allocation12]  }
  0xed   : > { %s2680_s0 = smov [#allocation16]   ;;  %s2681_s23 = smov [#allocation19]  }
  0xee   : > { %s438_s15 = sshll.u32 %s2680_s0, 4  ;;  %s462_s19 = sshll.u32 %s2681_s23, 4  ;;  %s439_s15 = int_to_ptr.vmem [resolvable:$true] %s438_s15  ;;  %s463_s19 = int_to_ptr.vmem [resolvable:$true] %s462_s19 }
  0xef   : > { %s2463_s22 = scalar_lea.hbm %s3353_s8, 16 }
  0xf0   : > { %p2464_p13 = scmp.ne.s32.totalorder %s3353_s8, %s2463_s22  ;;  %p2470_p3 = scmp.lt.u32.totalorder %s2463_s22, %s3353_s8 }
  0xf2   : > { %p2466_p0 = pnand %p2464_p13, %p2821_p8 }
  0xf4   : > { %p2467_p1 = pneg %p2466_p0 }
  0xf6   : > { %p2472_p2 = pnand %p2470_p3, %p2467_p1 }
  0xf8   : > { %2475 = shalt.err (!%p2472_p2)
}
  0xf9   : > { %s2476_s14 = scalar_lea.vmem %s439_s15, 16  ;;  %s2483_s13 = scalar_lea.vmem %s439_s15, 32 }
  0xfa   : > { %p2477_p5 = scmp.ne.s32.totalorder %s439_s15, %s2476_s14  ;;  %p2484_p10 = scmp.lt.s32.totalorder %s439_s15, %s439_s15 }
  0xfb   : > { %p2485_p11 = scmp.lt.s32.totalorder %s2483_s13, %s2476_s14 }
  0xfc   : > { %p2479_p7 = pnand %p2477_p5, %p2821_p8 }
  0xfd   : > { %p2486_p12 = por %p2485_p11, %p2484_p10 }
  0xfe   : > { %p2480_p9 = pneg %p2479_p7 }
 0x100   : > { %p2487_p4 = pnand %p2486_p12, %p2480_p9 }
 0x102   : > { %2490 = shalt.err (!%p2487_p4)
}
 0x103   : > { %2069 = dma.hbm_to_vmem [thread:$0]  (!%p2807_p6), %s3353_s8, 16, %s439_s15, [#allocation15]  }
 0x104   : > { %s2491_s3 = scalar_lea.hbm %s3355_s10, 16 }
 0x105   : > { %p2492_p13 = scmp.ne.s32.totalorder %s3355_s10, %s2491_s3  ;;  %p2498_p3 = scmp.lt.u32.totalorder %s2491_s3, %s3355_s10 }
 0x107   : > { %p2494_p0 = pnand %p2492_p13, %p2821_p8 }
 0x109   : > { %p2495_p1 = pneg %p2494_p0 }
 0x10b   : > { %p2500_p2 = pnand %p2498_p3, %p2495_p1 }
 0x10d   : > { %2503 = shalt.err (!%p2500_p2)
}
 0x10e   : > { %s2504_s1 = scalar_lea.vmem %s463_s19, 16  ;;  %s2511_s15 = scalar_lea.vmem %s463_s19, 32 }
 0x10f   : > { %p2505_p5 = scmp.ne.s32.totalorder %s463_s19, %s2504_s1  ;;  %p2512_p10 = scmp.lt.s32.totalorder %s463_s19, %s463_s19 }
 0x110   : > { %p2513_p11 = scmp.lt.s32.totalorder %s2511_s15, %s2504_s1 }
 0x111   : > { %p2507_p7 = pnand %p2505_p5, %p2821_p8 }
 0x112   : > { %p2514_p12 = por %p2513_p11, %p2512_p10 }
 0x113   : > { %p2508_p9 = pneg %p2507_p7 }
 0x115   : > { %p2515_p4 = pnand %p2514_p12, %p2508_p9 }
 0x117   : > { %2518 = shalt.err (!%p2515_p4)
}
 0x118   : > { %2075 = dma.hbm_to_vmem [thread:$0]  (!%p2807_p6), %s3355_s10, 16, %s463_s19, [#allocation18]  }
 0x119   : > { %s2682_s13 = smov [#allocation22]   ;;  %s2519_s23 = scalar_lea.hbm %s3357_s12, 16 }
 0x11a   : > { %s486_s24 = sshll.u32 %s2682_s13, 4  ;;  %p2520_p13 = scmp.ne.s32.totalorder %s3357_s12, %s2519_s23  ;;  %s487_s24 = int_to_ptr.vmem [resolvable:$true] %s486_s24 }
 0x11b   : > { %p2526_p3 = scmp.lt.u32.totalorder %s2519_s23, %s3357_s12 }
 0x11c   : > { %p2522_p0 = pnand %p2520_p13, %p2821_p8 }
 0x11e   : > { %p2523_p1 = pneg %p2522_p0 }
 0x120   : > { %p2528_p2 = pnand %p2526_p3, %p2523_p1 }
 0x122   : > { %2531 = shalt.err (!%p2528_p2)
}
 0x123   : > { %s2532_s19 = scalar_lea.vmem %s487_s24, 16  ;;  %s2539_s17 = scalar_lea.vmem %s487_s24, 32 }
 0x124   : > { %p2533_p5 = scmp.ne.s32.totalorder %s487_s24, %s2532_s19  ;;  %p2540_p10 = scmp.lt.s32.totalorder %s487_s24, %s487_s24 }
 0x125   : > { %p2541_p11 = scmp.lt.s32.totalorder %s2539_s17, %s2532_s19 }
 0x126   : > { %p2535_p7 = pnand %p2533_p5, %p2821_p8 }
 0x127   : > { %p2542_p12 = por %p2541_p11, %p2540_p10 }
 0x128   : > { %p2536_p9 = pneg %p2535_p7 }
 0x12a   : > { %p2543_p4 = pnand %p2542_p12, %p2536_p9 }
 0x12c   : > { %2546 = shalt.err (!%p2543_p4)
}
 0x12d   : > { %s3381_s16 = sld [smem:[#allocation32_spill]]  ;;  %s1775_s20 = sadd.s32 4294967294, %s2667_s28  }
 0x12e   : > { %2081 = dma.hbm_to_vmem [thread:$0]  (!%p2807_p6), %s3357_s12, 16, %s487_s24, [#allocation21]  }
 0x12f   : > { %s3065_s18 = sadd.s32 1, %s2667_s28   ;;  %s42_s13 = sadd.s32 1, %s2663_s27 }
 0x130   : > { %s39_s14 = ssub.s32 %s2667_s28, %s3065_s18  ;;  %p49_p13 = scmp.ne.s32.totalorder %s2663_s27, %s2659_s26 }
 0x131   : > { %p40_p8 = scmp.eq.s32.totalorder %s39_s14, 0  ;;  %p50_p0 = scmp.eq.s32.totalorder %s2667_s28, 0 }
 0x132   : > { %p55_p1 = scmp.ne.s32.totalorder %s2659_s26, %s2655_s25  ;;  %p337_p7 = scmp.eq.s32.totalorder %s1775_s20, 1 }
 0x133   : > { %s3076_s29 = scalar_select %p40_p8, %s2663_s27, %s42_s13  }
 0x134   : > { %p3078_p3 = por %p50_p0, %p49_p13  ;;  %p3383_p2 = scmp.eq.s32.totalorder %s3381_s16, 0 }
 0x135   : > { %p331_p5 = scmp.eq.s32.totalorder %s3381_s16, 1  ;;  %p2102_p9 = scmp.lt.s32.totalorder %s2667_s28, 2 }
 0x136   : > { %p3084_p6 = por %p3383_p2, %p55_p1  ;;  %s497_s23 = sand.u32 1, %s2663_s27  }
 0x137   : > { %p3091_p10 = por %p331_p5, %p49_p13  ;;  %p3095_p11 = por %p337_p7, %p55_p1 }
 0x138   : > { %s1790_s22 = sshll.u32 %s497_s23, 3  ;;  %s1791_s30 = sshll.u32 %s2667_s28, 7 }
 0x139   : > { %s3385_s3 = scalar_select %p3091_p10, 1, 0 }
 0x13a   : > { %s3386_s21 = scalar_select %p3095_p11, 1, 0 }
 0x13b   : > { %s3387_s1 = sld [smem:[#allocation34_spill]]  ;;  %s501_s16 = scalar_lea.vmem [#allocation2], %s1790_s22 }
 0x13c   : > { %s508_s20 = sshll.u32 %s501_s16, 4  ;;  %p3109_p12 = pnand %p2102_p9, %p3078_p3  ;;  %s3105_s20 = int_to_ptr.vmem [resolvable:$true] %s508_s20 }
 0x13d   : > { %s498_s13 = scalar_lea.sflag [#allocation3], %s497_s23 }
 0x13e   : > { %p2549_p8 = pneg %p3109_p12 }
 0x141   : > { %s3103_s15 = scalar_lea.hbm %s3387_s1, %s1791_s30  ;;  %s2552_s19 = scalar_lea.hbm %s3387_s1, 256 }
 0x142   : > { %s2547_s2 = scalar_lea.hbm %s3103_s15, 128  ;;  %p2553_p1 = scmp.lt.u32.totalorder %s3103_s15, %s3387_s1 }
 0x143   : > { %p2548_p4 = scmp.ne.s32.totalorder %s3103_s15, %s2547_s2  ;;  %p2554_p3 = scmp.lt.u32.totalorder %s2552_s19, %s2547_s2 }
 0x144   : > { %p2556_p5 = scmp.lt.u32.totalorder %s2547_s2, %s3103_s15 }
 0x145   : > { %p2550_p13 = pnand %p2549_p8, %p2548_p4  ;;  %p2555_p2 = por %p2554_p3, %p2553_p1 }
 0x147   : > { %p2551_p0 = pneg %p2550_p13  ;;  %p2557_p7 = por %p2556_p5, %p2555_p2 }
 0x149   : > { %p2558_p9 = pnand %p2557_p7, %p2551_p0 }
 0x14b   : > { %2561 = shalt.err (!%p2558_p9)
}
 0x14c   : > { %s2562_s23 = scalar_lea.vmem %s3105_s20, 128  ;;  %s2683_s16 = smov [#allocation2]  }
 0x14d   : > { %p2563_p4 = scmp.ne.s32.totalorder %s3105_s20, %s2562_s23  ;;  %s2567_s22 = sshll.u32 %s2683_s16, 4  ;;  %s2568_s22 = int_to_ptr.vmem [resolvable:$false] %s2567_s22 }
 0x14e   : > { %s2569_s30 = scalar_lea.vmem %s2568_s22, 256  ;;  %p2570_p10 = scmp.lt.s32.totalorder %s3105_s20, %s2568_s22 }
 0x14f   : > { %p2565_p13 = pnand %p2563_p4, %p2549_p8  ;;  %p2571_p1 = scmp.lt.s32.totalorder %s2569_s30, %s2562_s23 }
 0x151   : > { %p2566_p11 = pneg %p2565_p13  ;;  %p2572_p3 = por %p2571_p1, %p2570_p10 }
 0x153   : > { %p2573_p2 = pnand %p2572_p3, %p2566_p11 }
 0x155   : > { %2576 = shalt.err (!%p2573_p2)
}
 0x156   : > { %2085 = dma.hbm_to_vmem [thread:$0]  (!%p3109_p12), %s3103_s15, 128, %s3105_s20, %s498_s13  }
 0x157   : > { %s3389_s2 = sld [smem:[#allocation33_spill]] }
 0x15d   : > { %p3390_p0 = scmp.ne.s32.totalorder %s3389_s2, 0 }
 0x15e   : > { %s3141_s19 = sand.u32 (!%p3390_p0), 1, %s2659_s26  }
 0x15f   : > { %517 = sbr.rel (%p3390_p0) target bundleno = 4612 (0x1204), region = 72  ;;  %s1793_s0 = sshll.u32 (!%p3390_p0), %s3141_s19, 3 }
 0x160   : > { %s520_s17 = scalar_lea.sflag (!%p3390_p0), [#allocation3], %s3141_s19  ;;  %s523_s23 = scalar_lea.vmem (!%p3390_p0), [#allocation2], %s1793_s0 }
 0x166   : > { %2622 = dma.done.wait (%p3084_p6), %s520_s17, 128  }
 0x167   : > { %2624 = vsyncadd (%p3084_p6), %s520_s17, 4294967168  ;;  %s3391_s15 = sld [smem:[#allocation32_spill]] }
 0x16d   : > { %p3392_p10 = scmp.eq.s32.totalorder %s3391_s15, 0 }
 0x16f   : > { %2626 = dma.done.wait (%p3392_p10), [#allocation6], 32   ;;  %p3393_p11 = pmov %p3392_p10 }
 0x170   : > { %p3394_p12 = pmov %p3392_p10 }
 0x171   : > { %2628 = vsyncadd (%p3393_p11), [#allocation6], 4294967264 }
 0x172   : > { %2630 = dma.done.wait (%p3394_p12), [#allocation9], 272   ;;  %p3395_p8 = pmov %p3392_p10 }
 0x174   : > { %2632 = vsyncadd (%p3395_p8), [#allocation9], 4294967024  ;;  %p3396_p5 = pmov %p3395_p8 }
 0x176   : > { %2634 = dma.done.wait (%p3396_p5), [#allocation12], 272   ;;  %p3397_p7 = pmov %p3396_p5 }
 0x177   : > { %p3398_p6 = pmov %p3396_p5 }
 0x178   : > { %2636 = vsyncadd (%p3397_p7), [#allocation12], 4294967024 }
 0x179   : > { %2638 = dma.done.wait (%p3398_p6), [#allocation15], 32   ;;  %p3399_p9 = pmov %p3396_p5 }
 0x17a   : > { %p3400_p4 = pmov %p3396_p5 }
 0x17b   : > { %2640 = vsyncadd (%p3399_p9), [#allocation15], 4294967264 }
 0x17c   : > { %2642 = dma.done.wait (%p3400_p4), [#allocation18], 272   ;;  %p3401_p13 = pmov %p3400_p4 }
 0x17d   : > { %p3402_p1 = pmov %p3400_p4 }
 0x17e   : > { %2644 = vsyncadd (%p3401_p13), [#allocation18], 4294967024 }
 0x17f   : > { %2646 = dma.done.wait (%p3402_p1), [#allocation21], 1040   ;;  %p3403_p3 = pmov %p3402_p1 }
 0x180   : > { %vm618_vm0 = vcmask 261120   ;;  %v3175_v0 = vld [vmem:[%s523_s23] sm:$0xff]  ;;  %v2175_v7 = vld [vmem:[#allocation8] sm:$0xff]   ;;  %v2684_v8 = vmov 0.0   ;;  %vm2685_vm1 = vmmov 0   ;;  %s2686_s24 = smov 64  }
 0x181   : > { %2648 = vsyncadd (%p3403_p3), [#allocation21], 4294966256  ;;  %v619_v1 = vsel %vm618_vm0, %v3175_v0, 0.0  ;;  %1885 = vmatprep.subr.bf16.mxu1 %v2684_v8  ;;  %1889 = vmatprep.mubr.msk.bf16.mxu1 %vm2685_vm1, %v2684_v8  ;;  %v2176_v9 = vld [vmem:[#allocation8 + $0x8] sm:$0xff]   ;;  %v1807_v14 = vld [vmem:[#allocation5] ss:$0 sm:$0xff] }
 0x182   : > { %620 = vadd.xlane.f32.xlu0 %v619_v1  ;;  %1886 = vmatpush3.bf16.msra.mxu1 %v2175_v7  ;;  %v1808_v16 = vld [vmem:[#allocation7] ss:$0 sm:$0xff]  ;;  %v1809_v20 = vld [vmem:[#allocation10] ss:$0 sm:$0xff]  ;;  %s2687_s20 = smov 96   ;;  %vm718_vm2 = vcmask 64512  }
 0x183   : > { %1911 = vmatprep.subr.bf16.mxu0 %v2684_v8  ;;  %1887 = vmatprep.subr.bf16.mxu1 %v2684_v8  ;;  %vm782_vm3 = vcmask 1043456   ;;  %s2688_s14 = smov 88   ;;  %s2689_s13 = smov 120   ;;  %v939_v1 = vld [vmem:[#allocation11 + $0x4] sm:$0xf] }
 0x184   : > { %1913 = vmatprep.mubr.msk.bf16.mxu0 %vm2685_vm1, %v2684_v8  ;;  %s2690_s16 = smov 56   ;;  %s2691_s22 = smov 80  }
 0x185   : > { %s2692_s30 = smov 112   ;;  %s2693_s2 = smov 48  }
 0x186   : > { %1888 = vmatpush3.bf16.msra.mxu1 %v2176_v9  ;;  %s2694_s17 = smov 72   ;;  %s2695_s23 = smov 104  }
 0x187   : > { %1893 = vmatprep.subr.bf16.mxu1 %v2684_v8  ;;  %p3405_p0 = scmp.ne.s32.totalorder %s3385_s3, 0 }
 0x20f   : > { %v621_v2 = vpop.xlane.xlu0 %620 }
 0x210   : > { %v623_v3 = vmul.f32 0.03125, %v621_v2  ;;  %v944_v2 = vsel %vm782_vm3, %v939_v1, 0 }
 0x212   : > { %v624_v4 = vsub.f32 %v3175_v0, %v623_v3 }
 0x214   : > { %v625_v5 = vmul.f32 %v624_v4, %v624_v4 }
 0x216   : > { %v626_v6 = vsel %vm618_vm0, %v625_v5, 0.0  ;;  %v827_v5 = vld [vmem:[#allocation11] sm:$0xf] }
 0x217   : > { %627 = vadd.xlane.f32.xlu0 %v626_v6  ;;  %v990_v9 = vsel %vm782_vm3, %v827_v5, 0 }
 0x2a4   : > { %v628_v10 = vpop.xlane.xlu0 %627 }
 0x2a5   : > { %v629_v11 = vmul.f32 0.03125, %v628_v10 }
 0x2a7   : > { %v630_v12 = vadd.f32 1e-05, %v629_v11 }
 0x2a9   : > { %2187 = vrsqrt.f32 %v630_v12 }
 0x2b3   : > { %v2188_v13 = vpop.eup %2187 }
 0x2b4   : > { %v632_v15 = vmul.f32 %v2188_v13, %v624_v4 }
 0x2b6   : > { %v639_v17 = vmul.f32 %v1807_v14, %v632_v15 }
 0x2b8   : > { %v646_v18 = vadd.f32 %v1808_v16, %v639_v17 }
 0x2ba   : > { %v647_v19 = vpack.c.bf16 %v646_v18, %v646_v18 }
 0x2bc   : > { %1890 = vmatmul.mubr.msk.bf16.vlgmr.msra.gmra.mrb[0].mxu1 %vm618_vm0, %v647_v19 }
 0x2bd   : > { %1895 = vmatprep.mubr.msk.bf16.mxu1 %vm2685_vm1, %v2684_v8 }
 0x38f   : > { %v708_v21 = vpop.f32.mrb[0].mxu1 }
 0x390   : > { %v709_v22 = vadd.f32 %v1809_v20, %v708_v21  ;;  %v1891_v23 = vpop.f32.mrb[1].mxu1 }
 0x391   : > { %v711_v24 = vpop.f32.mrb[2].mxu1 }
 0x392   : > { %v3192_v25 = vpack.c.bf16 %v709_v22, %v709_v22  ;;  %v1892_v26 = vpop.f32.mrb[3].mxu1 }
 0x394   : > { %777 = vrot.lane.b32.xlu0 %v3192_v25, %s2686_s24  ;;  %716 = vrot.lane.b32.xlu1 %v3192_v25, %s2687_s20  ;;  %s2696_s24 = smov 40   ;;  %s1843_s20 = sshll.u32 %s3391_s15, 7 }
 0x406   : > { %v717_v27 = vpop.permute.xlu1 %716  ;;  %v778_v29 = vpop.permute.xlu0 %777 }
 0x407   : > { %v723_v28 = vsel %vm718_vm2, %v717_v27, 0  ;;  %v784_v30 = vsel %vm782_vm3, %v778_v29, 0 }
 0x408   : > { %1894 = vmatpush3.bf16.xpose.msra.mxu1 %v723_v28 }
 0x409   : > { %1899 = vmatprep.subr.bf16.mxu1 %v2684_v8 }
 0x40f   : > { %1896 = vmatmul.mubr.msk.bf16.vlgmr.msra.gmra.mrb[4].mxu1 %vm718_vm2, %v3192_v25 }
 0x410   : > { %1900 = vmatpush3.bf16.msra.mxu1 %v784_v30  ;;  %1901 = vmatprep.mubr.msk.bf16.mxu1 %vm2685_vm1, %v2684_v8 }
 0x411   : > { %1905 = vmatprep.subr.bf16.mxu1 %v2684_v8 }
 0x4e2   : > { %v759_v31 = vpop.f32.mrb[4].mxu1 }
 0x4e3   : > { %v1897_v32 = vpop.f32.mrb[5].mxu1  ;;  %v765_v33 = vsel %vm718_vm2, %v759_v31, -inf }
 0x4e4   : > { %766 = vmax.xlane.f32.xlu1 %v765_v33  ;;  %v762_v34 = vpop.f32.mrb[6].mxu1 }
 0x4e5   : > { %v1898_v35 = vpop.f32.mrb[7].mxu1 }
 0x571   : > { %v767_v36 = vpop.xlane.xlu1 %766 }
 0x572   : > { %v768_v37 = vsub.f32 %v759_v31, %v767_v36 }
 0x574   : > { %v769_v38 = vmul.f32 1.442695, %v768_v37 }
 0x576   : > { %2189 = vpow2.f32 %v769_v38 }
 0x580   : > { %v2190_v39 = vpop.eup %2189 }
 0x581   : > { %v771_v40 = vsel %vm718_vm2, %v2190_v39, 0.0 }
 0x582   : > { %772 = vadd.xlane.f32.xlu0 %v771_v40 }
 0x598   : > { %830 = vrot.lane.b32.xlu0 %v3192_v25, %s2688_s14  ;;  %s613_s14 = scalar_lea.vmem [#allocation23], %s1793_s0  ;;  %s1578_s0 = scalar_lea.sflag [#allocation4], %s3141_s19 }
 0x59c   : > { %828 = vrot.lane.b32.xlu0 %v3192_v25, %s2689_s13  ;;  %s1591_s13 = sshll.u32 %s613_s14, 4  ;;  %s3302_s13 = int_to_ptr.vmem [resolvable:$true] %s1591_s13 }
 0x59d   : > { %s2577_s15 = scalar_lea.vmem %s3302_s13, 128 }
 0x59e   : > { %p2578_p2 = scmp.ne.s32.totalorder %s3302_s13, %s2577_s15 }
 0x5a0   : > { %p2579_p10 = pnand %p2578_p2, %p3405_p0 }
 0x5a2   : > { %p2580_p11 = pneg %p2579_p10 }
 0x60f   : > { %v773_v41 = vpop.xlane.xlu0 %772 }
 0x610   : > { %2191 = vrcp.f32 %v773_v41 }
 0x613   : > { %v831_v44 = vpop.permute.xlu0 %830 }
 0x614   : > { %v836_v46 = vsel %vm718_vm2, %v831_v44, 0 }
 0x617   : > { %v829_v47 = vpop.permute.xlu0 %828 }
 0x61a   : > { %v2192_v42 = vpop.eup %2191 }
 0x61b   : > { %v775_v43 = vmul.f32 %v2192_v42, %v2190_v39 }
 0x61d   : > { %v776_v45 = vpack.c.bf16 %v775_v43, %v775_v43 }
 0x61f   : > { %1902 = vmatmul.mubr.msk.bf16.vlgmr.msra.gmra.mrb[8].mxu1 %vm718_vm2, %v776_v45 }
 0x620   : > { %1906 = vmatpush3.bf16.xpose.msra.mxu1 %v836_v46  ;;  %1907 = vmatprep.mubr.msk.bf16.mxu1 %vm2685_vm1, %v2684_v8 }
 0x621   : > { %1917 = vmatprep.subr.bf16.mxu1 %v2684_v8 }
 0x627   : > { %1908 = vmatmul.mubr.msk.bf16.vlgmr.msra.gmra.mrb[12].mxu1 %vm718_vm2, %v829_v47 }
 0x628   : > { %1919 = vmatprep.mubr.msk.bf16.mxu1 %vm2685_vm1, %v2684_v8  ;;  %1918 = vmatpush3.bf16.msra.mxu1 %v944_v2 }
 0x629   : > { %1929 = vmatprep.subr.bf16.mxu1 %v2684_v8 }
 0x6f2   : > { %v820_v48 = vpop.f32.mrb[8].mxu1 }
 0x6f3   : > { %v1903_v49 = vpop.f32.mrb[9].mxu1  ;;  %v826_v11 = vpack.c.bf16 %v820_v48, %v820_v48  ;;  %v1143_v48 = vld [vmem:[#allocation11 + $0x8] sm:$0xf] }
 0x6f4   : > { %v823_v50 = vpop.f32.mrb[10].mxu1  ;;  %v1148_v49 = vsel %vm782_vm3, %v1143_v48, 0  ;;  %v2181_v48 = vld [vmem:[#allocation20 + $0x10] sm:$0xff]  }
 0x6f5   : > { %v1904_v51 = vpop.f32.mrb[11].mxu1 }
 0x6fa   : > { %v872_v52 = vpop.f32.mrb[12].mxu1 }
 0x6fb   : > { %v1909_v53 = vpop.f32.mrb[13].mxu1  ;;  %v878_v54 = vsel %vm718_vm2, %v872_v52, -inf }
 0x6fc   : > { %879 = vmax.xlane.f32.xlu1 %v878_v54  ;;  %v875_v55 = vpop.f32.mrb[14].mxu1 }
 0x6fd   : > { %v1910_v56 = vpop.f32.mrb[15].mxu1 }
 0x70d   : > { %890 = vrot.lane.b32.xlu1 %v3192_v25, %s2690_s16 }
 0x711   : > { %1034 = vrot.lane.b32.xlu1 %v3192_v25, %s2691_s22 }
 0x715   : > { %1032 = vrot.lane.b32.xlu1 %v3192_v25, %s2692_s30  ;;  %s3404_s30 = sld [smem:[#allocation38_spill]] }
 0x789   : > { %v880_v57 = vpop.xlane.xlu1 %879 }
 0x78a   : > { %v881_v58 = vsub.f32 %v872_v52, %v880_v57 }
 0x78c   : > { %v882_v59 = vmul.f32 1.442695, %v881_v58 }
 0x78d   : > { %v891_v60 = vpop.permute.xlu1 %890 }
 0x78e   : > { %2193 = vpow2.f32 %v882_v59  ;;  %v896_v61 = vsel %vm782_vm3, %v891_v60, 0 }
 0x78f   : > { %1912 = vmatpush3.bf16.msra.mxu0 %v896_v61 }
 0x790   : > { %1923 = vmatprep.subr.bf16.mxu0 %v2684_v8 }
 0x791   : > { %v1035_v13 = vpop.permute.xlu1 %1034 }
 0x792   : > { %v1040_v18 = vsel %vm718_vm2, %v1035_v13, 0 }
 0x795   : > { %v1033_v22 = vpop.permute.xlu1 %1032 }
 0x798   : > { %v2194_v62 = vpop.eup %2193 }
 0x799   : > { %v884_v63 = vsel %vm718_vm2, %v2194_v62, 0.0 }
 0x79a   : > { %885 = vadd.xlane.f32.xlu0 %v884_v63 }
 0x7b0   : > { %1094 = vrot.lane.b32.xlu0 %v3192_v25, %s2693_s2  ;;  %s3300_s2 = scalar_lea.hbm %s3404_s30, %s1843_s20 }
 0x827   : > { %v886_v3 = vpop.xlane.xlu0 %885 }
 0x828   : > { %2195 = vrcp.f32 %v886_v3 }
 0x82b   : > { %v1095_v10 = vpop.permute.xlu0 %1094 }
 0x82c   : > { %v1100_v12 = vsel %vm782_vm3, %v1095_v10, 0 }
 0x832   : > { %v2196_v4 = vpop.eup %2195 }
 0x833   : > { %v888_v6 = vmul.f32 %v2196_v4, %v2194_v62  ;;  %v1302_v4 = vld [vmem:[#allocation11 + $0xc] sm:$0xf] }
 0x834   : > { %v1307_v5 = vsel %vm782_vm3, %v1302_v4, 0 }
 0x835   : > { %v889_v7 = vpack.c.bf16 %v888_v6, %v888_v6 }
 0x837   : > { %1914 = vmatmul.mubr.msk.bf16.vlgmr.msra.gmra.mrb[0].mxu0 %vm718_vm2, %v889_v7 }
 0x838   : > { %1924 = vmatpush3.bf16.msra.mxu0 %v990_v9  ;;  %1925 = vmatprep.mubr.msk.bf16.mxu0 %vm2685_vm1, %v2684_v8 }
 0x839   : > { %1935 = vmatprep.subr.bf16.mxu0 %v2684_v8 }
 0x83f   : > { %1926 = vmatmul.mubr.msk.bf16.vlgmr.msra.gmra.mrb[4].mxu0 %vm718_vm2, %v826_v11 }
 0x840   : > { %1936 = vmatpush3.bf16.msra.mxu0 %v1100_v12  ;;  %1937 = vmatprep.mubr.msk.bf16.mxu0 %vm2685_vm1, %v2684_v8 }
 0x841   : > { %1947 = vmatprep.subr.bf16.mxu0 %v2684_v8 }
 0x90a   : > { %v932_v14 = vpop.f32.mrb[0].mxu0 }
 0x90b   : > { %v938_v15 = vpack.c.bf16 %v932_v14, %v932_v14  ;;  %v1915_v16 = vpop.f32.mrb[1].mxu0 }
 0x90c   : > { %v935_v17 = vpop.f32.mrb[2].mxu0 }
 0x90d   : > { %v1916_v19 = vpop.f32.mrb[3].mxu0  ;;  %1920 = vmatmul.mubr.msk.bf16.vlgmr.msra.gmra.mrb[16].mxu1 %vm718_vm2, %v938_v15 }
 0x90e   : > { %1930 = vmatpush3.bf16.xpose.msra.mxu1 %v1040_v18  ;;  %1931 = vmatprep.mubr.msk.bf16.mxu1 %vm2685_vm1, %v2684_v8 }
 0x90f   : > { %1941 = vmatprep.subr.bf16.mxu1 %v2684_v8 }
 0x912   : > { %v1026_v20 = vpop.f32.mrb[4].mxu0 }
 0x913   : > { %v1927_v21 = vpop.f32.mrb[5].mxu0 }
 0x914   : > { %v1029_v23 = vpop.f32.mrb[6].mxu0 }
 0x915   : > { %v1928_v24 = vpop.f32.mrb[7].mxu0  ;;  %1932 = vmatmul.mubr.msk.bf16.vlgmr.msra.gmra.mrb[20].mxu1 %vm718_vm2, %v1033_v22  ;;  %v1825_v23 = vld [vmem:[#allocation13] ss:$0 sm:$0xff] }
 0x916   : > { %1943 = vmatprep.mubr.msk.bf16.mxu1 %vm2685_vm1, %v2684_v8  ;;  %1942 = vmatpush3.bf16.msra.mxu1 %v1148_v49  ;;  %v2182_v49 = vld [vmem:[#allocation20 + $0x18] sm:$0xff]  }
 0x917   : > { %1953 = vmatprep.subr.bf16.mxu1 %v2684_v8 }
 0x9e0   : > { %v980_v26 = vpop.f32.mrb[16].mxu1 }
 0x9e1   : > { %v3244_v27 = vadd.f32 %v1026_v20, %v980_v26  ;;  %v1921_v28 = vpop.f32.mrb[17].mxu1 }
 0x9e2   : > { %v983_v29 = vpop.f32.mrb[18].mxu1 }
 0x9e3   : > { %v1922_v30 = vpop.f32.mrb[19].mxu1 }
 0x9e8   : > { %v1076_v31 = vpop.f32.mrb[20].mxu1 }
 0x9e9   : > { %v1933_v32 = vpop.f32.mrb[21].mxu1  ;;  %v1082_v33 = vsel %vm718_vm2, %v1076_v31, -inf }
 0x9ea   : > { %1083 = vmax.xlane.f32.xlu1 %v1082_v33  ;;  %v1079_v34 = vpop.f32.mrb[22].mxu1 }
 0x9eb   : > { %v1934_v35 = vpop.f32.mrb[23].mxu1 }
 0x9ec   : > { %v2177_v35 = vld [vmem:[#allocation17] sm:$0xff]  }
 0xa77   : > { %v1084_v36 = vpop.xlane.xlu1 %1083 }
 0xa78   : > { %v1085_v37 = vsub.f32 %v1076_v31, %v1084_v36  ;;  %v2178_v36 = vld [vmem:[#allocation17 + $0x8] sm:$0xff]  }
 0xa7a   : > { %v1086_v38 = vmul.f32 1.442695, %v1085_v37 }
 0xa7c   : > { %2197 = vpow2.f32 %v1086_v38 }
 0xa86   : > { %v2198_v39 = vpop.eup %2197 }
 0xa87   : > { %v1088_v40 = vsel %vm718_vm2, %v2198_v39, 0.0 }
 0xa88   : > { %1089 = vadd.xlane.f32.xlu0 %v1088_v40  ;;  %v1826_v40 = vld [vmem:[#allocation14] ss:$0 sm:$0xff] }
 0xa9e   : > { %1193 = vrot.lane.b32.xlu0 %v3192_v25, %s2694_s17  ;;  %s2697_s17 = smov [#allocation23]  }
 0xaa2   : > { %1191 = vrot.lane.b32.xlu0 %v3192_v25, %s2695_s23  ;;  %s2581_s23 = sshll.u32 %s2697_s17, 4  ;;  %s2582_s23 = int_to_ptr.vmem [resolvable:$false] %s2581_s23 }
 0xaa3   : > { %p2584_p12 = scmp.lt.s32.totalorder %s3302_s13, %s2582_s23 }
 0xb15   : > { %v1090_v41 = vpop.xlane.xlu0 %1089 }
 0xb16   : > { %2199 = vrcp.f32 %v1090_v41 }
 0xb19   : > { %v1194_v44 = vpop.permute.xlu0 %1193 }
 0xb1a   : > { %v1199_v46 = vsel %vm718_vm2, %v1194_v44, 0 }
 0xb1d   : > { %v1192_v47 = vpop.permute.xlu0 %1191 }
 0xb20   : > { %v2200_v42 = vpop.eup %2199 }
 0xb21   : > { %v1092_v43 = vmul.f32 %v2200_v42, %v2198_v39  ;;  %v1827_v42 = vld [vmem:[#allocation16] ss:$0 sm:$0xff] }
 0xb23   : > { %v1093_v45 = vpack.c.bf16 %v1092_v43, %v1092_v43 }
 0xb25   : > { %1938 = vmatmul.mubr.msk.bf16.vlgmr.msra.gmra.mrb[8].mxu0 %vm718_vm2, %v1093_v45 }
 0xb26   : > { %1948 = vmatpush3.bf16.xpose.msra.mxu0 %v1199_v46  ;;  %1949 = vmatprep.mubr.msk.bf16.mxu0 %vm2685_vm1, %v2684_v8  ;;  %v2179_v46 = vld [vmem:[#allocation20] sm:$0xff]  }
 0xb27   : > { %1959 = vmatprep.subr.bf16.mxu0 %v2684_v8 }
 0xb2d   : > { %1950 = vmatmul.mubr.msk.bf16.vlgmr.msra.gmra.mrb[12].mxu0 %vm718_vm2, %v1192_v47  ;;  %v2180_v47 = vld [vmem:[#allocation20 + $0x8] sm:$0xff]  }
 0xb2e   : > { %1961 = vmatprep.mubr.msk.bf16.mxu0 %vm2685_vm1, %v2684_v8  ;;  %1960 = vmatpush3.bf16.msra.mxu0 %v1307_v5 }
 0xb2f   : > { %1973 = vmatprep.subr.bf16.mxu0 %v2684_v8 }
 0xbf8   : > { %v1136_v50 = vpop.f32.mrb[8].mxu0 }
 0xbf9   : > { %v1142_v51 = vpack.c.bf16 %v1136_v50, %v1136_v50  ;;  %v1939_v52 = vpop.f32.mrb[9].mxu0  ;;  %v2183_v50 = vld [vmem:[#allocation20 + $0x20] sm:$0xff]  }
 0xbfa   : > { %v1139_v53 = vpop.f32.mrb[10].mxu0  ;;  %v2185_v52 = vld [vmem:[#allocation20 + $0x30] sm:$0xff]  }
 0xbfb   : > { %v1940_v54 = vpop.f32.mrb[11].mxu0  ;;  %1944 = vmatmul.mubr.msk.bf16.vlgmr.msra.gmra.mrb[24].mxu1 %vm718_vm2, %v1142_v51  ;;  %v2184_v51 = vld [vmem:[#allocation20 + $0x28] sm:$0xff]   ;;  %v2186_v53 = vld [vmem:[#allocation20 + $0x38] sm:$0xff]  }
 0xbfc   : > { %1955 = vmatprep.mubr.msk.bf16.mxu1 %vm2685_vm1, %v2684_v8  ;;  %v1828_v54 = vld [vmem:[#allocation19] ss:$0 sm:$0xff] }
 0xc00   : > { %v1235_v55 = vpop.f32.mrb[12].mxu0 }
 0xc01   : > { %v1951_v56 = vpop.f32.mrb[13].mxu0  ;;  %v1241_v57 = vsel %vm718_vm2, %v1235_v55, -inf }
 0xc02   : > { %1242 = vmax.xlane.f32.xlu1 %v1241_v57  ;;  %v1238_v58 = vpop.f32.mrb[14].mxu0 }
 0xc03   : > { %v1952_v59 = vpop.f32.mrb[15].mxu0 }
 0xc13   : > { %1253 = vrot.lane.b32.xlu1 %v3192_v25, %s2696_s24  ;;  %s2583_s24 = scalar_lea.vmem %s2582_s23, 256 }
 0xc14   : > { %p2585_p8 = scmp.lt.s32.totalorder %s2583_s24, %s2577_s15 }
 0xc16   : > { %p2586_p5 = por %p2585_p8, %p2584_p12 }
 0xc18   : > { %p2587_p7 = pnand %p2586_p5, %p2580_p11 }
 0xc8f   : > { %v1243_v60 = vpop.xlane.xlu1 %1242 }
 0xc90   : > { %v1244_v61 = vsub.f32 %v1235_v55, %v1243_v60 }
 0xc92   : > { %v1245_v62 = vmul.f32 1.442695, %v1244_v61 }
 0xc93   : > { %v1254_v63 = vpop.permute.xlu1 %1253 }
 0xc94   : > { %2201 = vpow2.f32 %v1245_v62  ;;  %v1259_v1 = vsel %vm782_vm3, %v1254_v63, 0 }
 0xc95   : > { %1954 = vmatpush3.bf16.msra.mxu1 %v1259_v1 }
 0xc96   : > { %1965 = vmatprep.subr.bf16.mxu1 %v2684_v8 }
 0xc9e   : > { %v2202_v2 = vpop.eup %2201 }
 0xc9f   : > { %v1247_v3 = vsel %vm718_vm2, %v2202_v2, 0.0 }
 0xca0   : > { %1248 = vadd.xlane.f32.xlu0 %v1247_v3  ;;  %v1833_v3 = vld [vmem:[#allocation22] ss:$0 sm:$0xff] }
 0xcce   : > { %v1184_v25 = vpop.f32.mrb[24].mxu1 }
 0xccf   : > { %v1190_v6 = vadd.f32 %v1184_v25, %v3244_v27  ;;  %v1945_v7 = vpop.f32.mrb[25].mxu1 }
 0xcd0   : > { %v1187_v9 = vpop.f32.mrb[26].mxu1 }
 0xcd1   : > { %v1946_v10 = vpop.f32.mrb[27].mxu1 }
 0xd2d   : > { %v1249_v11 = vpop.xlane.xlu0 %1248 }
 0xd2e   : > { %2203 = vrcp.f32 %v1249_v11 }
 0xd38   : > { %v2204_v12 = vpop.eup %2203 }
 0xd39   : > { %v1251_v13 = vmul.f32 %v2204_v12, %v2202_v2 }
 0xd3b   : > { %v1252_v14 = vpack.c.bf16 %v1251_v13, %v1251_v13 }
 0xd3d   : > { %1956 = vmatmul.mubr.msk.bf16.vlgmr.msra.gmra.mrb[28].mxu1 %vm718_vm2, %v1252_v14 }
 0xd3e   : > { %1969 = vmatprep.mubr.msk.bf16.mxu1 %vm2685_vm1, %v2684_v8  ;;  %1966 = vmatpush3.bf16.msra.mxu1 %v2177_v35 }
 0xd3f   : > { %1967 = vmatprep.subr.bf16.mxu1 %v2684_v8 }
 0xd42   : > { %1968 = vmatpush3.bf16.msra.mxu1 %v2178_v36 }
 0xe10   : > { %v1295_v15 = vpop.f32.mrb[28].mxu1 }
 0xe11   : > { %v1301_v16 = vpack.c.bf16 %v1295_v15, %v1295_v15  ;;  %v1957_v17 = vpop.f32.mrb[29].mxu1 }
 0xe12   : > { %v1298_v18 = vpop.f32.mrb[30].mxu1 }
 0xe13   : > { %v1958_v19 = vpop.f32.mrb[31].mxu1  ;;  %1962 = vmatmul.mubr.msk.bf16.vlgmr.msra.gmra.mrb[16].mxu0 %vm718_vm2, %v1301_v16 }
 0xe14   : > { %1989 = vmatprep.mubr.msk.bf16.mxu0 %vm2685_vm1, %v2684_v8  ;;  %1974 = vmatpush3.bf16.msra.mxu0 %v2179_v46 }
 0xe15   : > { %1975 = vmatprep.subr.bf16.mxu0 %v2684_v8 }
 0xe18   : > { %1976 = vmatpush3.bf16.msra.mxu0 %v2180_v47 }
 0xe19   : > { %1977 = vmatprep.subr.bf16.mxu0 %v2684_v8 }
 0xe1c   : > { %1978 = vmatpush3.bf16.msra.mxu0 %v2181_v48 }
 0xe1d   : > { %1979 = vmatprep.subr.bf16.mxu0 %v2684_v8 }
 0xe20   : > { %1980 = vmatpush3.bf16.msra.mxu0 %v2182_v49 }
 0xe21   : > { %1981 = vmatprep.subr.bf16.mxu0 %v2684_v8 }
 0xe24   : > { %1982 = vmatpush3.bf16.msra.mxu0 %v2183_v50 }
 0xe25   : > { %1983 = vmatprep.subr.bf16.mxu0 %v2684_v8 }
 0xe28   : > { %1984 = vmatpush3.bf16.msra.mxu0 %v2184_v51 }
 0xe29   : > { %1985 = vmatprep.subr.bf16.mxu0 %v2684_v8 }
 0xe2c   : > { %1986 = vmatpush3.bf16.msra.mxu0 %v2185_v52 }
 0xe2d   : > { %1987 = vmatprep.subr.bf16.mxu0 %v2684_v8 }
 0xe30   : > { %1988 = vmatpush3.bf16.msra.mxu0 %v2186_v53 }
 0xee6   : > { %v1343_v20 = vpop.f32.mrb[16].mxu0 }
 0xee7   : > { %v1349_v21 = vadd.f32 %v1343_v20, %v1190_v6  ;;  %v1963_v22 = vpop.f32.mrb[17].mxu0 }
 0xee8   : > { %v1346_v24 = vpop.f32.mrb[18].mxu0 }
 0xee9   : > { %v1350_v26 = vadd.f32 %v1349_v21, %v3175_v0  ;;  %v1964_v27 = vpop.f32.mrb[19].mxu0 }
 0xeeb   : > { %v3278_v28 = vadd.f32 %v1825_v23, %v1350_v26 }
 0xeed   : > { %v1361_v29 = vsel %vm618_vm0, %v3278_v28, 0.0 }
 0xeee   : > { %1362 = vadd.xlane.f32.xlu1 %v1361_v29 }
 0xf7b   : > { %v1363_v30 = vpop.xlane.xlu1 %1362 }
 0xf7c   : > { %v1364_v31 = vmul.f32 0.03125, %v1363_v30 }
 0xf7e   : > { %v1365_v32 = vsub.f32 %v3278_v28, %v1364_v31 }
 0xf80   : > { %v1366_v33 = vmul.f32 %v1365_v32, %v1365_v32 }
 0xf82   : > { %v1367_v34 = vsel %vm618_vm0, %v1366_v33, 0.0 }
 0xf83   : > { %1368 = vadd.xlane.f32.xlu0 %v1367_v34 }
0x1010   : > { %v1369_v0 = vpop.xlane.xlu0 %1368 }
0x1011   : > { %v1370_v37 = vmul.f32 0.03125, %v1369_v0 }
0x1013   : > { %v1371_v38 = vadd.f32 1e-05, %v1370_v37 }
0x1015   : > { %2205 = vrsqrt.f32 %v1371_v38 }
0x101f   : > { %v2206_v39 = vpop.eup %2205 }
0x1020   : > { %v1373_v41 = vmul.f32 %v2206_v39, %v1365_v32 }
0x1022   : > { %v1380_v43 = vmul.f32 %v1826_v40, %v1373_v41 }
0x1024   : > { %v1387_v44 = vadd.f32 %v1827_v42, %v1380_v43 }
0x1026   : > { %v1388_v45 = vpack.c.bf16 %v1387_v44, %v1387_v44 }
0x1028   : > { %1970 = vmatmul.mubr.msk.bf16.vlgmr.msra.gmra.mrb[32].mxu1 %vm618_vm0, %v1388_v45 }
0x10fb   : > { %v1449_v55 = vpop.f32.mrb[32].mxu1 }
0x10fc   : > { %v1450_v56 = vadd.f32 %v1828_v54, %v1449_v55  ;;  %v1971_v57 = vpop.f32.mrb[33].mxu1 }
0x10fd   : > { %v1452_v58 = vpop.f32.mrb[34].mxu1 }
0x10fe   : > { %v1832_v59 = vmul.f32 -1.702, %v1450_v56  ;;  %v1972_v60 = vpop.f32.mrb[35].mxu1 }
0x1100   : > { %v1457_v61 = vmul.f32 1.442695, %v1832_v59 }
0x1102   : > { %2207 = vpow2.f32 %v1457_v61 }
0x110c   : > { %v2208_v62 = vpop.eup %2207 }
0x110d   : > { %v1459_v63 = vadd.f32 1.0, %v2208_v62 }
0x110f   : > { %2209 = vrcp.f32 %v1459_v63 }
0x1119   : > { %v2210_v1 = vpop.eup %2209 }
0x111a   : > { %v1462_v2 = vmul.f32 %v2210_v1, %v1450_v56 }
0x111c   : > { %v1463_v8 = vpack.c.bf16 %v1462_v2, %v1462_v2 }
0x111e   : > { %1990 = vmatmul.mubr.bf16.vlgmr.msra.gmra.mrb[20].mxu0 %v1463_v8 }
0x11f1   : > { %v1569_v4 = vpop.f32.mrb[20].mxu0 }
0x11f2   : > { %v1570_v5 = vadd.f32 %v1833_v3, %v1569_v4  ;;  %v1991_v25 = vpop.f32.mrb[21].mxu0 }
0x11f3   : > { %v1572_v6 = vpop.f32.mrb[22].mxu0 }
0x11f4   : > { %v1575_v7 = vadd.f32 %v1570_v5, %v3278_v28  ;;  %v1992_v9 = vpop.f32.mrb[23].mxu0 }
0x11f6   : > { %1576 = vst.msk [vmem:[%s613_s14] sm:$0xff] %vm618_vm0, %v1575_v7 }
0x11f7   : > { %2590 = shalt.err (!%p2587_p7)
}
0x11f8   : > { %s2591_s19 = scalar_lea.hbm %s3300_s2, 128  ;;  %s2595_s16 = scalar_lea.hbm %s3404_s30, 256 }
0x11f9   : > { %p2592_p6 = scmp.ne.s32.totalorder %s3300_s2, %s2591_s19  ;;  %p2596_p13 = scmp.lt.u32.totalorder %s3300_s2, %s3404_s30 }
0x11fa   : > { %p2597_p1 = scmp.lt.u32.totalorder %s2595_s16, %s2591_s19  ;;  %p2599_p2 = scmp.lt.u32.totalorder %s2591_s19, %s3300_s2 }
0x11fb   : > { %p2593_p9 = pnand %p2592_p6, %p3405_p0 }
0x11fc   : > { %p2598_p3 = por %p2597_p1, %p2596_p13 }
0x11fd   : > { %p2594_p4 = pneg %p2593_p9 }
0x11fe   : > { %p2600_p10 = por %p2599_p2, %p2598_p3 }
0x1200   : > { %p2601_p11 = pnand %p2600_p10, %p2594_p4 }
0x1202   : > { %2604 = shalt.err (!%p2601_p11)
}
0x1203   : > { %2043 = dma.vmem_to_hbm [thread:$0]  (%p3405_p0), %s3302_s13, 128, %s3300_s2, %s1578_s0  }
0x1204 PF: > { %s1603_s15 = sand.u32 1, %s2655_s25   ;;  %p3406_p12 = scmp.ne.s32.totalorder %s3386_s21, 0 }
0x1205   : > { %p3407_p8 = scmp.ge.s32.totalorder %s2667_s28, 2  ;;  %s1604_s23 = scalar_lea.sflag [#allocation4], %s1603_s15 }
0x1207   : > { %p2087_p5 = pnand %p3407_p8, %p3406_p12 }
0x1209   : > { %2650 = dma.done.wait (!%p2087_p5), %s1604_s23, 128  }
0x120a   : > { %2652 = vsyncadd (!%p2087_p5), %s1604_s23, 4294967168  ;;  %p32_p7 = scmp.ge.s32.totalorder %s3065_s18, 4   ;;  %s3408_s25 = smov %s2659_s26 }
0x120b   : > { %s3409_s26 = smov %s2663_s27  ;;  %s3410_s27 = smov %s3076_s29 }
0x120c   : > { %s3411_s28 = smov %s3065_s18  ;;  %34 = sbr.rel (!%p32_p7) target bundleno = 17 (0x11), region = 165 }
0x1213   :  { %1609 = vsyncpa [#allocation3], 1 }
0x1214   :  { %1611 = vsyncpa [#allocation3 + $0x1], 1 }
0x1215   :  { %1612 = vsyncpa [#allocation6], 1 }
0x1216   :  { %1613 = vsyncpa [#allocation9], 1 }
0x1217   :  { %1614 = vsyncpa [#allocation12], 1 }
0x1218   :  { %1615 = vsyncpa [#allocation15], 1 }
0x1219   :  { %1616 = vsyncpa [#allocation18], 1 }
0x121a   :  { %1617 = vsyncpa [#allocation21], 1 }
0x121b   :  { %1618 = vsyncpa [#allocation4], 1 }
0x121c   :  { %1620 = vsyncpa [#allocation4 + $0x1], 1 }

// kernel: tpu_custom_call.1
= control target key start
LH: loop header
LB: loop body
LE: loop exit
PB: predicated region body
PF: predicated region fallthrough
CT: control target
= control target key end

     0   :  { %s3345_s0 = inlined_call_operand.hbm [shape: f32[2,8,32], index: 0, kind: input, shape index: {}]   ;;  %s3346_s1 = inlined_call_operand.hbm [shape: f32[1,32], index: 1, kind: input, shape index: {}]   ;;  %s3347_s2 = inlined_call_operand.hbm [shape: f32[1,32], index: 2, kind: input, shape index: {}]   ;;  %s3348_s3 = inlined_call_operand.hbm [shape: bf16[32,96], index: 3, kind: input, shape index: {}]   ;;  %s3349_s4 = inlined_call_operand.hbm [shape: f32[1,96], index: 4, kind: input, shape index: {}]   ;;  %s3350_s5 = inlined_call_operand.hbm [shape: bf16[32,32], index: 5, kind: input, shape index: {}]   ;;  %s3351_s6 = inlined_call_operand.hbm [shape: f32[1,32], index: 6, kind: input, shape index: {}]   ;;  %s3352_s7 = inlined_call_operand.hbm [shape: f32[1,32], index: 7, kind: input, shape index: {}]   ;;  %s3353_s8 = inlined_call_operand.hbm [shape: f32[1,32], index: 8, kind: input, shape index: {}]   ;;  %s3354_s9 = inlined_call_operand.hbm [shape: bf16[32,128], index: 9, kind: input, shape index: {}]   ;;  %s3355_s10 = inlined_call_operand.hbm [shape: f32[1,128], index: 10, kind: input, shape index: {}]   ;;  %s3356_s11 = inlined_call_operand.hbm [shape: bf16[128,32], index: 11, kind: input, shape index: {}]   ;;  %s3357_s12 = inlined_call_operand.hbm [shape: f32[1,32], index: 12, kind: input, shape index: {}]   ;;  %s3358_s13 = inlined_call_operand.hbm [shape: f32[2,8,32], index: 13, kind: output, shape index: {}]  }
   0x1   :  { %3368 = sst [smem:[#allocation34_spill]] %s3345_s0 }
   0x2   :  { %3369 = sst [smem:[#allocation35_spill]] %s3346_s1 }
   0x3   :  { %3370 = sst [smem:[#allocation36_spill]] %s3347_s2 }
   0x4   :  { %3371 = sst [smem:[#allocation37_spill]] %s3348_s3 }
   0x5   :  { %3372 = sst [smem:[#allocation38_spill]] %s3358_s13 }
   0x6   :  { %18 = vsyncpa [#allocation3], 0 }
   0x7   :  { %20 = vsyncpa [#allocation3 + $0x1], 0 }
   0x8   :  { %21 = vsyncpa [#allocation6], 0 }
   0x9   :  { %22 = vsyncpa [#allocation9], 0 }
   0xa   :  { %23 = vsyncpa [#allocation12], 0 }
   0xb   :  { %24 = vsyncpa [#allocation15], 0 }
   0xc   :  { %25 = vsyncpa [#allocation18], 0 }
   0xd   :  { %26 = vsyncpa [#allocation21], 0 }
   0xe   :  { %27 = vsyncpa [#allocation4], 0 }
   0xf   :  { %29 = vsyncpa [#allocation4 + $0x1], 0  ;;  %s2768_s25 = smov 0   ;;  %s2770_s26 = smov 0  }
  0x10   :  { %s2772_s27 = smov 0   ;;  %s2774_s28 = smov 0  }
  0x11 LB: > { %s2669_s29 = smov [#allocation5]   ;;  %s2789_s14 = sadd.s32 4294967295, %s2667_s28   ;;  %s2667_s28 = sphi %s2774_s28, %s3411_s28   ;;  %s2663_s27 = sphi %s2772_s27, %s3410_s27   ;;  %s2659_s26 = sphi %s2770_s26, %s3409_s26   ;;  %s2655_s25 = sphi %s2768_s25, %s3408_s25  }
  0x12   : > { %s357_s30 = sshll.u32 %s2669_s29, 4  ;;  %3373 = sst [smem:[#allocation32_spill]] %s2789_s14  ;;  %s2794_s30 = int_to_ptr.vmem [resolvable:$true] %s357_s30 }
  0x13   : > { %p1776_p0 = scmp.ge.s32.totalorder %s2667_s28, 1  ;;  %p3365_p1 = scmp.eq.s32.totalorder %s2789_s14, 0 }
  0x14   : > { %p344_p2 = scmp.lt.s32.totalorder %s2667_s28, 3  ;;  %s2670_s16 = smov [#allocation8]  }
  0x15   : > { %s378_s17 = sshll.u32 %s2670_s16, 4  ;;  %s2671_s19 = smov [#allocation11]   ;;  %s2803_s17 = int_to_ptr.vmem [resolvable:$true] %s378_s17 }
  0x16   : > { %p2796_p3 = pnand %p1776_p0, %p344_p2  ;;  %s402_s20 = sshll.u32 %s2671_s19, 4  ;;  %s2811_s20 = int_to_ptr.vmem [resolvable:$true] %s402_s20 }
  0x17   : > { %s3377_s1 = sld [smem:[#allocation35_spill]] }
  0x18   : > { %s3374_s15 = scalar_select %p2796_p3, 1, 0 }
  0x19   : > { %p2045_p5 = pneg %p2796_p3 }
  0x1a   : > { %3375 = sst [smem:[#allocation33_spill]] %s3374_s15 }
  0x1b   : > { %p2807_p6 = pnand %p2045_p5, %p3365_p1 }
  0x1d   : > { %s2211_s23 = scalar_lea.hbm %s3377_s1, 16  ;;  %p2821_p8 = pneg %p2807_p6 }
  0x1e   : > { %p2212_p7 = scmp.ne.s32.totalorder %s3377_s1, %s2211_s23  ;;  %p2218_p11 = scmp.lt.u32.totalorder %s2211_s23, %s3377_s1 }
  0x20   : > { %p2214_p9 = pnand %p2821_p8, %p2212_p7 }
  0x22   : > { %p2215_p10 = pneg %p2214_p9 }
  0x24   : > { %p2220_p12 = pnand %p2218_p11, %p2215_p10 }
  0x26   : > { %2223 = shalt.err (!%p2220_p12)
}
  0x27   : > { %s2224_s21 = scalar_lea.vmem %s2794_s30, 16  ;;  %s2231_s22 = scalar_lea.vmem %s2794_s30, 32 }
  0x28   : > { %p2225_p13 = scmp.ne.s32.totalorder %s2794_s30, %s2224_s21  ;;  %p2232_p5 = scmp.lt.s32.totalorder %s2794_s30, %s2794_s30 }
  0x29   : > { %p2233_p7 = scmp.lt.s32.totalorder %s2231_s22, %s2224_s21 }
  0x2a   : > { %p2227_p0 = pnand %p2225_p13, %p2821_p8 }
  0x2b   : > { %p2234_p9 = por %p2233_p7, %p2232_p5 }
  0x2c   : > { %p2228_p2 = pneg %p2227_p0 }
  0x2e   : > { %p2235_p4 = pnand %p2234_p9, %p2228_p2 }
  0x30   : > { %2238 = shalt.err (!%p2235_p4)
}
  0x31   : > { %2048 = dma.hbm_to_vmem [thread:$0]  (!%p2807_p6), %s3377_s1, 16, %s2794_s30, [#allocation6]  }
  0x32   : > { %s3379_s3 = sld [smem:[#allocation37_spill]] }
  0x38   : > { %s2239_s19 = scalar_lea.hbm %s3379_s3, 256 }
  0x39   : > { %p2240_p10 = scmp.ne.s32.totalorder %s3379_s3, %s2239_s19  ;;  %p2246_p4 = scmp.lt.u32.totalorder %s2239_s19, %s3379_s3 }
  0x3b   : > { %p2242_p11 = pnand %p2240_p10, %p2821_p8 }
  0x3d   : > { %p2243_p12 = pneg %p2242_p11 }
  0x3f   : > { %p2248_p13 = pnand %p2246_p4, %p2243_p12 }
  0x41   : > { %2251 = shalt.err (!%p2248_p13)
}
  0x42   : > { %s2252_s30 = scalar_lea.vmem %s2803_s17, 256  ;;  %p2260_p7 = scmp.lt.s32.totalorder %s2803_s17, %s2803_s17 }
  0x43   : > { %p2253_p0 = scmp.ne.s32.totalorder %s2803_s17, %s2252_s30  ;;  %p2261_p9 = scmp.lt.s32.totalorder %s2252_s30, %s2252_s30 }
  0x45   : > { %p2255_p2 = pnand %p2253_p0, %p2821_p8  ;;  %p2262_p10 = por %p2261_p9, %p2260_p7 }
  0x47   : > { %p2256_p5 = pneg %p2255_p2 }
  0x49   : > { %p2263_p11 = pnand %p2262_p10, %p2256_p5 }
  0x4b   : > { %2266 = shalt.err (!%p2263_p11)
}
  0x4c   : > { %s2672_s0 = smov 64   ;;  %s2673_s15 = smov 4  }
  0x4d   : > { %2054 = dma.hbm_to_vmem [thread:$0]  (!%p2807_p6), %s3379_s3, 256, %s2803_s17, [#allocation9], %s2672_s0, %s2672_s0, %s2673_s15  }
  0x4e   : > { %s2267_s19 = scalar_lea.hbm %s3350_s5, 256 }
  0x4f   : > { %p2268_p12 = scmp.ne.s32.totalorder %s3350_s5, %s2267_s19  ;;  %p2274_p0 = scmp.lt.u32.totalorder %s2267_s19, %s3350_s5 }
  0x51   : > { %p2270_p4 = pnand %p2268_p12, %p2821_p8 }
  0x53   : > { %p2271_p13 = pneg %p2270_p4 }
  0x55   : > { %p2276_p2 = pnand %p2274_p0, %p2271_p13 }
  0x57   : > { %2279 = shalt.err (!%p2276_p2)
}
  0x58   : > { %s2280_s17 = scalar_lea.vmem %s2811_s20, 256  ;;  %p2288_p10 = scmp.lt.s32.totalorder %s2811_s20, %s2811_s20 }
  0x59   : > { %p2281_p5 = scmp.ne.s32.totalorder %s2811_s20, %s2280_s17  ;;  %p2289_p11 = scmp.lt.s32.totalorder %s2280_s17, %s2280_s17 }
  0x5b   : > { %p2283_p7 = pnand %p2281_p5, %p2821_p8  ;;  %p2290_p12 = por %p2289_p11, %p2288_p10 }
  0x5d   : > { %p2284_p9 = pneg %p2283_p7 }
  0x5f   : > { %p2291_p4 = pnand %p2290_p12, %p2284_p9 }
  0x61   : > { %2294 = shalt.err (!%p2291_p4)
}
  0x62   : > { %2060 = dma.hbm_to_vmem [thread:$0]  (!%p2807_p6), %s3350_s5, 256, %s2811_s20, [#allocation12], %s2672_s0, %s2672_s0, %s2673_s15  }
  0x63   : > { %s2674_s23 = smov [#allocation14]   ;;  %s2675_s29 = smov [#allocation17]  }
  0x64   : > { %s427_s24 = sshll.u32 %s2674_s23, 4  ;;  %s448_s19 = sshll.u32 %s2675_s29, 4  ;;  %s428_s24 = int_to_ptr.vmem [resolvable:$true] %s427_s24  ;;  %s449_s19 = int_to_ptr.vmem [resolvable:$true] %s448_s19 }
  0x65   : > { %s2295_s30 = scalar_lea.hbm %s3352_s7, 16 }
  0x66   : > { %p2296_p13 = scmp.ne.s32.totalorder %s3352_s7, %s2295_s30  ;;  %p2302_p5 = scmp.lt.u32.totalorder %s2295_s30, %s3352_s7 }
  0x68   : > { %p2298_p0 = pnand %p2296_p13, %p2821_p8 }
  0x6a   : > { %p2299_p2 = pneg %p2298_p0 }
  0x6c   : > { %p2304_p7 = pnand %p2302_p5, %p2299_p2 }
  0x6e   : > { %2307 = shalt.err (!%p2304_p7)
}
  0x6f   : > { %s2308_s20 = scalar_lea.vmem %s428_s24, 16  ;;  %s2315_s13 = scalar_lea.vmem %s428_s24, 32 }
  0x70   : > { %p2309_p9 = scmp.ne.s32.totalorder %s428_s24, %s2308_s20  ;;  %p2316_p12 = scmp.lt.s32.totalorder %s428_s24, %s428_s24 }
  0x71   : > { %p2317_p4 = scmp.lt.s32.totalorder %s2315_s13, %s2308_s20 }
  0x72   : > { %p2311_p10 = pnand %p2309_p9, %p2821_p8 }
  0x73   : > { %p2318_p1 = por %p2317_p4, %p2316_p12 }
  0x74   : > { %p2312_p11 = pneg %p2311_p10 }
  0x76   : > { %p2319_p3 = pnand %p2318_p1, %p2312_p11 }
  0x78   : > { %2322 = shalt.err (!%p2319_p3)
}
  0x79   : > { %2066 = dma.hbm_to_vmem [thread:$0]  (!%p2807_p6), %s3352_s7, 16, %s428_s24, [#allocation15]  }
  0x7a   : > { %s2323_s21 = scalar_lea.hbm %s3354_s9, 256 }
  0x7b   : > { %p2324_p13 = scmp.ne.s32.totalorder %s3354_s9, %s2323_s21  ;;  %p2330_p3 = scmp.lt.u32.totalorder %s2323_s21, %s3354_s9 }
  0x7d   : > { %p2326_p0 = pnand %p2324_p13, %p2821_p8 }
  0x7f   : > { %p2327_p1 = pneg %p2326_p0 }
  0x81   : > { %p2332_p2 = pnand %p2330_p3, %p2327_p1 }
  0x83   : > { %2335 = shalt.err (!%p2332_p2)
}
  0x84   : > { %s2336_s20 = scalar_lea.vmem %s449_s19, 256  ;;  %p2344_p10 = scmp.lt.s32.totalorder %s449_s19, %s449_s19 }
  0x85   : > { %p2337_p5 = scmp.ne.s32.totalorder %s449_s19, %s2336_s20  ;;  %p2345_p11 = scmp.lt.s32.totalorder %s2336_s20, %s2336_s20 }
  0x87   : > { %p2339_p7 = pnand %p2337_p5, %p2821_p8  ;;  %p2346_p12 = por %p2345_p11, %p2344_p10 }
  0x89   : > { %p2340_p9 = pneg %p2339_p7 }
  0x8b   : > { %p2347_p4 = pnand %p2346_p12, %p2340_p9 }
  0x8d   : > { %2350 = shalt.err (!%p2347_p4)
}
  0x8e   : > { %2072 = dma.hbm_to_vmem [thread:$0]  (!%p2807_p6), %s3354_s9, 256, %s449_s19, [#allocation18], %s2672_s0, %s2672_s0, %s2673_s15  }
  0x8f   : > { %s2676_s3 = smov [#allocation20]   ;;  %s2677_s14 = smov [#allocation7]  }
  0x90   : > { %s472_s23 = sshll.u32 %s2676_s3, 4  ;;  %s368_s29 = sshll.u32 %s2677_s14, 4  ;;  %s473_s23 = int_to_ptr.vmem [resolvable:$true] %s472_s23  ;;  %s369_s29 = int_to_ptr.vmem [resolvable:$true] %s368_s29 }
  0x91   : > { %s2351_s30 = scalar_lea.hbm %s3356_s11, 1024 }
  0x92   : > { %p2352_p13 = scmp.ne.s32.totalorder %s3356_s11, %s2351_s30  ;;  %p2358_p3 = scmp.lt.u32.totalorder %s2351_s30, %s3356_s11 }
  0x94   : > { %p2354_p0 = pnand %p2352_p13, %p2821_p8 }
  0x96   : > { %p2355_p1 = pneg %p2354_p0 }
  0x98   : > { %p2360_p2 = pnand %p2358_p3, %p2355_p1 }
  0x9a   : > { %2363 = shalt.err (!%p2360_p2)
}
  0x9b   : > { %s2364_s19 = scalar_lea.vmem %s473_s23, 1024  ;;  %p2372_p10 = scmp.lt.s32.totalorder %s473_s23, %s473_s23 }
  0x9c   : > { %p2365_p5 = scmp.ne.s32.totalorder %s473_s23, %s2364_s19  ;;  %p2373_p11 = scmp.lt.s32.totalorder %s2364_s19, %s2364_s19 }
  0x9e   : > { %p2367_p7 = pnand %p2365_p5, %p2821_p8  ;;  %p2374_p12 = por %p2373_p11, %p2372_p10 }
  0xa0   : > { %p2368_p9 = pneg %p2367_p7 }
  0xa2   : > { %p2375_p4 = pnand %p2374_p12, %p2368_p9 }
  0xa4   : > { %2378 = shalt.err (!%p2375_p4)
}
  0xa5   : > { %2078 = dma.hbm_to_vmem [thread:$0]  (!%p2807_p6), %s3356_s11, 1024, %s473_s23, [#allocation21], %s2672_s0, %s2672_s0, %s2673_s15  }
  0xa6   : > { %s3380_s2 = sld [smem:[#allocation36_spill]] }
  0xac   : > { %s2379_s22 = scalar_lea.hbm %s3380_s2, 16 }
  0xad   : > { %p2380_p13 = scmp.ne.s32.totalorder %s3380_s2, %s2379_s22  ;;  %p2386_p3 = scmp.lt.u32.totalorder %s2379_s22, %s3380_s2 }
  0xaf   : > { %p2382_p0 = pnand %p2380_p13, %p2821_p8 }
  0xb1   : > { %p2383_p1 = pneg %p2382_p0 }
  0xb3   : > { %p2388_p2 = pnand %p2386_p3, %p2383_p1 }
  0xb5   : > { %2391 = shalt.err (!%p2388_p2)
}
  0xb6   : > { %s2392_s24 = scalar_lea.vmem %s369_s29, 16  ;;  %s2399_s0 = scalar_lea.vmem %s369_s29, 32 }
  0xb7   : > { %p2393_p5 = scmp.ne.s32.totalorder %s369_s29, %s2392_s24  ;;  %p2400_p10 = scmp.lt.s32.totalorder %s369_s29, %s369_s29 }
  0xb8   : > { %p2401_p11 = scmp.lt.s32.totalorder %s2399_s0, %s2392_s24 }
  0xb9   : > { %p2395_p7 = pnand %p2393_p5, %p2821_p8 }
  0xba   : > { %p2402_p12 = por %p2401_p11, %p2400_p10 }
  0xbb   : > { %p2396_p9 = pneg %p2395_p7 }
  0xbd   : > { %p2403_p4 = pnand %p2402_p12, %p2396_p9 }
  0xbf   : > { %2406 = shalt.err (!%p2403_p4)
}
  0xc0   : > { %2051 = dma.hbm_to_vmem [thread:$0]  (!%p2807_p6), %s3380_s2, 16, %s369_s29, [#allocation6]  }
  0xc1   : > { %s2678_s19 = smov [#allocation10]   ;;  %s2679_s3 = smov [#allocation13]  }
  0xc2   : > { %s392_s13 = sshll.u32 %s2678_s19, 4  ;;  %s416_s14 = sshll.u32 %s2679_s3, 4  ;;  %s393_s13 = int_to_ptr.vmem [resolvable:$true] %s392_s13  ;;  %s417_s14 = int_to_ptr.vmem [resolvable:$true] %s416_s14 }
  0xc3   : > { %s2407_s30 = scalar_lea.hbm %s3349_s4, 16 }
  0xc4   : > { %p2408_p13 = scmp.ne.s32.totalorder %s3349_s4, %s2407_s30  ;;  %p2414_p3 = scmp.lt.u32.totalorder %s2407_s30, %s3349_s4 }
  0xc6   : > { %p2410_p0 = pnand %p2408_p13, %p2821_p8 }
  0xc8   : > { %p2411_p1 = pneg %p2410_p0 }
  0xca   : > { %p2416_p2 = pnand %p2414_p3, %p2411_p1 }
  0xcc   : > { %2419 = shalt.err (!%p2416_p2)
}
  0xcd   : > { %s2420_s29 = scalar_lea.vmem %s393_s13, 16  ;;  %s2427_s0 = scalar_lea.vmem %s393_s13, 32 }
  0xce   : > { %p2421_p5 = scmp.ne.s32.totalorder %s393_s13, %s2420_s29  ;;  %p2428_p10 = scmp.lt.s32.totalorder %s393_s13, %s393_s13 }
  0xcf   : > { %p2429_p11 = scmp.lt.s32.totalorder %s2427_s0, %s2420_s29 }
  0xd0   : > { %p2423_p7 = pnand %p2421_p5, %p2821_p8 }
  0xd1   : > { %p2430_p12 = por %p2429_p11, %p2428_p10 }
  0xd2   : > { %p2424_p9 = pneg %p2423_p7 }
  0xd4   : > { %p2431_p4 = pnand %p2430_p12, %p2424_p9 }
  0xd6   : > { %2434 = shalt.err (!%p2431_p4)
}
  0xd7   : > { %2057 = dma.hbm_to_vmem [thread:$0]  (!%p2807_p6), %s3349_s4, 16, %s393_s13, [#allocation9]  }
  0xd8   : > { %s2435_s21 = scalar_lea.hbm %s3351_s6, 16 }
  0xd9   : > { %p2436_p13 = scmp.ne.s32.totalorder %s3351_s6, %s2435_s21  ;;  %p2442_p3 = scmp.lt.u32.totalorder %s2435_s21, %s3351_s6 }
  0xdb   : > { %p2438_p0 = pnand %p2436_p13, %p2821_p8 }
  0xdd   : > { %p2439_p1 = pneg %p2438_p0 }
  0xdf   : > { %p2444_p2 = pnand %p2442_p3, %p2439_p1 }
  0xe1   : > { %2447 = shalt.err (!%p2444_p2)
}
  0xe2   : > { %s2448_s20 = scalar_lea.vmem %s417_s14, 16  ;;  %s2455_s13 = scalar_lea.vmem %s417_s14, 32 }
  0xe3   : > { %p2449_p5 = scmp.ne.s32.totalorder %s417_s14, %s2448_s20  ;;  %p2456_p10 = scmp.lt.s32.totalorder %s417_s14, %s417_s14 }
  0xe4   : > { %p2457_p11 = scmp.lt.s32.totalorder %s2455_s13, %s2448_s20 }
  0xe5   : > { %p2451_p7 = pnand %p2449_p5, %p2821_p8 }
  0xe6   : > { %p2458_p12 = por %p2457_p11, %p2456_p10 }
  0xe7   : > { %p2452_p9 = pneg %p2451_p7 }
  0xe9   : > { %p2459_p4 = pnand %p2458_p12, %p2452_p9 }
  0xeb   : > { %2462 = shalt.err (!%p2459_p4)
}
  0xec   : > { %2063 = dma.hbm_to_vmem [thread:$0]  (!%p2807_p6), %s3351_s6, 16, %s417_s14, [#allocation12]  }
  0xed   : > { %s2680_s0 = smov [#allocation16]   ;;  %s2681_s23 = smov [#allocation19]  }
  0xee   : > { %s438_s15 = sshll.u32 %s2680_s0, 4  ;;  %s462_s19 = sshll.u32 %s2681_s23, 4  ;;  %s439_s15 = int_to_ptr.vmem [resolvable:$true] %s438_s15  ;;  %s463_s19 = int_to_ptr.vmem [resolvable:$true] %s462_s19 }
  0xef   : > { %s2463_s22 = scalar_lea.hbm %s3353_s8, 16 }
  0xf0   : > { %p2464_p13 = scmp.ne.s32.totalorder %s3353_s8, %s2463_s22  ;;  %p2470_p3 = scmp.lt.u32.totalorder %s2463_s22, %s3353_s8 }
  0xf2   : > { %p2466_p0 = pnand %p2464_p13, %p2821_p8 }
  0xf4   : > { %p2467_p1 = pneg %p2466_p0 }
  0xf6   : > { %p2472_p2 = pnand %p2470_p3, %p2467_p1 }
  0xf8   : > { %2475 = shalt.err (!%p2472_p2)
}
  0xf9   : > { %s2476_s14 = scalar_lea.vmem %s439_s15, 16  ;;  %s2483_s13 = scalar_lea.vmem %s439_s15, 32 }
  0xfa   : > { %p2477_p5 = scmp.ne.s32.totalorder %s439_s15, %s2476_s14  ;;  %p2484_p10 = scmp.lt.s32.totalorder %s439_s15, %s439_s15 }
  0xfb   : > { %p2485_p11 = scmp.lt.s32.totalorder %s2483_s13, %s2476_s14 }
  0xfc   : > { %p2479_p7 = pnand %p2477_p5, %p2821_p8 }
  0xfd   : > { %p2486_p12 = por %p2485_p11, %p2484_p10 }
  0xfe   : > { %p2480_p9 = pneg %p2479_p7 }
 0x100   : > { %p2487_p4 = pnand %p2486_p12, %p2480_p9 }
 0x102   : > { %2490 = shalt.err (!%p2487_p4)
}
 0x103   : > { %2069 = dma.hbm_to_vmem [thread:$0]  (!%p2807_p6), %s3353_s8, 16, %s439_s15, [#allocation15]  }
 0x104   : > { %s2491_s3 = scalar_lea.hbm %s3355_s10, 16 }
 0x105   : > { %p2492_p13 = scmp.ne.s32.totalorder %s3355_s10, %s2491_s3  ;;  %p2498_p3 = scmp.lt.u32.totalorder %s2491_s3, %s3355_s10 }
 0x107   : > { %p2494_p0 = pnand %p2492_p13, %p2821_p8 }
 0x109   : > { %p2495_p1 = pneg %p2494_p0 }
 0x10b   : > { %p2500_p2 = pnand %p2498_p3, %p2495_p1 }
 0x10d   : > { %2503 = shalt.err (!%p2500_p2)
}
 0x10e   : > { %s2504_s1 = scalar_lea.vmem %s463_s19, 16  ;;  %s2511_s15 = scalar_lea.vmem %s463_s19, 32 }
 0x10f   : > { %p2505_p5 = scmp.ne.s32.totalorder %s463_s19, %s2504_s1  ;;  %p2512_p10 = scmp.lt.s32.totalorder %s463_s19, %s463_s19 }
 0x110   : > { %p2513_p11 = scmp.lt.s32.totalorder %s2511_s15, %s2504_s1 }
 0x111   : > { %p2507_p7 = pnand %p2505_p5, %p2821_p8 }
 0x112   : > { %p2514_p12 = por %p2513_p11, %p2512_p10 }
 0x113   : > { %p2508_p9 = pneg %p2507_p7 }
 0x115   : > { %p2515_p4 = pnand %p2514_p12, %p2508_p9 }
 0x117   : > { %2518 = shalt.err (!%p2515_p4)
}
 0x118   : > { %2075 = dma.hbm_to_vmem [thread:$0]  (!%p2807_p6), %s3355_s10, 16, %s463_s19, [#allocation18]  }
 0x119   : > { %s2682_s13 = smov [#allocation22]   ;;  %s2519_s23 = scalar_lea.hbm %s3357_s12, 16 }
 0x11a   : > { %s486_s24 = sshll.u32 %s2682_s13, 4  ;;  %p2520_p13 = scmp.ne.s32.totalorder %s3357_s12, %s2519_s23  ;;  %s487_s24 = int_to_ptr.vmem [resolvable:$true] %s486_s24 }
 0x11b   : > { %p2526_p3 = scmp.lt.u32.totalorder %s2519_s23, %s3357_s12 }
 0x11c   : > { %p2522_p0 = pnand %p2520_p13, %p2821_p8 }
 0x11e   : > { %p2523_p1 = pneg %p2522_p0 }
 0x120   : > { %p2528_p2 = pnand %p2526_p3, %p2523_p1 }
 0x122   : > { %2531 = shalt.err (!%p2528_p2)
}
 0x123   : > { %s2532_s19 = scalar_lea.vmem %s487_s24, 16  ;;  %s2539_s17 = scalar_lea.vmem %s487_s24, 32 }
 0x124   : > { %p2533_p5 = scmp.ne.s32.totalorder %s487_s24, %s2532_s19  ;;  %p2540_p10 = scmp.lt.s32.totalorder %s487_s24, %s487_s24 }
 0x125   : > { %p2541_p11 = scmp.lt.s32.totalorder %s2539_s17, %s2532_s19 }
 0x126   : > { %p2535_p7 = pnand %p2533_p5, %p2821_p8 }
 0x127   : > { %p2542_p12 = por %p2541_p11, %p2540_p10 }
 0x128   : > { %p2536_p9 = pneg %p2535_p7 }
 0x12a   : > { %p2543_p4 = pnand %p2542_p12, %p2536_p9 }
 0x12c   : > { %2546 = shalt.err (!%p2543_p4)
}
 0x12d   : > { %s3381_s16 = sld [smem:[#allocation32_spill]]  ;;  %s1775_s20 = sadd.s32 4294967294, %s2667_s28  }
 0x12e   : > { %2081 = dma.hbm_to_vmem [thread:$0]  (!%p2807_p6), %s3357_s12, 16, %s487_s24, [#allocation21]  }
 0x12f   : > { %s3065_s18 = sadd.s32 1, %s2667_s28   ;;  %s42_s13 = sadd.s32 1, %s2663_s27 }
 0x130   : > { %s39_s14 = ssub.s32 %s2667_s28, %s3065_s18  ;;  %p49_p13 = scmp.ne.s32.totalorder %s2663_s27, %s2659_s26 }
 0x131   : > { %p40_p8 = scmp.eq.s32.totalorder %s39_s14, 0  ;;  %p50_p0 = scmp.eq.s32.totalorder %s2667_s28, 0 }
 0x132   : > { %p55_p1 = scmp.ne.s32.totalorder %s2659_s26, %s2655_s25  ;;  %p337_p7 = scmp.eq.s32.totalorder %s1775_s20, 1 }
 0x133   : > { %s3076_s29 = scalar_select %p40_p8, %s2663_s27, %s42_s13  }
 0x134   : > { %p3078_p3 = por %p50_p0, %p49_p13  ;;  %p3383_p2 = scmp.eq.s32.totalorder %s3381_s16, 0 }
 0x135   : > { %p331_p5 = scmp.eq.s32.totalorder %s3381_s16, 1  ;;  %p2102_p9 = scmp.lt.s32.totalorder %s2667_s28, 2 }
 0x136   : > { %p3084_p6 = por %p3383_p2, %p55_p1  ;;  %s497_s23 = sand.u32 1, %s2663_s27  }
 0x137   : > { %p3091_p10 = por %p331_p5, %p49_p13  ;;  %p3095_p11 = por %p337_p7, %p55_p1 }
 0x138   : > { %s1790_s22 = sshll.u32 %s497_s23, 3  ;;  %s1791_s30 = sshll.u32 %s2667_s28, 7 }
 0x139   : > { %s3385_s3 = scalar_select %p3091_p10, 1, 0 }
 0x13a   : > { %s3386_s21 = scalar_select %p3095_p11, 1, 0 }
 0x13b   : > { %s3387_s1 = sld [smem:[#allocation34_spill]]  ;;  %s501_s16 = scalar_lea.vmem [#allocation2], %s1790_s22 }
 0x13c   : > { %s508_s20 = sshll.u32 %s501_s16, 4  ;;  %p3109_p12 = pnand %p2102_p9, %p3078_p3  ;;  %s3105_s20 = int_to_ptr.vmem [resolvable:$true] %s508_s20 }
 0x13d   : > { %s498_s13 = scalar_lea.sflag [#allocation3], %s497_s23 }
 0x13e   : > { %p2549_p8 = pneg %p3109_p12 }
 0x141   : > { %s3103_s15 = scalar_lea.hbm %s3387_s1, %s1791_s30  ;;  %s2552_s19 = scalar_lea.hbm %s3387_s1, 256 }
 0x142   : > { %s2547_s2 = scalar_lea.hbm %s3103_s15, 128  ;;  %p2553_p1 = scmp.lt.u32.totalorder %s3103_s15, %s3387_s1 }
 0x143   : > { %p2548_p4 = scmp.ne.s32.totalorder %s3103_s15, %s2547_s2  ;;  %p2554_p3 = scmp.lt.u32.totalorder %s2552_s19, %s2547_s2 }
 0x144   : > { %p2556_p5 = scmp.lt.u32.totalorder %s2547_s2, %s3103_s15 }
 0x145   : > { %p2550_p13 = pnand %p2549_p8, %p2548_p4  ;;  %p2555_p2 = por %p2554_p3, %p2553_p1 }
 0x147   : > { %p2551_p0 = pneg %p2550_p13  ;;  %p2557_p7 = por %p2556_p5, %p2555_p2 }
 0x149   : > { %p2558_p9 = pnand %p2557_p7, %p2551_p0 }
 0x14b   : > { %2561 = shalt.err (!%p2558_p9)
}
 0x14c   : > { %s2562_s23 = scalar_lea.vmem %s3105_s20, 128  ;;  %s2683_s16 = smov [#allocation2]  }
 0x14d   : > { %p2563_p4 = scmp.ne.s32.totalorder %s3105_s20, %s2562_s23  ;;  %s2567_s22 = sshll.u32 %s2683_s16, 4  ;;  %s2568_s22 = int_to_ptr.vmem [resolvable:$false] %s2567_s22 }
 0x14e   : > { %s2569_s30 = scalar_lea.vmem %s2568_s22, 256  ;;  %p2570_p10 = scmp.lt.s32.totalorder %s3105_s20, %s2568_s22 }
 0x14f   : > { %p2565_p13 = pnand %p2563_p4, %p2549_p8  ;;  %p2571_p1 = scmp.lt.s32.totalorder %s2569_s30, %s2562_s23 }
 0x151   : > { %p2566_p11 = pneg %p2565_p13  ;;  %p2572_p3 = por %p2571_p1, %p2570_p10 }
 0x153   : > { %p2573_p2 = pnand %p2572_p3, %p2566_p11 }
 0x155   : > { %2576 = shalt.err (!%p2573_p2)
}
 0x156   : > { %2085 = dma.hbm_to_vmem [thread:$0]  (!%p3109_p12), %s3103_s15, 128, %s3105_s20, %s498_s13  }
 0x157   : > { %s3389_s2 = sld [smem:[#allocation33_spill]] }
 0x15d   : > { %p3390_p0 = scmp.ne.s32.totalorder %s3389_s2, 0 }
 0x15e   : > { %s3141_s19 = sand.u32 (!%p3390_p0), 1, %s2659_s26  }
 0x15f   : > { %517 = sbr.rel (%p3390_p0) target bundleno = 4612 (0x1204), region = 72  ;;  %s1793_s0 = sshll.u32 (!%p3390_p0), %s3141_s19, 3 }
 0x160   : > { %s520_s17 = scalar_lea.sflag (!%p3390_p0), [#allocation3], %s3141_s19  ;;  %s523_s23 = scalar_lea.vmem (!%p3390_p0), [#allocation2], %s1793_s0 }
 0x166   : > { %2622 = dma.done.wait (%p3084_p6), %s520_s17, 128  }
 0x167   : > { %2624 = vsyncadd (%p3084_p6), %s520_s17, 4294967168  ;;  %s3391_s15 = sld [smem:[#allocation32_spill]] }
 0x16d   : > { %p3392_p10 = scmp.eq.s32.totalorder %s3391_s15, 0 }
 0x16f   : > { %2626 = dma.done.wait (%p3392_p10), [#allocation6], 32   ;;  %p3393_p11 = pmov %p3392_p10 }
 0x170   : > { %p3394_p12 = pmov %p3392_p10 }
 0x171   : > { %2628 = vsyncadd (%p3393_p11), [#allocation6], 4294967264 }
 0x172   : > { %2630 = dma.done.wait (%p3394_p12), [#allocation9], 272   ;;  %p3395_p8 = pmov %p3392_p10 }
 0x174   : > { %2632 = vsyncadd (%p3395_p8), [#allocation9], 4294967024  ;;  %p3396_p5 = pmov %p3395_p8 }
 0x176   : > { %2634 = dma.done.wait (%p3396_p5), [#allocation12], 272   ;;  %p3397_p7 = pmov %p3396_p5 }
 0x177   : > { %p3398_p6 = pmov %p3396_p5 }
 0x178   : > { %2636 = vsyncadd (%p3397_p7), [#allocation12], 4294967024 }
 0x179   : > { %2638 = dma.done.wait (%p3398_p6), [#allocation15], 32   ;;  %p3399_p9 = pmov %p3396_p5 }
 0x17a   : > { %p3400_p4 = pmov %p3396_p5 }
 0x17b   : > { %2640 = vsyncadd (%p3399_p9), [#allocation15], 4294967264 }
 0x17c   : > { %2642 = dma.done.wait (%p3400_p4), [#allocation18], 272   ;;  %p3401_p13 = pmov %p3400_p4 }
 0x17d   : > { %p3402_p1 = pmov %p3400_p4 }
 0x17e   : > { %2644 = vsyncadd (%p3401_p13), [#allocation18], 4294967024 }
 0x17f   : > { %2646 = dma.done.wait (%p3402_p1), [#allocation21], 1040   ;;  %p3403_p3 = pmov %p3402_p1 }
 0x180   : > { %vm618_vm0 = vcmask 261120   ;;  %v3175_v0 = vld [vmem:[%s523_s23] sm:$0xff]  ;;  %v2175_v7 = vld [vmem:[#allocation8] sm:$0xff]   ;;  %v2684_v8 = vmov 0.0   ;;  %vm2685_vm1 = vmmov 0   ;;  %s2686_s24 = smov 64  }
 0x181   : > { %2648 = vsyncadd (%p3403_p3), [#allocation21], 4294966256  ;;  %v619_v1 = vsel %vm618_vm0, %v3175_v0, 0.0  ;;  %1885 = vmatprep.subr.bf16.mxu1 %v2684_v8  ;;  %1889 = vmatprep.mubr.msk.bf16.mxu1 %vm2685_vm1, %v2684_v8  ;;  %v2176_v9 = vld [vmem:[#allocation8 + $0x8] sm:$0xff]   ;;  %v1807_v14 = vld [vmem:[#allocation5] ss:$0 sm:$0xff] }
 0x182   : > { %620 = vadd.xlane.f32.xlu0 %v619_v1  ;;  %1886 = vmatpush3.bf16.msra.mxu1 %v2175_v7  ;;  %v1808_v16 = vld [vmem:[#allocation7] ss:$0 sm:$0xff]  ;;  %v1809_v20 = vld [vmem:[#allocation10] ss:$0 sm:$0xff]  ;;  %s2687_s20 = smov 96   ;;  %vm718_vm2 = vcmask 64512  }
 0x183   : > { %1911 = vmatprep.subr.bf16.mxu0 %v2684_v8  ;;  %1887 = vmatprep.subr.bf16.mxu1 %v2684_v8  ;;  %vm782_vm3 = vcmask 1043456   ;;  %s2688_s14 = smov 88   ;;  %s2689_s13 = smov 120   ;;  %v939_v1 = vld [vmem:[#allocation11 + $0x4] sm:$0xf] }
 0x184   : > { %1913 = vmatprep.mubr.msk.bf16.mxu0 %vm2685_vm1, %v2684_v8  ;;  %s2690_s16 = smov 56   ;;  %s2691_s22 = smov 80  }
 0x185   : > { %s2692_s30 = smov 112   ;;  %s2693_s2 = smov 48  }
 0x186   : > { %1888 = vmatpush3.bf16.msra.mxu1 %v2176_v9  ;;  %s2694_s17 = smov 72   ;;  %s2695_s23 = smov 104  }
 0x187   : > { %1893 = vmatprep.subr.bf16.mxu1 %v2684_v8  ;;  %p3405_p0 = scmp.ne.s32.totalorder %s3385_s3, 0 }
 0x20f   : > { %v621_v2 = vpop.xlane.xlu0 %620 }
 0x210   : > { %v623_v3 = vmul.f32 0.03125, %v621_v2  ;;  %v944_v2 = vsel %vm782_vm3, %v939_v1, 0 }
 0x212   : > { %v624_v4 = vsub.f32 %v3175_v0, %v623_v3 }
 0x214   : > { %v625_v5 = vmul.f32 %v624_v4, %v624_v4 }
 0x216   : > { %v626_v6 = vsel %vm618_vm0, %v625_v5, 0.0  ;;  %v827_v5 = vld [vmem:[#allocation11] sm:$0xf] }
 0x217   : > { %627 = vadd.xlane.f32.xlu0 %v626_v6  ;;  %v990_v9 = vsel %vm782_vm3, %v827_v5, 0 }
 0x2a4   : > { %v628_v10 = vpop.xlane.xlu0 %627 }
 0x2a5   : > { %v629_v11 = vmul.f32 0.03125, %v628_v10 }
 0x2a7   : > { %v630_v12 = vadd.f32 1e-05, %v629_v11 }
 0x2a9   : > { %2187 = vrsqrt.f32 %v630_v12 }
 0x2b3   : > { %v2188_v13 = vpop.eup %2187 }
 0x2b4   : > { %v632_v15 = vmul.f32 %v2188_v13, %v624_v4 }
 0x2b6   : > { %v639_v17 = vmul.f32 %v1807_v14, %v632_v15 }
 0x2b8   : > { %v646_v18 = vadd.f32 %v1808_v16, %v639_v17 }
 0x2ba   : > { %v647_v19 = vpack.c.bf16 %v646_v18, %v646_v18 }
 0x2bc   : > { %1890 = vmatmul.mubr.msk.bf16.vlgmr.msra.gmra.mrb[0].mxu1 %vm618_vm0, %v647_v19 }
 0x2bd   : > { %1895 = vmatprep.mubr.msk.bf16.mxu1 %vm2685_vm1, %v2684_v8 }
 0x38f   : > { %v708_v21 = vpop.f32.mrb[0].mxu1 }
 0x390   : > { %v709_v22 = vadd.f32 %v1809_v20, %v708_v21  ;;  %v1891_v23 = vpop.f32.mrb[1].mxu1 }
 0x391   : > { %v711_v24 = vpop.f32.mrb[2].mxu1 }
 0x392   : > { %v3192_v25 = vpack.c.bf16 %v709_v22, %v709_v22  ;;  %v1892_v26 = vpop.f32.mrb[3].mxu1 }
 0x394   : > { %777 = vrot.lane.b32.xlu0 %v3192_v25, %s2686_s24  ;;  %716 = vrot.lane.b32.xlu1 %v3192_v25, %s2687_s20  ;;  %s2696_s24 = smov 40   ;;  %s1843_s20 = sshll.u32 %s3391_s15, 7 }
 0x406   : > { %v717_v27 = vpop.permute.xlu1 %716  ;;  %v778_v29 = vpop.permute.xlu0 %777 }
 0x407   : > { %v723_v28 = vsel %vm718_vm2, %v717_v27, 0  ;;  %v784_v30 = vsel %vm782_vm3, %v778_v29, 0 }
 0x408   : > { %1894 = vmatpush3.bf16.xpose.msra.mxu1 %v723_v28 }
 0x409   : > { %1899 = vmatprep.subr.bf16.mxu1 %v2684_v8 }
 0x40f   : > { %1896 = vmatmul.mubr.msk.bf16.vlgmr.msra.gmra.mrb[4].mxu1 %vm718_vm2, %v3192_v25 }
 0x410   : > { %1900 = vmatpush3.bf16.msra.mxu1 %v784_v30  ;;  %1901 = vmatprep.mubr.msk.bf16.mxu1 %vm2685_vm1, %v2684_v8 }
 0x411   : > { %1905 = vmatprep.subr.bf16.mxu1 %v2684_v8 }
 0x4e2   : > { %v759_v31 = vpop.f32.mrb[4].mxu1 }
 0x4e3   : > { %v1897_v32 = vpop.f32.mrb[5].mxu1  ;;  %v765_v33 = vsel %vm718_vm2, %v759_v31, -inf }
 0x4e4   : > { %766 = vmax.xlane.f32.xlu1 %v765_v33  ;;  %v762_v34 = vpop.f32.mrb[6].mxu1 }
 0x4e5   : > { %v1898_v35 = vpop.f32.mrb[7].mxu1 }
 0x571   : > { %v767_v36 = vpop.xlane.xlu1 %766 }
 0x572   : > { %v768_v37 = vsub.f32 %v759_v31, %v767_v36 }
 0x574   : > { %v769_v38 = vmul.f32 1.442695, %v768_v37 }
 0x576   : > { %2189 = vpow2.f32 %v769_v38 }
 0x580   : > { %v2190_v39 = vpop.eup %2189 }
 0x581   : > { %v771_v40 = vsel %vm718_vm2, %v2190_v39, 0.0 }
 0x582   : > { %772 = vadd.xlane.f32.xlu0 %v771_v40 }
 0x598   : > { %830 = vrot.lane.b32.xlu0 %v3192_v25, %s2688_s14  ;;  %s613_s14 = scalar_lea.vmem [#allocation23], %s1793_s0  ;;  %s1578_s0 = scalar_lea.sflag [#allocation4], %s3141_s19 }
 0x59c   : > { %828 = vrot.lane.b32.xlu0 %v3192_v25, %s2689_s13  ;;  %s1591_s13 = sshll.u32 %s613_s14, 4  ;;  %s3302_s13 = int_to_ptr.vmem [resolvable:$true] %s1591_s13 }
 0x59d   : > { %s2577_s15 = scalar_lea.vmem %s3302_s13, 128 }
 0x59e   : > { %p2578_p2 = scmp.ne.s32.totalorder %s3302_s13, %s2577_s15 }
 0x5a0   : > { %p2579_p10 = pnand %p2578_p2, %p3405_p0 }
 0x5a2   : > { %p2580_p11 = pneg %p2579_p10 }
 0x60f   : > { %v773_v41 = vpop.xlane.xlu0 %772 }
 0x610   : > { %2191 = vrcp.f32 %v773_v41 }
 0x613   : > { %v831_v44 = vpop.permute.xlu0 %830 }
 0x614   : > { %v836_v46 = vsel %vm718_vm2, %v831_v44, 0 }
 0x617   : > { %v829_v47 = vpop.permute.xlu0 %828 }
 0x61a   : > { %v2192_v42 = vpop.eup %2191 }
 0x61b   : > { %v775_v43 = vmul.f32 %v2192_v42, %v2190_v39 }
 0x61d   : > { %v776_v45 = vpack.c.bf16 %v775_v43, %v775_v43 }
 0x61f   : > { %1902 = vmatmul.mubr.msk.bf16.vlgmr.msra.gmra.mrb[8].mxu1 %vm718_vm2, %v776_v45 }
 0x620   : > { %1906 = vmatpush3.bf16.xpose.msra.mxu1 %v836_v46  ;;  %1907 = vmatprep.mubr.msk.bf16.mxu1 %vm2685_vm1, %v2684_v8 }
 0x621   : > { %1917 = vmatprep.subr.bf16.mxu1 %v2684_v8 }
 0x627   : > { %1908 = vmatmul.mubr.msk.bf16.vlgmr.msra.gmra.mrb[12].mxu1 %vm718_vm2, %v829_v47 }
 0x628   : > { %1919 = vmatprep.mubr.msk.bf16.mxu1 %vm2685_vm1, %v2684_v8  ;;  %1918 = vmatpush3.bf16.msra.mxu1 %v944_v2 }
 0x629   : > { %1929 = vmatprep.subr.bf16.mxu1 %v2684_v8 }
 0x6f2   : > { %v820_v48 = vpop.f32.mrb[8].mxu1 }
 0x6f3   : > { %v1903_v49 = vpop.f32.mrb[9].mxu1  ;;  %v826_v11 = vpack.c.bf16 %v820_v48, %v820_v48  ;;  %v1143_v48 = vld [vmem:[#allocation11 + $0x8] sm:$0xf] }
 0x6f4   : > { %v823_v50 = vpop.f32.mrb[10].mxu1  ;;  %v1148_v49 = vsel %vm782_vm3, %v1143_v48, 0  ;;  %v2181_v48 = vld [vmem:[#allocation20 + $0x10] sm:$0xff]  }
 0x6f5   : > { %v1904_v51 = vpop.f32.mrb[11].mxu1 }
 0x6fa   : > { %v872_v52 = vpop.f32.mrb[12].mxu1 }
 0x6fb   : > { %v1909_v53 = vpop.f32.mrb[13].mxu1  ;;  %v878_v54 = vsel %vm718_vm2, %v872_v52, -inf }
 0x6fc   : > { %879 = vmax.xlane.f32.xlu1 %v878_v54  ;;  %v875_v55 = vpop.f32.mrb[14].mxu1 }
 0x6fd   : > { %v1910_v56 = vpop.f32.mrb[15].mxu1 }
 0x70d   : > { %890 = vrot.lane.b32.xlu1 %v3192_v25, %s2690_s16 }
 0x711   : > { %1034 = vrot.lane.b32.xlu1 %v3192_v25, %s2691_s22 }
 0x715   : > { %1032 = vrot.lane.b32.xlu1 %v3192_v25, %s2692_s30  ;;  %s3404_s30 = sld [smem:[#allocation38_spill]] }
 0x789   : > { %v880_v57 = vpop.xlane.xlu1 %879 }
 0x78a   : > { %v881_v58 = vsub.f32 %v872_v52, %v880_v57 }
 0x78c   : > { %v882_v59 = vmul.f32 1.442695, %v881_v58 }
 0x78d   : > { %v891_v60 = vpop.permute.xlu1 %890 }
 0x78e   : > { %2193 = vpow2.f32 %v882_v59  ;;  %v896_v61 = vsel %vm782_vm3, %v891_v60, 0 }
 0x78f   : > { %1912 = vmatpush3.bf16.msra.mxu0 %v896_v61 }
 0x790   : > { %1923 = vmatprep.subr.bf16.mxu0 %v2684_v8 }
 0x791   : > { %v1035_v13 = vpop.permute.xlu1 %1034 }
 0x792   : > { %v1040_v18 = vsel %vm718_vm2, %v1035_v13, 0 }
 0x795   : > { %v1033_v22 = vpop.permute.xlu1 %1032 }
 0x798   : > { %v2194_v62 = vpop.eup %2193 }
 0x799   : > { %v884_v63 = vsel %vm718_vm2, %v2194_v62, 0.0 }
 0x79a   : > { %885 = vadd.xlane.f32.xlu0 %v884_v63 }
 0x7b0   : > { %1094 = vrot.lane.b32.xlu0 %v3192_v25, %s2693_s2  ;;  %s3300_s2 = scalar_lea.hbm %s3404_s30, %s1843_s20 }
 0x827   : > { %v886_v3 = vpop.xlane.xlu0 %885 }
 0x828   : > { %2195 = vrcp.f32 %v886_v3 }
 0x82b   : > { %v1095_v10 = vpop.permute.xlu0 %1094 }
 0x82c   : > { %v1100_v12 = vsel %vm782_vm3, %v1095_v10, 0 }
 0x832   : > { %v2196_v4 = vpop.eup %2195 }
 0x833   : > { %v888_v6 = vmul.f32 %v2196_v4, %v2194_v62  ;;  %v1302_v4 = vld [vmem:[#allocation11 + $0xc] sm:$0xf] }
 0x834   : > { %v1307_v5 = vsel %vm782_vm3, %v1302_v4, 0 }
 0x835   : > { %v889_v7 = vpack.c.bf16 %v888_v6, %v888_v6 }
 0x837   : > { %1914 = vmatmul.mubr.msk.bf16.vlgmr.msra.gmra.mrb[0].mxu0 %vm718_vm2, %v889_v7 }
 0x838   : > { %1924 = vmatpush3.bf16.msra.mxu0 %v990_v9  ;;  %1925 = vmatprep.mubr.msk.bf16.mxu0 %vm2685_vm1, %v2684_v8 }
 0x839   : > { %1935 = vmatprep.subr.bf16.mxu0 %v2684_v8 }
 0x83f   : > { %1926 = vmatmul.mubr.msk.bf16.vlgmr.msra.gmra.mrb[4].mxu0 %vm718_vm2, %v826_v11 }
 0x840   : > { %1936 = vmatpush3.bf16.msra.mxu0 %v1100_v12  ;;  %1937 = vmatprep.mubr.msk.bf16.mxu0 %vm2685_vm1, %v2684_v8 }
 0x841   : > { %1947 = vmatprep.subr.bf16.mxu0 %v2684_v8 }
 0x90a   : > { %v932_v14 = vpop.f32.mrb[0].mxu0 }
 0x90b   : > { %v938_v15 = vpack.c.bf16 %v932_v14, %v932_v14  ;;  %v1915_v16 = vpop.f32.mrb[1].mxu0 }
 0x90c   : > { %v935_v17 = vpop.f32.mrb[2].mxu0 }
 0x90d   : > { %v1916_v19 = vpop.f32.mrb[3].mxu0  ;;  %1920 = vmatmul.mubr.msk.bf16.vlgmr.msra.gmra.mrb[16].mxu1 %vm718_vm2, %v938_v15 }
 0x90e   : > { %1930 = vmatpush3.bf16.xpose.msra.mxu1 %v1040_v18  ;;  %1931 = vmatprep.mubr.msk.bf16.mxu1 %vm2685_vm1, %v2684_v8 }
 0x90f   : > { %1941 = vmatprep.subr.bf16.mxu1 %v2684_v8 }
 0x912   : > { %v1026_v20 = vpop.f32.mrb[4].mxu0 }
 0x913   : > { %v1927_v21 = vpop.f32.mrb[5].mxu0 }
 0x914   : > { %v1029_v23 = vpop.f32.mrb[6].mxu0 }
 0x915   : > { %v1928_v24 = vpop.f32.mrb[7].mxu0  ;;  %1932 = vmatmul.mubr.msk.bf16.vlgmr.msra.gmra.mrb[20].mxu1 %vm718_vm2, %v1033_v22  ;;  %v1825_v23 = vld [vmem:[#allocation13] ss:$0 sm:$0xff] }
 0x916   : > { %1943 = vmatprep.mubr.msk.bf16.mxu1 %vm2685_vm1, %v2684_v8  ;;  %1942 = vmatpush3.bf16.msra.mxu1 %v1148_v49  ;;  %v2182_v49 = vld [vmem:[#allocation20 + $0x18] sm:$0xff]  }
 0x917   : > { %1953 = vmatprep.subr.bf16.mxu1 %v2684_v8 }
 0x9e0   : > { %v980_v26 = vpop.f32.mrb[16].mxu1 }
 0x9e1   : > { %v3244_v27 = vadd.f32 %v1026_v20, %v980_v26  ;;  %v1921_v28 = vpop.f32.mrb[17].mxu1 }
 0x9e2   : > { %v983_v29 = vpop.f32.mrb[18].mxu1 }
 0x9e3   : > { %v1922_v30 = vpop.f32.mrb[19].mxu1 }
 0x9e8   : > { %v1076_v31 = vpop.f32.mrb[20].mxu1 }
 0x9e9   : > { %v1933_v32 = vpop.f32.mrb[21].mxu1  ;;  %v1082_v33 = vsel %vm718_vm2, %v1076_v31, -inf }
 0x9ea   : > { %1083 = vmax.xlane.f32.xlu1 %v1082_v33  ;;  %v1079_v34 = vpop.f32.mrb[22].mxu1 }
 0x9eb   : > { %v1934_v35 = vpop.f32.mrb[23].mxu1 }
 0x9ec   : > { %v2177_v35 = vld [vmem:[#allocation17] sm:$0xff]  }
 0xa77   : > { %v1084_v36 = vpop.xlane.xlu1 %1083 }
 0xa78   : > { %v1085_v37 = vsub.f32 %v1076_v31, %v1084_v36  ;;  %v2178_v36 = vld [vmem:[#allocation17 + $0x8] sm:$0xff]  }
 0xa7a   : > { %v1086_v38 = vmul.f32 1.442695, %v1085_v37 }
 0xa7c   : > { %2197 = vpow2.f32 %v1086_v38 }
 0xa86   : > { %v2198_v39 = vpop.eup %2197 }
 0xa87   : > { %v1088_v40 = vsel %vm718_vm2, %v2198_v39, 0.0 }
 0xa88   : > { %1089 = vadd.xlane.f32.xlu0 %v1088_v40  ;;  %v1826_v40 = vld [vmem:[#allocation14] ss:$0 sm:$0xff] }
 0xa9e   : > { %1193 = vrot.lane.b32.xlu0 %v3192_v25, %s2694_s17  ;;  %s2697_s17 = smov [#allocation23]  }
 0xaa2   : > { %1191 = vrot.lane.b32.xlu0 %v3192_v25, %s2695_s23  ;;  %s2581_s23 = sshll.u32 %s2697_s17, 4  ;;  %s2582_s23 = int_to_ptr.vmem [resolvable:$false] %s2581_s23 }
 0xaa3   : > { %p2584_p12 = scmp.lt.s32.totalorder %s3302_s13, %s2582_s23 }
 0xb15   : > { %v1090_v41 = vpop.xlane.xlu0 %1089 }
 0xb16   : > { %2199 = vrcp.f32 %v1090_v41 }
 0xb19   : > { %v1194_v44 = vpop.permute.xlu0 %1193 }
 0xb1a   : > { %v1199_v46 = vsel %vm718_vm2, %v1194_v44, 0 }
 0xb1d   : > { %v1192_v47 = vpop.permute.xlu0 %1191 }
 0xb20   : > { %v2200_v42 = vpop.eup %2199 }
 0xb21   : > { %v1092_v43 = vmul.f32 %v2200_v42, %v2198_v39  ;;  %v1827_v42 = vld [vmem:[#allocation16] ss:$0 sm:$0xff] }
 0xb23   : > { %v1093_v45 = vpack.c.bf16 %v1092_v43, %v1092_v43 }
 0xb25   : > { %1938 = vmatmul.mubr.msk.bf16.vlgmr.msra.gmra.mrb[8].mxu0 %vm718_vm2, %v1093_v45 }
 0xb26   : > { %1948 = vmatpush3.bf16.xpose.msra.mxu0 %v1199_v46  ;;  %1949 = vmatprep.mubr.msk.bf16.mxu0 %vm2685_vm1, %v2684_v8  ;;  %v2179_v46 = vld [vmem:[#allocation20] sm:$0xff]  }
 0xb27   : > { %1959 = vmatprep.subr.bf16.mxu0 %v2684_v8 }
 0xb2d   : > { %1950 = vmatmul.mubr.msk.bf16.vlgmr.msra.gmra.mrb[12].mxu0 %vm718_vm2, %v1192_v47  ;;  %v2180_v47 = vld [vmem:[#allocation20 + $0x8] sm:$0xff]  }
 0xb2e   : > { %1961 = vmatprep.mubr.msk.bf16.mxu0 %vm2685_vm1, %v2684_v8  ;;  %1960 = vmatpush3.bf16.msra.mxu0 %v1307_v5 }
 0xb2f   : > { %1973 = vmatprep.subr.bf16.mxu0 %v2684_v8 }
 0xbf8   : > { %v1136_v50 = vpop.f32.mrb[8].mxu0 }
 0xbf9   : > { %v1142_v51 = vpack.c.bf16 %v1136_v50, %v1136_v50  ;;  %v1939_v52 = vpop.f32.mrb[9].mxu0  ;;  %v2183_v50 = vld [vmem:[#allocation20 + $0x20] sm:$0xff]  }
 0xbfa   : > { %v1139_v53 = vpop.f32.mrb[10].mxu0  ;;  %v2185_v52 = vld [vmem:[#allocation20 + $0x30] sm:$0xff]  }
 0xbfb   : > { %v1940_v54 = vpop.f32.mrb[11].mxu0  ;;  %1944 = vmatmul.mubr.msk.bf16.vlgmr.msra.gmra.mrb[24].mxu1 %vm718_vm2, %v1142_v51  ;;  %v2184_v51 = vld [vmem:[#allocation20 + $0x28] sm:$0xff]   ;;  %v2186_v53 = vld [vmem:[#allocation20 + $0x38] sm:$0xff]  }
 0xbfc   : > { %1955 = vmatprep.mubr.msk.bf16.mxu1 %vm2685_vm1, %v2684_v8  ;;  %v1828_v54 = vld [vmem:[#allocation19] ss:$0 sm:$0xff] }
 0xc00   : > { %v1235_v55 = vpop.f32.mrb[12].mxu0 }
 0xc01   : > { %v1951_v56 = vpop.f32.mrb[13].mxu0  ;;  %v1241_v57 = vsel %vm718_vm2, %v1235_v55, -inf }
 0xc02   : > { %1242 = vmax.xlane.f32.xlu1 %v1241_v57  ;;  %v1238_v58 = vpop.f32.mrb[14].mxu0 }
 0xc03   : > { %v1952_v59 = vpop.f32.mrb[15].mxu0 }
 0xc13   : > { %1253 = vrot.lane.b32.xlu1 %v3192_v25, %s2696_s24  ;;  %s2583_s24 = scalar_lea.vmem %s2582_s23, 256 }
 0xc14   : > { %p2585_p8 = scmp.lt.s32.totalorder %s2583_s24, %s2577_s15 }
 0xc16   : > { %p2586_p5 = por %p2585_p8, %p2584_p12 }
 0xc18   : > { %p2587_p7 = pnand %p2586_p5, %p2580_p11 }
 0xc8f   : > { %v1243_v60 = vpop.xlane.xlu1 %1242 }
 0xc90   : > { %v1244_v61 = vsub.f32 %v1235_v55, %v1243_v60 }
 0xc92   : > { %v1245_v62 = vmul.f32 1.442695, %v1244_v61 }
 0xc93   : > { %v1254_v63 = vpop.permute.xlu1 %1253 }
 0xc94   : > { %2201 = vpow2.f32 %v1245_v62  ;;  %v1259_v1 = vsel %vm782_vm3, %v1254_v63, 0 }
 0xc95   : > { %1954 = vmatpush3.bf16.msra.mxu1 %v1259_v1 }
 0xc96   : > { %1965 = vmatprep.subr.bf16.mxu1 %v2684_v8 }
 0xc9e   : > { %v2202_v2 = vpop.eup %2201 }
 0xc9f   : > { %v1247_v3 = vsel %vm718_vm2, %v2202_v2, 0.0 }
 0xca0   : > { %1248 = vadd.xlane.f32.xlu0 %v1247_v3  ;;  %v1833_v3 = vld [vmem:[#allocation22] ss:$0 sm:$0xff] }
 0xcce   : > { %v1184_v25 = vpop.f32.mrb[24].mxu1 }
 0xccf   : > { %v1190_v6 = vadd.f32 %v1184_v25, %v3244_v27  ;;  %v1945_v7 = vpop.f32.mrb[25].mxu1 }
 0xcd0   : > { %v1187_v9 = vpop.f32.mrb[26].mxu1 }
 0xcd1   : > { %v1946_v10 = vpop.f32.mrb[27].mxu1 }
 0xd2d   : > { %v1249_v11 = vpop.xlane.xlu0 %1248 }
 0xd2e   : > { %2203 = vrcp.f32 %v1249_v11 }
 0xd38   : > { %v2204_v12 = vpop.eup %2203 }
 0xd39   : > { %v1251_v13 = vmul.f32 %v2204_v12, %v2202_v2 }
 0xd3b   : > { %v1252_v14 = vpack.c.bf16 %v1251_v13, %v1251_v13 }
 0xd3d   : > { %1956 = vmatmul.mubr.msk.bf16.vlgmr.msra.gmra.mrb[28].mxu1 %vm718_vm2, %v1252_v14 }
 0xd3e   : > { %1969 = vmatprep.mubr.msk.bf16.mxu1 %vm2685_vm1, %v2684_v8  ;;  %1966 = vmatpush3.bf16.msra.mxu1 %v2177_v35 }
 0xd3f   : > { %1967 = vmatprep.subr.bf16.mxu1 %v2684_v8 }
 0xd42   : > { %1968 = vmatpush3.bf16.msra.mxu1 %v2178_v36 }
 0xe10   : > { %v1295_v15 = vpop.f32.mrb[28].mxu1 }
 0xe11   : > { %v1301_v16 = vpack.c.bf16 %v1295_v15, %v1295_v15  ;;  %v1957_v17 = vpop.f32.mrb[29].mxu1 }
 0xe12   : > { %v1298_v18 = vpop.f32.mrb[30].mxu1 }
 0xe13   : > { %v1958_v19 = vpop.f32.mrb[31].mxu1  ;;  %1962 = vmatmul.mubr.msk.bf16.vlgmr.msra.gmra.mrb[16].mxu0 %vm718_vm2, %v1301_v16 }
 0xe14   : > { %1989 = vmatprep.mubr.msk.bf16.mxu0 %vm2685_vm1, %v2684_v8  ;;  %1974 = vmatpush3.bf16.msra.mxu0 %v2179_v46 }
 0xe15   : > { %1975 = vmatprep.subr.bf16.mxu0 %v2684_v8 }
 0xe18   : > { %1976 = vmatpush3.bf16.msra.mxu0 %v2180_v47 }
 0xe19   : > { %1977 = vmatprep.subr.bf16.mxu0 %v2684_v8 }
 0xe1c   : > { %1978 = vmatpush3.bf16.msra.mxu0 %v2181_v48 }
 0xe1d   : > { %1979 = vmatprep.subr.bf16.mxu0 %v2684_v8 }
 0xe20   : > { %1980 = vmatpush3.bf16.msra.mxu0 %v2182_v49 }
 0xe21   : > { %1981 = vmatprep.subr.bf16.mxu0 %v2684_v8 }
 0xe24   : > { %1982 = vmatpush3.bf16.msra.mxu0 %v2183_v50 }
 0xe25   : > { %1983 = vmatprep.subr.bf16.mxu0 %v2684_v8 }
 0xe28   : > { %1984 = vmatpush3.bf16.msra.mxu0 %v2184_v51 }
 0xe29   : > { %1985 = vmatprep.subr.bf16.mxu0 %v2684_v8 }
 0xe2c   : > { %1986 = vmatpush3.bf16.msra.mxu0 %v2185_v52 }
 0xe2d   : > { %1987 = vmatprep.subr.bf16.mxu0 %v2684_v8 }
 0xe30   : > { %1988 = vmatpush3.bf16.msra.mxu0 %v2186_v53 }
 0xee6   : > { %v1343_v20 = vpop.f32.mrb[16].mxu0 }
 0xee7   : > { %v1349_v21 = vadd.f32 %v1343_v20, %v1190_v6  ;;  %v1963_v22 = vpop.f32.mrb[17].mxu0 }
 0xee8   : > { %v1346_v24 = vpop.f32.mrb[18].mxu0 }
 0xee9   : > { %v1350_v26 = vadd.f32 %v1349_v21, %v3175_v0  ;;  %v1964_v27 = vpop.f32.mrb[19].mxu0 }
 0xeeb   : > { %v3278_v28 = vadd.f32 %v1825_v23, %v1350_v26 }
 0xeed   : > { %v1361_v29 = vsel %vm618_vm0, %v3278_v28, 0.0 }
 0xeee   : > { %1362 = vadd.xlane.f32.xlu1 %v1361_v29 }
 0xf7b   : > { %v1363_v30 = vpop.xlane.xlu1 %1362 }
 0xf7c   : > { %v1364_v31 = vmul.f32 0.03125, %v1363_v30 }
 0xf7e   : > { %v1365_v32 = vsub.f32 %v3278_v28, %v1364_v31 }
 0xf80   : > { %v1366_v33 = vmul.f32 %v1365_v32, %v1365_v32 }
 0xf82   : > { %v1367_v34 = vsel %vm618_vm0, %v1366_v33, 0.0 }
 0xf83   : > { %1368 = vadd.xlane.f32.xlu0 %v1367_v34 }
0x1010   : > { %v1369_v0 = vpop.xlane.xlu0 %1368 }
0x1011   : > { %v1370_v37 = vmul.f32 0.03125, %v1369_v0 }
0x1013   : > { %v1371_v38 = vadd.f32 1e-05, %v1370_v37 }
0x1015   : > { %2205 = vrsqrt.f32 %v1371_v38 }
0x101f   : > { %v2206_v39 = vpop.eup %2205 }
0x1020   : > { %v1373_v41 = vmul.f32 %v2206_v39, %v1365_v32 }
0x1022   : > { %v1380_v43 = vmul.f32 %v1826_v40, %v1373_v41 }
0x1024   : > { %v1387_v44 = vadd.f32 %v1827_v42, %v1380_v43 }
0x1026   : > { %v1388_v45 = vpack.c.bf16 %v1387_v44, %v1387_v44 }
0x1028   : > { %1970 = vmatmul.mubr.msk.bf16.vlgmr.msra.gmra.mrb[32].mxu1 %vm618_vm0, %v1388_v45 }
0x10fb   : > { %v1449_v55 = vpop.f32.mrb[32].mxu1 }
0x10fc   : > { %v1450_v56 = vadd.f32 %v1828_v54, %v1449_v55  ;;  %v1971_v57 = vpop.f32.mrb[33].mxu1 }
0x10fd   : > { %v1452_v58 = vpop.f32.mrb[34].mxu1 }
0x10fe   : > { %v1832_v59 = vmul.f32 -1.702, %v1450_v56  ;;  %v1972_v60 = vpop.f32.mrb[35].mxu1 }
0x1100   : > { %v1457_v61 = vmul.f32 1.442695, %v1832_v59 }
0x1102   : > { %2207 = vpow2.f32 %v1457_v61 }
0x110c   : > { %v2208_v62 = vpop.eup %2207 }
0x110d   : > { %v1459_v63 = vadd.f32 1.0, %v2208_v62 }
0x110f   : > { %2209 = vrcp.f32 %v1459_v63 }
0x1119   : > { %v2210_v1 = vpop.eup %2209 }
0x111a   : > { %v1462_v2 = vmul.f32 %v2210_v1, %v1450_v56 }
0x111c   : > { %v1463_v8 = vpack.c.bf16 %v1462_v2, %v1462_v2 }
0x111e   : > { %1990 = vmatmul.mubr.bf16.vlgmr.msra.gmra.mrb[20].mxu0 %v1463_v8 }
0x11f1   : > { %v1569_v4 = vpop.f32.mrb[20].mxu0 }
0x11f2   : > { %v1570_v5 = vadd.f32 %v1833_v3, %v1569_v4  ;;  %v1991_v25 = vpop.f32.mrb[21].mxu0 }
0x11f3   : > { %v1572_v6 = vpop.f32.mrb[22].mxu0 }
0x11f4   : > { %v1575_v7 = vadd.f32 %v1570_v5, %v3278_v28  ;;  %v1992_v9 = vpop.f32.mrb[23].mxu0 }
0x11f6   : > { %1576 = vst.msk [vmem:[%s613_s14] sm:$0xff] %vm618_vm0, %v1575_v7 }
0x11f7   : > { %2590 = shalt.err (!%p2587_p7)
}
0x11f8   : > { %s2591_s19 = scalar_lea.hbm %s3300_s2, 128  ;;  %s2595_s16 = scalar_lea.hbm %s3404_s30, 256 }
0x11f9   : > { %p2592_p6 = scmp.ne.s32.totalorder %s3300_s2, %s2591_s19  ;;  %p2596_p13 = scmp.lt.u32.totalorder %s3300_s2, %s3404_s30 }
0x11fa   : > { %p2597_p1 = scmp.lt.u32.totalorder %s2595_s16, %s2591_s19  ;;  %p2599_p2 = scmp.lt.u32.totalorder %s2591_s19, %s3300_s2 }
0x11fb   : > { %p2593_p9 = pnand %p2592_p6, %p3405_p0 }
0x11fc   : > { %p2598_p3 = por %p2597_p1, %p2596_p13 }
0x11fd   : > { %p2594_p4 = pneg %p2593_p9 }
0x11fe   : > { %p2600_p10 = por %p2599_p2, %p2598_p3 }
0x1200   : > { %p2601_p11 = pnand %p2600_p10, %p2594_p4 }
0x1202   : > { %2604 = shalt.err (!%p2601_p11)
}
0x1203   : > { %2043 = dma.vmem_to_hbm [thread:$0]  (%p3405_p0), %s3302_s13, 128, %s3300_s2, %s1578_s0  }
0x1204 PF: > { %s1603_s15 = sand.u32 1, %s2655_s25   ;;  %p3406_p12 = scmp.ne.s32.totalorder %s3386_s21, 0 }
0x1205   : > { %p3407_p8 = scmp.ge.s32.totalorder %s2667_s28, 2  ;;  %s1604_s23 = scalar_lea.sflag [#allocation4], %s1603_s15 }
0x1207   : > { %p2087_p5 = pnand %p3407_p8, %p3406_p12 }
0x1209   : > { %2650 = dma.done.wait (!%p2087_p5), %s1604_s23, 128  }
0x120a   : > { %2652 = vsyncadd (!%p2087_p5), %s1604_s23, 4294967168  ;;  %p32_p7 = scmp.ge.s32.totalorder %s3065_s18, 4   ;;  %s3408_s25 = smov %s2659_s26 }
0x120b   : > { %s3409_s26 = smov %s2663_s27  ;;  %s3410_s27 = smov %s3076_s29 }
0x120c   : > { %s3411_s28 = smov %s3065_s18  ;;  %34 = sbr.rel (!%p32_p7) target bundleno = 17 (0x11), region = 165 }
0x1213   :  { %1609 = vsyncpa [#allocation3], 1 }
0x1214   :  { %1611 = vsyncpa [#allocation3 + $0x1], 1 }
0x1215   :  { %1612 = vsyncpa [#allocation6], 1 }
0x1216   :  { %1613 = vsyncpa [#allocation9], 1 }
0x1217   :  { %1614 = vsyncpa [#allocation12], 1 }
0x1218   :  { %1615 = vsyncpa [#allocation15], 1 }
0x1219   :  { %1616 = vsyncpa [#allocation18], 1 }
0x121a   :  { %1617 = vsyncpa [#allocation21], 1 }
0x121b   :  { %1618 = vsyncpa [#allocation4], 1 }
0x121c   :  { %1620 = vsyncpa [#allocation4 + $0x1], 1 }

</bundles_post_ra>
